<compile_context>
chip_gen: v7x
topology: tpu7x:2x2x1
jax: 0.10.0
libtpu: 0.0.40
codegen_flags: <defaults>
</compile_context>

<pallas_src>
import functools
import math

import jax
import jax.numpy as jnp
from jax.experimental import pallas as pl
from jax.experimental.pallas import tpu as pltpu


HIDDEN1 = 32
HIDDEN2 = 8
HEADS = 8
NUM_LAYERS = 3
NUM_INNER = NUM_LAYERS - 1

# ---- packed parameter-vector row layout (all rows are length HIDDEN1=32) ----
PV_CONV1_W0 = 0          # Linear(1,32) weight as a row
PV_CONV1_B0 = 1
PV_CONV1_B1 = 2
PV_CONV1_BN_S = 3
PV_CONV1_BN_B = 4
PV_GIN_BASE = 5          # + 6*i : b0, b1, mlp_bn_s, mlp_bn_b, outer_bn_s, outer_bn_b
PV_LIN1_B = PV_GIN_BASE + 6 * NUM_INNER     # 17
PV_BN2_S = PV_LIN1_B + 1                    # 18
PV_BN2_B = PV_LIN1_B + 2                    # 19
PV_LIN2_W = PV_LIN1_B + 3                   # 20  (Linear(32,1) weight as a row)
PV_SCALARS = PV_LIN1_B + 4                  # 21  [eps_0 .. eps_{NI-1}, lin2_bias, ...]
PV_ROWS = ((PV_SCALARS + 1 + 7) // 8) * 8   # pad row count to a multiple of 8

OUT_LANES = 128          # lane-dense output slabs
N_GRAPH_STATS = 11


# =============================================================================
# The fused kernel: one grid step == one graph of the batch.
# =============================================================================
def _fused_forward_kernel(a_ref, xr_ref, pv_ref, wstk_ref, wgat_ref, att_ref,
                          wlin1_ref, node_out_ref, graph_out_ref,
                          *, n_valid, gat_slope, leaky_slope):
    f32 = jnp.float32
    A = a_ref[0]                         # [n, n] adjacency of this graph (no self loops)
    xr = xr_ref[0]                       # [n, 2]  col0 = data.x, col1 = uniform rand
    x0 = xr[:, 0:1]
    rnd = xr[:, 1:2]
    pv = pv_ref[...]                     # [PV_ROWS, 32]
    Wg = wgat_ref[...]                   # [32, H*D]
    Wl1 = wlin1_ref[...]                 # [H*D, 32]
    att_src = att_ref[0]                 # [H, D]
    att_dst = att_ref[1]                 # [H, D]
    att_bias = att_ref[2]                # [H, D]

    n = A.shape[0]
    D = HIDDEN2

    # valid-node mask (handles padding of nodes_per_graph up to a multiple of 8)
    row_ids = jax.lax.broadcasted_iota(jnp.int32, (n, 1), 0)
    valid = (row_ids < n_valid).astype(f32)                        # [n, 1]

    # degree as a row-sum (no A @ ones matmul)
    deg = jnp.sum(A, axis=1, keepdims=True)                        # [n, 1]

    # ---- mask = get_mask(x, edge_index, 1);  A @ x reused by conv1 ----------
    ax = jnp.dot(A, x0, preferred_element_type=f32)                # [n, 1]
    mask = (ax > 0).astype(f32) * valid

    # ---- conv1: GINConv(eps=0), MLP = Linear(1,32)-ReLU-Linear(32,32)-ReLU-BN
    agg = x0 + ax
    h = agg * pv[PV_CONV1_W0:PV_CONV1_W0 + 1, :] + pv[PV_CONV1_B0:PV_CONV1_B0 + 1, :]
    h = jnp.maximum(h, 0.0)
    h = jnp.dot(h, wstk_ref[0], preferred_element_type=f32) + pv[PV_CONV1_B1:PV_CONV1_B1 + 1, :]
    h = jnp.maximum(h, 0.0)
    h = h * pv[PV_CONV1_BN_S:PV_CONV1_BN_S + 1, :] + pv[PV_CONV1_BN_B:PV_CONV1_BN_B + 1, :]
    xh = h * mask

    # ---- inner GIN layers (residual, mask propagation, BN) — all in VMEM ----
    for i in range(NUM_INNER):
        base = PV_GIN_BASE + 6 * i
        eps = pv[PV_SCALARS:PV_SCALARS + 1, i:i + 1]               # (1, 1)
        a_xh = jnp.dot(A, xh, preferred_element_type=f32)
        agg = (1.0 + eps) * xh + a_xh
        h = jnp.dot(agg, wstk_ref[1 + 2 * i], preferred_element_type=f32) + pv[base:base + 1, :]
        h = jnp.maximum(h, 0.0)
        h = jnp.dot(h, wstk_ref[2 + 2 * i], preferred_element_type=f32) + pv[base + 1:base + 2, :]
        h = jnp.maximum(h, 0.0)
        h = h * pv[base + 2:base + 3, :] + pv[base + 3:base + 4, :]   # GIN-MLP BN
        xh = xh + h
        mask = (jnp.dot(A, mask, preferred_element_type=f32) > 0).astype(f32) * valid
        xh = xh * mask
        xh = xh * pv[base + 4:base + 5, :] + pv[base + 5:base + 6, :]  # outer BN

    # ---- conv2: GATAConv (all HEADS heads in this one kernel) ----------------
    xw = jnp.dot(xh, Wg, preferred_element_type=f32)               # [n, H*D]
    # mask propagation of this layer does not depend on the attention output
    mask = (jnp.dot(A, mask, preferred_element_type=f32) > 0).astype(f32) * valid

    r_idx = jax.lax.broadcasted_iota(jnp.int32, (n, n), 0)
    c_idx = jax.lax.broadcasted_iota(jnp.int32, (n, n), 1)
    has_edge = jnp.logical_or(A > 0, r_idx == c_idx)               # adjacency + self loops

    # lin1(concat_h(out_h + b_h) * mask) = sum_h ((out_h + b_h) * mask) @ Wl1_rows_h
    # (avoids building the concatenated [n, H*D] GAT output)
    lin1_acc = jnp.zeros((n, HIDDEN1), f32)
    for hd in range(HEADS):
        xw_h = xw[:, hd * D:(hd + 1) * D]                          # [n, D]
        # attention scores: VPU reduction for a_src, lane-wide row for a_dst
        a_s = jnp.sum(xw_h * att_src[hd:hd + 1, :], axis=-1, keepdims=True)   # [n, 1]
        a_d = jax.lax.dot_general(att_dst[hd:hd + 1, :], xw_h,
                                  (((1,), (1,)), ((), ())),
                                  preferred_element_type=f32)      # [1, n]
        logits = a_s + a_d                                         # [n, n]
        logits = jnp.where(logits > 0, logits, gat_slope * logits)  # LeakyReLU(0.2)
        logits = jnp.where(has_edge, logits, f32(-1e30))
        m = jnp.max(logits, axis=-1, keepdims=True)
        p = jnp.exp(logits - m)
        p = jnp.where(has_edge, p, 0.0)
        alpha = p * pl.reciprocal(jnp.sum(p, axis=-1, keepdims=True), approx=True)
        out_h = jnp.dot(alpha, xw_h, preferred_element_type=f32) + att_bias[hd:hd + 1, :]
        lin1_acc = lin1_acc + jnp.dot(out_h * mask, Wl1[hd * D:(hd + 1) * D, :],
                                      preferred_element_type=f32)

    # ---- lin1 + LeakyReLU, mask, bn2, dropout(eval)=id, lin2 + LeakyReLU -----
    h = lin1_acc + pv[PV_LIN1_B:PV_LIN1_B + 1, :]
    h = jnp.where(h > 0, h, leaky_slope * h)
    h = h * mask
    h = h * pv[PV_BN2_S:PV_BN2_S + 1, :] + pv[PV_BN2_B:PV_BN2_B + 1, :]
    # lin2 (32 -> 1) as a VPU reduction (no 1-lane MXU output)
    z = jnp.sum(h * pv[PV_LIN2_W:PV_LIN2_W + 1, :], axis=-1, keepdims=True) \
        + pv[PV_SCALARS:PV_SCALARS + 1, NUM_INNER:NUM_INNER + 1]
    z = jnp.where(z > 0, z, leaky_slope * z)
    z = z * mask                                                   # [n, 1]

    # ---- per-graph min/max normalization (segment == this grid step) ---------
    big = f32(1e30)
    gmax = jnp.max(jnp.where(valid > 0, z, -big), axis=0, keepdims=True)   # (1,1)
    gmin = jnp.min(jnp.where(valid > 0, z, big), axis=0, keepdims=True)
    z = (z - gmin) / (gmax + 1e-6 - gmin)
    probs = z * mask + mask * 1e-6

    # ---- hard sample + edge-weight propagation -------------------------------
    x2 = (probs - rnd > 0).astype(f32)
    a_probs = jnp.dot(A, probs, preferred_element_type=f32)
    a_x2 = jnp.dot(A, x2, preferred_element_type=f32)

    # ---- per-graph scatter_add reductions (sublane reductions, lane-dense out)
    stat_cols = [
        deg,               # 0  totalvol
        valid,             # 1  totalcard
        deg * mask,        # 2  recvol_hard
        mask,              # 3  reccard_hard / rec_field
        probs * deg,       # 4  vol_1
        probs,             # 5  card_1
        x2,                # 6  set_size
        deg * x2,          # 7  vol_hard
        probs * probs,     # 8  2 * self_sums
        probs * a_probs,   # 9  2 * expected_weight_G
        x2 * a_x2,         # 10 2 * set_weight
    ]
    lane_g = jax.lax.broadcasted_iota(jnp.int32, (8, OUT_LANES), 1)
    gout = jnp.zeros((8, OUT_LANES), f32)
    for k, col in enumerate(stat_cols):
        s = jnp.sum(col * valid, axis=0, keepdims=True)            # (1, 1)
        gout = gout + jnp.where(lane_g == k, s, 0.0)
    graph_out_ref[0] = gout

    lane_n = jax.lax.broadcasted_iota(jnp.int32, (n, OUT_LANES), 1)
    node_slab = (jnp.where(lane_n == 0, probs, 0.0)
                 + jnp.where(lane_n == 1, x2, 0.0)
                 + jnp.where(lane_n == 2, mask, 0.0)
                 + jnp.where(lane_n == 3, deg, 0.0))
    node_out_ref[0] = node_slab


def fused_forward(A_blocks, x_nodes, rand_nodes, packed, *, n_valid):
    G, n, _ = A_blocks.shape
    pv, wstk, wgat, att, wlin1 = packed
    xr = jnp.stack([x_nodes, rand_nodes], axis=-1).astype(jnp.float32)   # [G, n, 2]

    kernel = functools.partial(_fused_forward_kernel, n_valid=n_valid,
                               gat_slope=0.2, leaky_slope=0.01)
    node_out, graph_out = pl.pallas_call(
        kernel,
        out_shape=(
            jax.ShapeDtypeStruct((G, n, OUT_LANES), jnp.float32),
            jax.ShapeDtypeStruct((G, 8, OUT_LANES), jnp.float32),
        ),
        grid=(G,),
        in_specs=[
            pl.BlockSpec((1, n, n), lambda g: (g, 0, 0)),        # adjacency block
            pl.BlockSpec((1, n, 2), lambda g: (g, 0, 0)),        # [x | rand]
            pl.BlockSpec(pv.shape, lambda g: (0, 0)),            # packed vectors
            pl.BlockSpec(wstk.shape, lambda g: (0, 0, 0)),       # stacked 32x32 weights
            pl.BlockSpec(wgat.shape, lambda g: (0, 0)),          # GAT weight
            pl.BlockSpec(att.shape, lambda g: (0, 0, 0)),        # att_src|att_dst|bias
            pl.BlockSpec(wlin1.shape, lambda g: (0, 0)),         # lin1 weight
        ],
        out_specs=(
            pl.BlockSpec((1, n, OUT_LANES), lambda g: (g, 0, 0)),
            pl.BlockSpec((1, 8, OUT_LANES), lambda g: (g, 0, 0)),
        ),
        compiler_params=pltpu.CompilerParams(
            dimension_semantics=("parallel",)),   # graphs are independent -> both v7x TCs
    )(A_blocks.astype(jnp.float32), xr, pv, wstk, wgat, att, wlin1)
    # TODO(synk): for very large per-graph node counts, the n*n adjacency block
    # would need bf16 storage and a K-tiled accumulator grid axis to stay inside
    # VMEM; not required at the benchmarked sizes.
    return node_out, graph_out


# =============================================================================
# Parameters (deterministic in-script init, eval-mode BN folded to scale/shift)
# =============================================================================
def init_params(key):
    ks = iter(jax.random.split(key, 64))

    def glorot(shape):
        fi, fo = shape[0], shape[-1]
        lim = math.sqrt(6.0 / (fi + fo))
        return jax.random.uniform(next(ks), shape, jnp.float32, -lim, lim)

    bn_scale = jnp.full((HIDDEN1,), 1.0 / math.sqrt(1.0 + 1e-5), jnp.float32)
    bn_shift = jnp.zeros((HIDDEN1,), jnp.float32)
    zeros32 = jnp.zeros((HIDDEN1,), jnp.float32)

    pv = jnp.zeros((PV_ROWS, HIDDEN1), jnp.float32)
    pv = pv.at[PV_CONV1_W0].set(glorot((1, HIDDEN1)).reshape(HIDDEN1))
    pv = pv.at[PV_CONV1_B0].set(zeros32)
    pv = pv.at[PV_CONV1_B1].set(zeros32)
    pv = pv.at[PV_CONV1_BN_S].set(bn_scale)
    pv = pv.at[PV_CONV1_BN_B].set(bn_shift)

    wstk = [glorot((HIDDEN1, HIDDEN1))]                       # conv1 second Linear
    for i in range(NUM_INNER):
        base = PV_GIN_BASE + 6 * i
        wstk.append(glorot((HIDDEN1, HIDDEN1)))               # gin_i Linear 0
        wstk.append(glorot((HIDDEN1, HIDDEN1)))               # gin_i Linear 1
        pv = pv.at[base + 0].set(zeros32)                     # b0
        pv = pv.at[base + 1].set(zeros32)                     # b1
        pv = pv.at[base + 2].set(bn_scale)                    # GIN-MLP BN
        pv = pv.at[base + 3].set(bn_shift)
        pv = pv.at[base + 4].set(bn_scale)                    # outer BN (self.bns[i])
        pv = pv.at[base + 5].set(bn_shift)
        pv = pv.at[PV_SCALARS, i].set(0.0)                    # train_eps=True, init 0
    wstk = jnp.stack(wstk, axis=0)                            # [1 + 2*NUM_INNER, 32, 32]

    wgat = glorot((HIDDEN1, HEADS * HIDDEN2))
    att = glorot((HEADS, 2 * HIDDEN2))
    att_pack = jnp.stack([att[:, :HIDDEN2], att[:, HIDDEN2:],
                          jnp.zeros((HEADS, HIDDEN2), jnp.float32)], axis=0)   # [3, H, D]

    wlin1 = glorot((HEADS * HIDDEN2, HIDDEN1))
    pv = pv.at[PV_LIN1_B].set(zeros32)
    pv = pv.at[PV_BN2_S].set(bn_scale)
    pv = pv.at[PV_BN2_B].set(bn_shift)
    pv = pv.at[PV_LIN2_W].set(glorot((HIDDEN1, 1)).reshape(HIDDEN1))
    pv = pv.at[PV_SCALARS, NUM_INNER].set(0.0)                # lin2 bias

    return pv, wstk, wgat, att_pack, wlin1


# =============================================================================
# Forward pass (mirrors cliqueMPNN_hindsight.forward, edge_dropout=None)
# =============================================================================
def forward(params_packed, A_blocks, x_nodes, sample_key, *, nodes_per_graph,
            penalty_coeff=0.25):
    G, n_pad, _ = A_blocks.shape
    rnd = jax.random.uniform(sample_key, (G, n_pad), dtype=jnp.float32)
    node_out, graph_out = fused_forward(A_blocks, x_nodes, rnd, params_packed,
                                        n_valid=nodes_per_graph)

    probs = node_out[:, :nodes_per_graph, 0].reshape(-1, 1)          # [N, 1]
    sums = graph_out[:, 0, :N_GRAPH_STATS]                           # [G, 11]

    totalvol = sums[:, 0:1] + 1e-6
    totalcard = sums[:, 1:2] + 1e-6          # computed (unused) as in torch
    recvol_hard = sums[:, 2:3] + 1e-6
    reccard_hard = sums[:, 3:4] + 1e-6       # computed (unused) as in torch
    rec_field = sums[:, 3:4] + 1e-6
    vol_1 = sums[:, 4:5] + 1e-6
    card_1 = sums[:, 5:6]
    set_size = sums[:, 6:7]
    vol_hard = sums[:, 7:8] + 1e-6
    self_sums = sums[:, 8:9] / 2.0
    expected_weight_G = sums[:, 9:10] / 2.0
    set_weight = sums[:, 10:11] / 2.0 + 1e-6

    rec_field_ratio = set_size / rec_field          # computed (unused) as in torch
    rec_field_volratio = vol_hard / recvol_hard     # computed (unused) as in torch
    total_vol_ratio = vol_hard / totalvol

    # conv1d trick == (sum probs)^2 / 2 per graph
    pairwise_prodsums = (card_1 ** 2) / 2.0
    expected_clique_weight = pairwise_prodsums - self_sums
    expected_distance = expected_clique_weight - expected_weight_G
    expected_loss = expected_distance * 0.5 - penalty_coeff * expected_weight_G
    # TODO(synk): lambda_factors = rand(30,1)*penalty-0.1 is generated but unused upstream; skipped.

    clique_edges_hard = set_size * (set_size - 1) / 2 + 1e-6
    clique_dist_hard = set_weight / clique_edges_hard
    loss = expected_loss
    current_edge_percentage = jnp.float32(1.0)      # edge_dropout is None

    retdict = {}
    retdict["output"] = [jnp.squeeze(probs, -1), "hist"]
    retdict["clique_check"] = [clique_edges_hard, "hist"]
    retdict["set_weight_check"] = [set_weight, "hist"]
    retdict["Expected_volume"] = [vol_1.mean(), "sequence"]
    retdict["Expected_cardinality"] = [card_1.mean(), "sequence"]
    retdict["Set sizes"] = [jnp.squeeze(set_size, -1), "hist"]
    retdict["volume_hard"] = [vol_hard.mean(), "aux"]
    retdict["cardinality_hard"] = [set_size[0], "sequence"]
    retdict["Expected weight(G)"] = [expected_weight_G.mean(), "sequence"]
    retdict["Expected maximum weight"] = [expected_clique_weight.mean(), "sequence"]
    retdict["Expected distance"] = [expected_distance.mean(), "sequence"]
    retdict["Currvol/Cliquevol"] = [clique_dist_hard.mean(), "sequence"]
    retdict["Currvol/Cliquevol all graphs in batch"] = [jnp.squeeze(clique_dist_hard, -1), "hist"]
    retdict["Average ratio of total volume"] = [total_vol_ratio.mean(), "sequence"]
    retdict["Current edge percentage"] = [current_edge_percentage, "sequence"]
    retdict["loss"] = [jnp.squeeze(loss.mean()), "sequence"]
    return retdict


# =============================================================================
# Synthetic graph data: block adjacency [G, n, n], node features [G, n]
# =============================================================================
def build_graph(key, num_graphs, nodes_per_graph):
    n_pad = max(8, ((nodes_per_graph + 7) // 8) * 8)
    eye_s = jnp.eye(nodes_per_graph, dtype=jnp.float32)
    blocks = []
    for g in range(num_graphs):
        kk = jax.random.fold_in(key, 100 + g)
        up = jnp.triu(jax.random.bernoulli(kk, 0.35, (nodes_per_graph, nodes_per_graph))
                      .astype(jnp.float32), k=1)
        ring = jnp.eye(nodes_per_graph, k=1, dtype=jnp.float32)
        sub = jnp.clip(up + up.T + ring + ring.T, 0.0, 1.0) * (1.0 - eye_s)
        sub = jnp.pad(sub, ((0, n_pad - nodes_per_graph), (0, n_pad - nodes_per_graph)))
        blocks.append(sub)
    A_blocks = jnp.stack(blocks, axis=0)                                 # [G, n_pad, n_pad]
    x_nodes = jnp.pad(jnp.ones((num_graphs, nodes_per_graph), jnp.float32),
                      ((0, 0), (0, n_pad - nodes_per_graph)))            # data.x (ones)
    return A_blocks, x_nodes


if __name__ == "__main__":
    key = jax.random.PRNGKey(0)
    k_params, k_graph, k_sample = jax.random.split(key, 3)

    num_graphs, nodes_per_graph = 2, 16
    A_blocks, x_nodes = build_graph(k_graph, num_graphs, nodes_per_graph)
    params = init_params(k_params)

    retdict = forward(params, A_blocks, x_nodes, k_sample,
                      nodes_per_graph=nodes_per_graph, penalty_coeff=0.25)

    jax.block_until_ready(retdict["loss"][0])
    jax.block_until_ready(retdict["output"][0])
    print("KERNEL_OK")
</pallas_src>

<mosaic_0001>
module attributes {stable_mosaic.version = 11 : i64} {
  func.func @_fused_forward_kernel(%arg0: i32, %arg1: memref<1x16x16xf32, #tpu.memory_space<vmem>>, %arg2: memref<1x16x2xf32, #tpu.memory_space<vmem>>, %arg3: memref<24x32xf32, #tpu.memory_space<vmem>>, %arg4: memref<5x32x32xf32, #tpu.memory_space<vmem>>, %arg5: memref<32x64xf32, #tpu.memory_space<vmem>>, %arg6: memref<3x8x8xf32, #tpu.memory_space<vmem>>, %arg7: memref<64x32xf32, #tpu.memory_space<vmem>>, %arg8: memref<1x16x128xf32, #tpu.memory_space<vmem>>, %arg9: memref<1x8x128xf32, #tpu.memory_space<vmem>>) attributes {dimension_semantics = [#tpu.dimension_semantics<parallel>], iteration_bounds = array<i64: 2>, scalar_prefetch = 0 : i64, scratch_operands = 0 : i64, tpu.core_type = #tpu.core_type<tc>, window_params = [{transform_indices = @transform_0, window_bounds = array<i64: 1, 16, 16>}, {transform_indices = @transform_1, window_bounds = array<i64: 1, 16, 2>}, {pipeline_mode = #tpu.pipeline_mode<synchronous>, transform_indices = @transform_2, window_bounds = array<i64: 24, 32>}, {pipeline_mode = #tpu.pipeline_mode<synchronous>, transform_indices = @transform_3, window_bounds = array<i64: 5, 32, 32>}, {pipeline_mode = #tpu.pipeline_mode<synchronous>, transform_indices = @transform_4, window_bounds = array<i64: 32, 64>}, {pipeline_mode = #tpu.pipeline_mode<synchronous>, transform_indices = @transform_5, window_bounds = array<i64: 3, 8, 8>}, {pipeline_mode = #tpu.pipeline_mode<synchronous>, transform_indices = @transform_6, window_bounds = array<i64: 64, 32>}, {transform_indices = @transform_7, window_bounds = array<i64: 1, 16, 128>}, {transform_indices = @transform_8, window_bounds = array<i64: 1, 8, 128>}]} {
    %c0 = arith.constant 0 : index
    %c0_0 = arith.constant 0 : index
    %c0_1 = arith.constant 0 : index
    %0 = vector.load %arg1[%c0, %c0_0, %c0_1] : memref<1x16x16xf32, #tpu.memory_space<vmem>>, vector<1x16x16xf32>
    %1 = vector.shape_cast %0 : vector<1x16x16xf32> to vector<16x16xf32>
    %c0_2 = arith.constant 0 : index
    %c0_3 = arith.constant 0 : index
    %c0_4 = arith.constant 0 : index
    %2 = vector.load %arg2[%c0_2, %c0_3, %c0_4] : memref<1x16x2xf32, #tpu.memory_space<vmem>>, vector<1x16x2xf32>
    %3 = vector.shape_cast %2 : vector<1x16x2xf32> to vector<16x2xf32>
    %4 = vector.extract_strided_slice %3 {offsets = [0, 0], sizes = [16, 1], strides = [1, 1]} : vector<16x2xf32> to vector<16x1xf32>
    %5 = vector.extract_strided_slice %3 {offsets = [0, 1], sizes = [16, 1], strides = [1, 1]} : vector<16x2xf32> to vector<16x1xf32>
    %c0_5 = arith.constant 0 : index
    %c0_6 = arith.constant 0 : index
    %6 = vector.load %arg3[%c0_5, %c0_6] : memref<24x32xf32, #tpu.memory_space<vmem>>, vector<24x32xf32>
    %c0_7 = arith.constant 0 : index
    %c0_8 = arith.constant 0 : index
    %7 = vector.load %arg5[%c0_7, %c0_8] : memref<32x64xf32, #tpu.memory_space<vmem>>, vector<32x64xf32>
    %c0_9 = arith.constant 0 : index
    %c0_10 = arith.constant 0 : index
    %8 = vector.load %arg7[%c0_9, %c0_10] : memref<64x32xf32, #tpu.memory_space<vmem>>, vector<64x32xf32>
    %c0_11 = arith.constant 0 : index
    %c0_12 = arith.constant 0 : index
    %c0_13 = arith.constant 0 : index
    %9 = vector.load %arg6[%c0_11, %c0_12, %c0_13] : memref<3x8x8xf32, #tpu.memory_space<vmem>>, vector<1x8x8xf32>
    %10 = vector.shape_cast %9 : vector<1x8x8xf32> to vector<8x8xf32>
    %c1 = arith.constant 1 : index
    %c0_14 = arith.constant 0 : index
    %c0_15 = arith.constant 0 : index
    %11 = vector.load %arg6[%c1, %c0_14, %c0_15] : memref<3x8x8xf32, #tpu.memory_space<vmem>>, vector<1x8x8xf32>
    %12 = vector.shape_cast %11 : vector<1x8x8xf32> to vector<8x8xf32>
    %c2 = arith.constant 2 : index
    %c0_16 = arith.constant 0 : index
    %c0_17 = arith.constant 0 : index
    %13 = vector.load %arg6[%c2, %c0_16, %c0_17] : memref<3x8x8xf32, #tpu.memory_space<vmem>>, vector<1x8x8xf32>
    %14 = vector.shape_cast %13 : vector<1x8x8xf32> to vector<8x8xf32>
    %15 = tpu.iota {dimensions = array<i32: 0>} : vector<16x1xi32>
    %c16_i32 = arith.constant 16 : i32
    %16 = vector.broadcast %c16_i32 : i32 to vector<16x1xi32>
    %17 = arith.cmpi slt, %15, %16 : vector<16x1xi32>
    %18 = arith.extui %17 : vector<16x1xi1> to vector<16x1xi32>
    %19 = arith.sitofp %18 : vector<16x1xi32> to vector<16x1xf32>
    %cst = arith.constant dense<0.000000e+00> : vector<16xf32>
    %20 = vector.multi_reduction <add>, %1, %cst [1] : vector<16x16xf32> to vector<16xf32>
    %21 = vector.shape_cast %20 : vector<16xf32> to vector<16x1xf32>
    %cst_18 = arith.constant dense<0.000000e+00> : vector<16x1xf32>
    %22 = tpu.matmul %1, %4, %cst_18 {dimension_numbers = #tpu.dot_dimension_numbers<[1], [0], [0], [1], [0, 0, 1, 1], [], []>} : vector<16x16xf32>, vector<16x1xf32>, vector<16x1xf32> -> vector<16x1xf32>
    %cst_19 = arith.constant 0.000000e+00 : f32
    %23 = vector.broadcast %cst_19 : f32 to vector<16x1xf32>
    %24 = arith.cmpf ogt, %22, %23 : vector<16x1xf32>
    %25 = arith.extui %24 : vector<16x1xi1> to vector<16x1xi32>
    %26 = arith.sitofp %25 : vector<16x1xi32> to vector<16x1xf32>
    %27 = arith.mulf %26, %19 : vector<16x1xf32>
    %28 = arith.addf %4, %22 : vector<16x1xf32>
    %29 = vector.extract_strided_slice %6 {offsets = [0, 0], sizes = [1, 32], strides = [1, 1]} : vector<24x32xf32> to vector<1x32xf32>
    %30 = vector.broadcast %28 : vector<16x1xf32> to vector<16x32xf32>
    %31 = vector.broadcast %29 : vector<1x32xf32> to vector<16x32xf32>
    %32 = arith.mulf %30, %31 : vector<16x32xf32>
    %33 = vector.extract_strided_slice %6 {offsets = [1, 0], sizes = [1, 32], strides = [1, 1]} : vector<24x32xf32> to vector<1x32xf32>
    %34 = vector.broadcast %33 : vector<1x32xf32> to vector<16x32xf32>
    %35 = arith.addf %32, %34 : vector<16x32xf32>
    %cst_20 = arith.constant 0.000000e+00 : f32
    %36 = vector.broadcast %cst_20 : f32 to vector<16x32xf32>
    %37 = arith.maximumf %35, %36 : vector<16x32xf32>
    %c0_21 = arith.constant 0 : index
    %c0_22 = arith.constant 0 : index
    %c0_23 = arith.constant 0 : index
    %38 = vector.load %arg4[%c0_21, %c0_22, %c0_23] : memref<5x32x32xf32, #tpu.memory_space<vmem>>, vector<1x32x32xf32>
    %39 = vector.shape_cast %38 : vector<1x32x32xf32> to vector<32x32xf32>
    %cst_24 = arith.constant dense<0.000000e+00> : vector<16x32xf32>
    %40 = tpu.matmul %37, %39, %cst_24 {dimension_numbers = #tpu.dot_dimension_numbers<[1], [0], [0], [1], [0, 0, 1, 1], [], []>} : vector<16x32xf32>, vector<32x32xf32>, vector<16x32xf32> -> vector<16x32xf32>
    %41 = vector.extract_strided_slice %6 {offsets = [2, 0], sizes = [1, 32], strides = [1, 1]} : vector<24x32xf32> to vector<1x32xf32>
    %42 = vector.broadcast %41 : vector<1x32xf32> to vector<16x32xf32>
    %43 = arith.addf %40, %42 : vector<16x32xf32>
    %cst_25 = arith.constant 0.000000e+00 : f32
    %44 = vector.broadcast %cst_25 : f32 to vector<16x32xf32>
    %45 = arith.maximumf %43, %44 : vector<16x32xf32>
    %46 = vector.extract_strided_slice %6 {offsets = [3, 0], sizes = [1, 32], strides = [1, 1]} : vector<24x32xf32> to vector<1x32xf32>
    %47 = vector.broadcast %46 : vector<1x32xf32> to vector<16x32xf32>
    %48 = arith.mulf %45, %47 : vector<16x32xf32>
    %49 = vector.extract_strided_slice %6 {offsets = [4, 0], sizes = [1, 32], strides = [1, 1]} : vector<24x32xf32> to vector<1x32xf32>
    %50 = vector.broadcast %49 : vector<1x32xf32> to vector<16x32xf32>
    %51 = arith.addf %48, %50 : vector<16x32xf32>
    %52 = vector.broadcast %27 : vector<16x1xf32> to vector<16x32xf32>
    %53 = arith.mulf %51, %52 : vector<16x32xf32>
    %54 = vector.extract_strided_slice %6 {offsets = [21, 0], sizes = [1, 1], strides = [1, 1]} : vector<24x32xf32> to vector<1x1xf32>
    %cst_26 = arith.constant dense<0.000000e+00> : vector<16x32xf32>
    %55 = tpu.matmul %1, %53, %cst_26 {dimension_numbers = #tpu.dot_dimension_numbers<[1], [0], [0], [1], [0, 0, 1, 1], [], []>} : vector<16x16xf32>, vector<16x32xf32>, vector<16x32xf32> -> vector<16x32xf32>
    %cst_27 = arith.constant 1.000000e+00 : f32
    %56 = vector.broadcast %cst_27 : f32 to vector<1x1xf32>
    %57 = arith.addf %56, %54 : vector<1x1xf32>
    %58 = vector.broadcast %57 : vector<1x1xf32> to vector<16x32xf32>
    %59 = arith.mulf %58, %53 : vector<16x32xf32>
    %60 = arith.addf %59, %55 : vector<16x32xf32>
    %c1_28 = arith.constant 1 : index
    %c0_29 = arith.constant 0 : index
    %c0_30 = arith.constant 0 : index
    %61 = vector.load %arg4[%c1_28, %c0_29, %c0_30] : memref<5x32x32xf32, #tpu.memory_space<vmem>>, vector<1x32x32xf32>
    %62 = vector.shape_cast %61 : vector<1x32x32xf32> to vector<32x32xf32>
    %cst_31 = arith.constant dense<0.000000e+00> : vector<16x32xf32>
    %63 = tpu.matmul %60, %62, %cst_31 {dimension_numbers = #tpu.dot_dimension_numbers<[1], [0], [0], [1], [0, 0, 1, 1], [], []>} : vector<16x32xf32>, vector<32x32xf32>, vector<16x32xf32> -> vector<16x32xf32>
    %64 = vector.extract_strided_slice %6 {offsets = [5, 0], sizes = [1, 32], strides = [1, 1]} : vector<24x32xf32> to vector<1x32xf32>
    %65 = vector.broadcast %64 : vector<1x32xf32> to vector<16x32xf32>
    %66 = arith.addf %63, %65 : vector<16x32xf32>
    %cst_32 = arith.constant 0.000000e+00 : f32
    %67 = vector.broadcast %cst_32 : f32 to vector<16x32xf32>
    %68 = arith.maximumf %66, %67 : vector<16x32xf32>
    %c2_33 = arith.constant 2 : index
    %c0_34 = arith.constant 0 : index
    %c0_35 = arith.constant 0 : index
    %69 = vector.load %arg4[%c2_33, %c0_34, %c0_35] : memref<5x32x32xf32, #tpu.memory_space<vmem>>, vector<1x32x32xf32>
    %70 = vector.shape_cast %69 : vector<1x32x32xf32> to vector<32x32xf32>
    %cst_36 = arith.constant dense<0.000000e+00> : vector<16x32xf32>
    %71 = tpu.matmul %68, %70, %cst_36 {dimension_numbers = #tpu.dot_dimension_numbers<[1], [0], [0], [1], [0, 0, 1, 1], [], []>} : vector<16x32xf32>, vector<32x32xf32>, vector<16x32xf32> -> vector<16x32xf32>
    %72 = vector.extract_strided_slice %6 {offsets = [6, 0], sizes = [1, 32], strides = [1, 1]} : vector<24x32xf32> to vector<1x32xf32>
    %73 = vector.broadcast %72 : vector<1x32xf32> to vector<16x32xf32>
    %74 = arith.addf %71, %73 : vector<16x32xf32>
    %cst_37 = arith.constant 0.000000e+00 : f32
    %75 = vector.broadcast %cst_37 : f32 to vector<16x32xf32>
    %76 = arith.maximumf %74, %75 : vector<16x32xf32>
    %77 = vector.extract_strided_slice %6 {offsets = [7, 0], sizes = [1, 32], strides = [1, 1]} : vector<24x32xf32> to vector<1x32xf32>
    %78 = vector.broadcast %77 : vector<1x32xf32> to vector<16x32xf32>
    %79 = arith.mulf %76, %78 : vector<16x32xf32>
    %80 = vector.extract_strided_slice %6 {offsets = [8, 0], sizes = [1, 32], strides = [1, 1]} : vector<24x32xf32> to vector<1x32xf32>
    %81 = vector.broadcast %80 : vector<1x32xf32> to vector<16x32xf32>
    %82 = arith.addf %79, %81 : vector<16x32xf32>
    %83 = arith.addf %53, %82 : vector<16x32xf32>
    %cst_38 = arith.constant dense<0.000000e+00> : vector<16x1xf32>
    %84 = tpu.matmul %1, %27, %cst_38 {dimension_numbers = #tpu.dot_dimension_numbers<[1], [0], [0], [1], [0, 0, 1, 1], [], []>} : vector<16x16xf32>, vector<16x1xf32>, vector<16x1xf32> -> vector<16x1xf32>
    %cst_39 = arith.constant 0.000000e+00 : f32
    %85 = vector.broadcast %cst_39 : f32 to vector<16x1xf32>
    %86 = arith.cmpf ogt, %84, %85 : vector<16x1xf32>
    %87 = arith.extui %86 : vector<16x1xi1> to vector<16x1xi32>
    %88 = arith.sitofp %87 : vector<16x1xi32> to vector<16x1xf32>
    %89 = arith.mulf %88, %19 : vector<16x1xf32>
    %90 = vector.broadcast %89 : vector<16x1xf32> to vector<16x32xf32>
    %91 = arith.mulf %83, %90 : vector<16x32xf32>
    %92 = vector.extract_strided_slice %6 {offsets = [9, 0], sizes = [1, 32], strides = [1, 1]} : vector<24x32xf32> to vector<1x32xf32>
    %93 = vector.broadcast %92 : vector<1x32xf32> to vector<16x32xf32>
    %94 = arith.mulf %91, %93 : vector<16x32xf32>
    %95 = vector.extract_strided_slice %6 {offsets = [10, 0], sizes = [1, 32], strides = [1, 1]} : vector<24x32xf32> to vector<1x32xf32>
    %96 = vector.broadcast %95 : vector<1x32xf32> to vector<16x32xf32>
    %97 = arith.addf %94, %96 : vector<16x32xf32>
    %98 = vector.extract_strided_slice %6 {offsets = [21, 1], sizes = [1, 1], strides = [1, 1]} : vector<24x32xf32> to vector<1x1xf32>
    %cst_40 = arith.constant dense<0.000000e+00> : vector<16x32xf32>
    %99 = tpu.matmul %1, %97, %cst_40 {dimension_numbers = #tpu.dot_dimension_numbers<[1], [0], [0], [1], [0, 0, 1, 1], [], []>} : vector<16x16xf32>, vector<16x32xf32>, vector<16x32xf32> -> vector<16x32xf32>
    %cst_41 = arith.constant 1.000000e+00 : f32
    %100 = vector.broadcast %cst_41 : f32 to vector<1x1xf32>
    %101 = arith.addf %100, %98 : vector<1x1xf32>
    %102 = vector.broadcast %101 : vector<1x1xf32> to vector<16x32xf32>
    %103 = arith.mulf %102, %97 : vector<16x32xf32>
    %104 = arith.addf %103, %99 : vector<16x32xf32>
    %c3 = arith.constant 3 : index
    %c0_42 = arith.constant 0 : index
    %c0_43 = arith.constant 0 : index
    %105 = vector.load %arg4[%c3, %c0_42, %c0_43] : memref<5x32x32xf32, #tpu.memory_space<vmem>>, vector<1x32x32xf32>
    %106 = vector.shape_cast %105 : vector<1x32x32xf32> to vector<32x32xf32>
    %cst_44 = arith.constant dense<0.000000e+00> : vector<16x32xf32>
    %107 = tpu.matmul %104, %106, %cst_44 {dimension_numbers = #tpu.dot_dimension_numbers<[1], [0], [0], [1], [0, 0, 1, 1], [], []>} : vector<16x32xf32>, vector<32x32xf32>, vector<16x32xf32> -> vector<16x32xf32>
    %108 = vector.extract_strided_slice %6 {offsets = [11, 0], sizes = [1, 32], strides = [1, 1]} : vector<24x32xf32> to vector<1x32xf32>
    %109 = vector.broadcast %108 : vector<1x32xf32> to vector<16x32xf32>
    %110 = arith.addf %107, %109 : vector<16x32xf32>
    %cst_45 = arith.constant 0.000000e+00 : f32
    %111 = vector.broadcast %cst_45 : f32 to vector<16x32xf32>
    %112 = arith.maximumf %110, %111 : vector<16x32xf32>
    %c4 = arith.constant 4 : index
    %c0_46 = arith.constant 0 : index
    %c0_47 = arith.constant 0 : index
    %113 = vector.load %arg4[%c4, %c0_46, %c0_47] : memref<5x32x32xf32, #tpu.memory_space<vmem>>, vector<1x32x32xf32>
    %114 = vector.shape_cast %113 : vector<1x32x32xf32> to vector<32x32xf32>
    %cst_48 = arith.constant dense<0.000000e+00> : vector<16x32xf32>
    %115 = tpu.matmul %112, %114, %cst_48 {dimension_numbers = #tpu.dot_dimension_numbers<[1], [0], [0], [1], [0, 0, 1, 1], [], []>} : vector<16x32xf32>, vector<32x32xf32>, vector<16x32xf32> -> vector<16x32xf32>
    %116 = vector.extract_strided_slice %6 {offsets = [12, 0], sizes = [1, 32], strides = [1, 1]} : vector<24x32xf32> to vector<1x32xf32>
    %117 = vector.broadcast %116 : vector<1x32xf32> to vector<16x32xf32>
    %118 = arith.addf %115, %117 : vector<16x32xf32>
    %cst_49 = arith.constant 0.000000e+00 : f32
    %119 = vector.broadcast %cst_49 : f32 to vector<16x32xf32>
    %120 = arith.maximumf %118, %119 : vector<16x32xf32>
    %121 = vector.extract_strided_slice %6 {offsets = [13, 0], sizes = [1, 32], strides = [1, 1]} : vector<24x32xf32> to vector<1x32xf32>
    %122 = vector.broadcast %121 : vector<1x32xf32> to vector<16x32xf32>
    %123 = arith.mulf %120, %122 : vector<16x32xf32>
    %124 = vector.extract_strided_slice %6 {offsets = [14, 0], sizes = [1, 32], strides = [1, 1]} : vector<24x32xf32> to vector<1x32xf32>
    %125 = vector.broadcast %124 : vector<1x32xf32> to vector<16x32xf32>
    %126 = arith.addf %123, %125 : vector<16x32xf32>
    %127 = arith.addf %97, %126 : vector<16x32xf32>
    %cst_50 = arith.constant dense<0.000000e+00> : vector<16x1xf32>
    %128 = tpu.matmul %1, %89, %cst_50 {dimension_numbers = #tpu.dot_dimension_numbers<[1], [0], [0], [1], [0, 0, 1, 1], [], []>} : vector<16x16xf32>, vector<16x1xf32>, vector<16x1xf32> -> vector<16x1xf32>
    %cst_51 = arith.constant 0.000000e+00 : f32
    %129 = vector.broadcast %cst_51 : f32 to vector<16x1xf32>
    %130 = arith.cmpf ogt, %128, %129 : vector<16x1xf32>
    %131 = arith.extui %130 : vector<16x1xi1> to vector<16x1xi32>
    %132 = arith.sitofp %131 : vector<16x1xi32> to vector<16x1xf32>
    %133 = arith.mulf %132, %19 : vector<16x1xf32>
    %134 = vector.broadcast %133 : vector<16x1xf32> to vector<16x32xf32>
    %135 = arith.mulf %127, %134 : vector<16x32xf32>
    %136 = vector.extract_strided_slice %6 {offsets = [15, 0], sizes = [1, 32], strides = [1, 1]} : vector<24x32xf32> to vector<1x32xf32>
    %137 = vector.broadcast %136 : vector<1x32xf32> to vector<16x32xf32>
    %138 = arith.mulf %135, %137 : vector<16x32xf32>
    %139 = vector.extract_strided_slice %6 {offsets = [16, 0], sizes = [1, 32], strides = [1, 1]} : vector<24x32xf32> to vector<1x32xf32>
    %140 = vector.broadcast %139 : vector<1x32xf32> to vector<16x32xf32>
    %141 = arith.addf %138, %140 : vector<16x32xf32>
    %cst_52 = arith.constant dense<0.000000e+00> : vector<16x64xf32>
    %142 = tpu.matmul %141, %7, %cst_52 {dimension_numbers = #tpu.dot_dimension_numbers<[1], [0], [0], [1], [0, 0, 1, 1], [], []>} : vector<16x32xf32>, vector<32x64xf32>, vector<16x64xf32> -> vector<16x64xf32>
    %cst_53 = arith.constant dense<0.000000e+00> : vector<16x1xf32>
    %143 = tpu.matmul %1, %133, %cst_53 {dimension_numbers = #tpu.dot_dimension_numbers<[1], [0], [0], [1], [0, 0, 1, 1], [], []>} : vector<16x16xf32>, vector<16x1xf32>, vector<16x1xf32> -> vector<16x1xf32>
    %cst_54 = arith.constant 0.000000e+00 : f32
    %144 = vector.broadcast %cst_54 : f32 to vector<16x1xf32>
    %145 = arith.cmpf ogt, %143, %144 : vector<16x1xf32>
    %146 = arith.extui %145 : vector<16x1xi1> to vector<16x1xi32>
    %147 = arith.sitofp %146 : vector<16x1xi32> to vector<16x1xf32>
    %148 = arith.mulf %147, %19 : vector<16x1xf32>
    %149 = tpu.iota {dimensions = array<i32: 0>} : vector<16x16xi32>
    %150 = tpu.iota {dimensions = array<i32: 1>} : vector<16x16xi32>
    %cst_55 = arith.constant 0.000000e+00 : f32
    %151 = vector.broadcast %cst_55 : f32 to vector<16x16xf32>
    %152 = arith.cmpf ogt, %1, %151 : vector<16x16xf32>
    %153 = arith.cmpi eq, %149, %150 : vector<16x16xi32>
    %154 = arith.ori %152, %153 : vector<16x16xi1>
    %cst_56 = arith.constant 0.000000e+00 : f32
    %155 = vector.broadcast %cst_56 : f32 to vector<16x32xf32>
    %156 = vector.extract_strided_slice %142 {offsets = [0, 0], sizes = [16, 8], strides = [1, 1]} : vector<16x64xf32> to vector<16x8xf32>
    %157 = vector.extract_strided_slice %10 {offsets = [0, 0], sizes = [1, 8], strides = [1, 1]} : vector<8x8xf32> to vector<1x8xf32>
    %158 = vector.broadcast %157 : vector<1x8xf32> to vector<16x8xf32>
    %159 = arith.mulf %156, %158 : vector<16x8xf32>
    %cst_57 = arith.constant dense<0.000000e+00> : vector<16xf32>
    %160 = vector.multi_reduction <add>, %159, %cst_57 [1] : vector<16x8xf32> to vector<16xf32>
    %161 = vector.shape_cast %160 : vector<16xf32> to vector<16x1xf32>
    %162 = vector.extract_strided_slice %12 {offsets = [0, 0], sizes = [1, 8], strides = [1, 1]} : vector<8x8xf32> to vector<1x8xf32>
    %cst_58 = arith.constant dense<0.000000e+00> : vector<1x16xf32>
    %163 = tpu.matmul %162, %156, %cst_58 {dimension_numbers = #tpu.dot_dimension_numbers<[1], [1], [0], [0], [0, 0, 1, 0], [], []>} : vector<1x8xf32>, vector<16x8xf32>, vector<1x16xf32> -> vector<1x16xf32>
    %164 = vector.broadcast %161 : vector<16x1xf32> to vector<16x16xf32>
    %165 = vector.broadcast %163 : vector<1x16xf32> to vector<16x16xf32>
    %166 = arith.addf %164, %165 : vector<16x16xf32>
    %cst_59 = arith.constant 0.000000e+00 : f32
    %167 = vector.broadcast %cst_59 : f32 to vector<16x16xf32>
    %168 = arith.cmpf ogt, %166, %167 : vector<16x16xf32>
    %cst_60 = arith.constant 2.000000e-01 : f32
    %169 = vector.broadcast %cst_60 : f32 to vector<16x16xf32>
    %170 = arith.mulf %169, %166 : vector<16x16xf32>
    %171 = arith.select %168, %166, %170 : vector<16x16xi1>, vector<16x16xf32>
    %cst_61 = arith.constant -1.000000e+30 : f32
    %172 = vector.broadcast %cst_61 : f32 to vector<16x16xf32>
    %173 = arith.select %154, %171, %172 : vector<16x16xi1>, vector<16x16xf32>
    %cst_62 = arith.constant dense<0xFF800000> : vector<16xf32>
    %174 = vector.multi_reduction <maximumf>, %173, %cst_62 [1] : vector<16x16xf32> to vector<16xf32>
    %175 = vector.shape_cast %174 : vector<16xf32> to vector<16x1xf32>
    %176 = vector.broadcast %175 : vector<16x1xf32> to vector<16x16xf32>
    %177 = arith.subf %173, %176 : vector<16x16xf32>
    %178 = math.exp %177 : vector<16x16xf32>
    %cst_63 = arith.constant 0.000000e+00 : f32
    %179 = vector.broadcast %cst_63 : f32 to vector<16x16xf32>
    %180 = arith.select %154, %178, %179 : vector<16x16xi1>, vector<16x16xf32>
    %cst_64 = arith.constant dense<0.000000e+00> : vector<16xf32>
    %181 = vector.multi_reduction <add>, %180, %cst_64 [1] : vector<16x16xf32> to vector<16xf32>
    %182 = vector.shape_cast %181 : vector<16xf32> to vector<16x1xf32>
    %183 = tpu.reciprocal %182 {approx = true} : vector<16x1xf32> -> vector<16x1xf32>
    %184 = vector.broadcast %183 : vector<16x1xf32> to vector<16x16xf32>
    %185 = arith.mulf %180, %184 : vector<16x16xf32>
    %cst_65 = arith.constant dense<0.000000e+00> : vector<16x8xf32>
    %186 = tpu.matmul %185, %156, %cst_65 {dimension_numbers = #tpu.dot_dimension_numbers<[1], [0], [0], [1], [0, 0, 1, 1], [], []>} : vector<16x16xf32>, vector<16x8xf32>, vector<16x8xf32> -> vector<16x8xf32>
    %187 = vector.extract_strided_slice %14 {offsets = [0, 0], sizes = [1, 8], strides = [1, 1]} : vector<8x8xf32> to vector<1x8xf32>
    %188 = vector.broadcast %187 : vector<1x8xf32> to vector<16x8xf32>
    %189 = arith.addf %186, %188 : vector<16x8xf32>
    %190 = vector.broadcast %148 : vector<16x1xf32> to vector<16x8xf32>
    %191 = arith.mulf %189, %190 : vector<16x8xf32>
    %192 = vector.extract_strided_slice %8 {offsets = [0, 0], sizes = [8, 32], strides = [1, 1]} : vector<64x32xf32> to vector<8x32xf32>
    %cst_66 = arith.constant dense<0.000000e+00> : vector<16x32xf32>
    %193 = tpu.matmul %191, %192, %cst_66 {dimension_numbers = #tpu.dot_dimension_numbers<[1], [0], [0], [1], [0, 0, 1, 1], [], []>} : vector<16x8xf32>, vector<8x32xf32>, vector<16x32xf32> -> vector<16x32xf32>
    %194 = arith.addf %155, %193 : vector<16x32xf32>
    %195 = vector.extract_strided_slice %142 {offsets = [0, 8], sizes = [16, 8], strides = [1, 1]} : vector<16x64xf32> to vector<16x8xf32>
    %196 = vector.extract_strided_slice %10 {offsets = [1, 0], sizes = [1, 8], strides = [1, 1]} : vector<8x8xf32> to vector<1x8xf32>
    %197 = vector.broadcast %196 : vector<1x8xf32> to vector<16x8xf32>
    %198 = arith.mulf %195, %197 : vector<16x8xf32>
    %cst_67 = arith.constant dense<0.000000e+00> : vector<16xf32>
    %199 = vector.multi_reduction <add>, %198, %cst_67 [1] : vector<16x8xf32> to vector<16xf32>
    %200 = vector.shape_cast %199 : vector<16xf32> to vector<16x1xf32>
    %201 = vector.extract_strided_slice %12 {offsets = [1, 0], sizes = [1, 8], strides = [1, 1]} : vector<8x8xf32> to vector<1x8xf32>
    %cst_68 = arith.constant dense<0.000000e+00> : vector<1x16xf32>
    %202 = tpu.matmul %201, %195, %cst_68 {dimension_numbers = #tpu.dot_dimension_numbers<[1], [1], [0], [0], [0, 0, 1, 0], [], []>} : vector<1x8xf32>, vector<16x8xf32>, vector<1x16xf32> -> vector<1x16xf32>
    %203 = vector.broadcast %200 : vector<16x1xf32> to vector<16x16xf32>
    %204 = vector.broadcast %202 : vector<1x16xf32> to vector<16x16xf32>
    %205 = arith.addf %203, %204 : vector<16x16xf32>
    %cst_69 = arith.constant 0.000000e+00 : f32
    %206 = vector.broadcast %cst_69 : f32 to vector<16x16xf32>
    %207 = arith.cmpf ogt, %205, %206 : vector<16x16xf32>
    %cst_70 = arith.constant 2.000000e-01 : f32
    %208 = vector.broadcast %cst_70 : f32 to vector<16x16xf32>
    %209 = arith.mulf %208, %205 : vector<16x16xf32>
    %210 = arith.select %207, %205, %209 : vector<16x16xi1>, vector<16x16xf32>
    %cst_71 = arith.constant -1.000000e+30 : f32
    %211 = vector.broadcast %cst_71 : f32 to vector<16x16xf32>
    %212 = arith.select %154, %210, %211 : vector<16x16xi1>, vector<16x16xf32>
    %cst_72 = arith.constant dense<0xFF800000> : vector<16xf32>
    %213 = vector.multi_reduction <maximumf>, %212, %cst_72 [1] : vector<16x16xf32> to vector<16xf32>
    %214 = vector.shape_cast %213 : vector<16xf32> to vector<16x1xf32>
    %215 = vector.broadcast %214 : vector<16x1xf32> to vector<16x16xf32>
    %216 = arith.subf %212, %215 : vector<16x16xf32>
    %217 = math.exp %216 : vector<16x16xf32>
    %cst_73 = arith.constant 0.000000e+00 : f32
    %218 = vector.broadcast %cst_73 : f32 to vector<16x16xf32>
    %219 = arith.select %154, %217, %218 : vector<16x16xi1>, vector<16x16xf32>
    %cst_74 = arith.constant dense<0.000000e+00> : vector<16xf32>
    %220 = vector.multi_reduction <add>, %219, %cst_74 [1] : vector<16x16xf32> to vector<16xf32>
    %221 = vector.shape_cast %220 : vector<16xf32> to vector<16x1xf32>
    %222 = tpu.reciprocal %221 {approx = true} : vector<16x1xf32> -> vector<16x1xf32>
    %223 = vector.broadcast %222 : vector<16x1xf32> to vector<16x16xf32>
    %224 = arith.mulf %219, %223 : vector<16x16xf32>
    %cst_75 = arith.constant dense<0.000000e+00> : vector<16x8xf32>
    %225 = tpu.matmul %224, %195, %cst_75 {dimension_numbers = #tpu.dot_dimension_numbers<[1], [0], [0], [1], [0, 0, 1, 1], [], []>} : vector<16x16xf32>, vector<16x8xf32>, vector<16x8xf32> -> vector<16x8xf32>
    %226 = vector.extract_strided_slice %14 {offsets = [1, 0], sizes = [1, 8], strides = [1, 1]} : vector<8x8xf32> to vector<1x8xf32>
    %227 = vector.broadcast %226 : vector<1x8xf32> to vector<16x8xf32>
    %228 = arith.addf %225, %227 : vector<16x8xf32>
    %229 = vector.broadcast %148 : vector<16x1xf32> to vector<16x8xf32>
    %230 = arith.mulf %228, %229 : vector<16x8xf32>
    %231 = vector.extract_strided_slice %8 {offsets = [8, 0], sizes = [8, 32], strides = [1, 1]} : vector<64x32xf32> to vector<8x32xf32>
    %cst_76 = arith.constant dense<0.000000e+00> : vector<16x32xf32>
    %232 = tpu.matmul %230, %231, %cst_76 {dimension_numbers = #tpu.dot_dimension_numbers<[1], [0], [0], [1], [0, 0, 1, 1], [], []>} : vector<16x8xf32>, vector<8x32xf32>, vector<16x32xf32> -> vector<16x32xf32>
    %233 = arith.addf %194, %232 : vector<16x32xf32>
    %234 = vector.extract_strided_slice %142 {offsets = [0, 16], sizes = [16, 8], strides = [1, 1]} : vector<16x64xf32> to vector<16x8xf32>
    %235 = vector.extract_strided_slice %10 {offsets = [2, 0], sizes = [1, 8], strides = [1, 1]} : vector<8x8xf32> to vector<1x8xf32>
    %236 = vector.broadcast %235 : vector<1x8xf32> to vector<16x8xf32>
    %237 = arith.mulf %234, %236 : vector<16x8xf32>
    %cst_77 = arith.constant dense<0.000000e+00> : vector<16xf32>
    %238 = vector.multi_reduction <add>, %237, %cst_77 [1] : vector<16x8xf32> to vector<16xf32>
    %239 = vector.shape_cast %238 : vector<16xf32> to vector<16x1xf32>
    %240 = vector.extract_strided_slice %12 {offsets = [2, 0], sizes = [1, 8], strides = [1, 1]} : vector<8x8xf32> to vector<1x8xf32>
    %cst_78 = arith.constant dense<0.000000e+00> : vector<1x16xf32>
    %241 = tpu.matmul %240, %234, %cst_78 {dimension_numbers = #tpu.dot_dimension_numbers<[1], [1], [0], [0], [0, 0, 1, 0], [], []>} : vector<1x8xf32>, vector<16x8xf32>, vector<1x16xf32> -> vector<1x16xf32>
    %242 = vector.broadcast %239 : vector<16x1xf32> to vector<16x16xf32>
    %243 = vector.broadcast %241 : vector<1x16xf32> to vector<16x16xf32>
    %244 = arith.addf %242, %243 : vector<16x16xf32>
    %cst_79 = arith.constant 0.000000e+00 : f32
    %245 = vector.broadcast %cst_79 : f32 to vector<16x16xf32>
    %246 = arith.cmpf ogt, %244, %245 : vector<16x16xf32>
    %cst_80 = arith.constant 2.000000e-01 : f32
    %247 = vector.broadcast %cst_80 : f32 to vector<16x16xf32>
    %248 = arith.mulf %247, %244 : vector<16x16xf32>
    %249 = arith.select %246, %244, %248 : vector<16x16xi1>, vector<16x16xf32>
    %cst_81 = arith.constant -1.000000e+30 : f32
    %250 = vector.broadcast %cst_81 : f32 to vector<16x16xf32>
    %251 = arith.select %154, %249, %250 : vector<16x16xi1>, vector<16x16xf32>
    %cst_82 = arith.constant dense<0xFF800000> : vector<16xf32>
    %252 = vector.multi_reduction <maximumf>, %251, %cst_82 [1] : vector<16x16xf32> to vector<16xf32>
    %253 = vector.shape_cast %252 : vector<16xf32> to vector<16x1xf32>
    %254 = vector.broadcast %253 : vector<16x1xf32> to vector<16x16xf32>
    %255 = arith.subf %251, %254 : vector<16x16xf32>
    %256 = math.exp %255 : vector<16x16xf32>
    %cst_83 = arith.constant 0.000000e+00 : f32
    %257 = vector.broadcast %cst_83 : f32 to vector<16x16xf32>
    %258 = arith.select %154, %256, %257 : vector<16x16xi1>, vector<16x16xf32>
    %cst_84 = arith.constant dense<0.000000e+00> : vector<16xf32>
    %259 = vector.multi_reduction <add>, %258, %cst_84 [1] : vector<16x16xf32> to vector<16xf32>
    %260 = vector.shape_cast %259 : vector<16xf32> to vector<16x1xf32>
    %261 = tpu.reciprocal %260 {approx = true} : vector<16x1xf32> -> vector<16x1xf32>
    %262 = vector.broadcast %261 : vector<16x1xf32> to vector<16x16xf32>
    %263 = arith.mulf %258, %262 : vector<16x16xf32>
    %cst_85 = arith.constant dense<0.000000e+00> : vector<16x8xf32>
    %264 = tpu.matmul %263, %234, %cst_85 {dimension_numbers = #tpu.dot_dimension_numbers<[1], [0], [0], [1], [0, 0, 1, 1], [], []>} : vector<16x16xf32>, vector<16x8xf32>, vector<16x8xf32> -> vector<16x8xf32>
    %265 = vector.extract_strided_slice %14 {offsets = [2, 0], sizes = [1, 8], strides = [1, 1]} : vector<8x8xf32> to vector<1x8xf32>
    %266 = vector.broadcast %265 : vector<1x8xf32> to vector<16x8xf32>
    %267 = arith.addf %264, %266 : vector<16x8xf32>
    %268 = vector.broadcast %148 : vector<16x1xf32> to vector<16x8xf32>
    %269 = arith.mulf %267, %268 : vector<16x8xf32>
    %270 = vector.extract_strided_slice %8 {offsets = [16, 0], sizes = [8, 32], strides = [1, 1]} : vector<64x32xf32> to vector<8x32xf32>
    %cst_86 = arith.constant dense<0.000000e+00> : vector<16x32xf32>
    %271 = tpu.matmul %269, %270, %cst_86 {dimension_numbers = #tpu.dot_dimension_numbers<[1], [0], [0], [1], [0, 0, 1, 1], [], []>} : vector<16x8xf32>, vector<8x32xf32>, vector<16x32xf32> -> vector<16x32xf32>
    %272 = arith.addf %233, %271 : vector<16x32xf32>
    %273 = vector.extract_strided_slice %142 {offsets = [0, 24], sizes = [16, 8], strides = [1, 1]} : vector<16x64xf32> to vector<16x8xf32>
    %274 = vector.extract_strided_slice %10 {offsets = [3, 0], sizes = [1, 8], strides = [1, 1]} : vector<8x8xf32> to vector<1x8xf32>
    %275 = vector.broadcast %274 : vector<1x8xf32> to vector<16x8xf32>
    %276 = arith.mulf %273, %275 : vector<16x8xf32>
    %cst_87 = arith.constant dense<0.000000e+00> : vector<16xf32>
    %277 = vector.multi_reduction <add>, %276, %cst_87 [1] : vector<16x8xf32> to vector<16xf32>
    %278 = vector.shape_cast %277 : vector<16xf32> to vector<16x1xf32>
    %279 = vector.extract_strided_slice %12 {offsets = [3, 0], sizes = [1, 8], strides = [1, 1]} : vector<8x8xf32> to vector<1x8xf32>
    %cst_88 = arith.constant dense<0.000000e+00> : vector<1x16xf32>
    %280 = tpu.matmul %279, %273, %cst_88 {dimension_numbers = #tpu.dot_dimension_numbers<[1], [1], [0], [0], [0, 0, 1, 0], [], []>} : vector<1x8xf32>, vector<16x8xf32>, vector<1x16xf32> -> vector<1x16xf32>
    %281 = vector.broadcast %278 : vector<16x1xf32> to vector<16x16xf32>
    %282 = vector.broadcast %280 : vector<1x16xf32> to vector<16x16xf32>
    %283 = arith.addf %281, %282 : vector<16x16xf32>
    %cst_89 = arith.constant 0.000000e+00 : f32
    %284 = vector.broadcast %cst_89 : f32 to vector<16x16xf32>
    %285 = arith.cmpf ogt, %283, %284 : vector<16x16xf32>
    %cst_90 = arith.constant 2.000000e-01 : f32
    %286 = vector.broadcast %cst_90 : f32 to vector<16x16xf32>
    %287 = arith.mulf %286, %283 : vector<16x16xf32>
    %288 = arith.select %285, %283, %287 : vector<16x16xi1>, vector<16x16xf32>
    %cst_91 = arith.constant -1.000000e+30 : f32
    %289 = vector.broadcast %cst_91 : f32 to vector<16x16xf32>
    %290 = arith.select %154, %288, %289 : vector<16x16xi1>, vector<16x16xf32>
    %cst_92 = arith.constant dense<0xFF800000> : vector<16xf32>
    %291 = vector.multi_reduction <maximumf>, %290, %cst_92 [1] : vector<16x16xf32> to vector<16xf32>
    %292 = vector.shape_cast %291 : vector<16xf32> to vector<16x1xf32>
    %293 = vector.broadcast %292 : vector<16x1xf32> to vector<16x16xf32>
    %294 = arith.subf %290, %293 : vector<16x16xf32>
    %295 = math.exp %294 : vector<16x16xf32>
    %cst_93 = arith.constant 0.000000e+00 : f32
    %296 = vector.broadcast %cst_93 : f32 to vector<16x16xf32>
    %297 = arith.select %154, %295, %296 : vector<16x16xi1>, vector<16x16xf32>
    %cst_94 = arith.constant dense<0.000000e+00> : vector<16xf32>
    %298 = vector.multi_reduction <add>, %297, %cst_94 [1] : vector<16x16xf32> to vector<16xf32>
    %299 = vector.shape_cast %298 : vector<16xf32> to vector<16x1xf32>
    %300 = tpu.reciprocal %299 {approx = true} : vector<16x1xf32> -> vector<16x1xf32>
    %301 = vector.broadcast %300 : vector<16x1xf32> to vector<16x16xf32>
    %302 = arith.mulf %297, %301 : vector<16x16xf32>
    %cst_95 = arith.constant dense<0.000000e+00> : vector<16x8xf32>
    %303 = tpu.matmul %302, %273, %cst_95 {dimension_numbers = #tpu.dot_dimension_numbers<[1], [0], [0], [1], [0, 0, 1, 1], [], []>} : vector<16x16xf32>, vector<16x8xf32>, vector<16x8xf32> -> vector<16x8xf32>
    %304 = vector.extract_strided_slice %14 {offsets = [3, 0], sizes = [1, 8], strides = [1, 1]} : vector<8x8xf32> to vector<1x8xf32>
    %305 = vector.broadcast %304 : vector<1x8xf32> to vector<16x8xf32>
    %306 = arith.addf %303, %305 : vector<16x8xf32>
    %307 = vector.broadcast %148 : vector<16x1xf32> to vector<16x8xf32>
    %308 = arith.mulf %306, %307 : vector<16x8xf32>
    %309 = vector.extract_strided_slice %8 {offsets = [24, 0], sizes = [8, 32], strides = [1, 1]} : vector<64x32xf32> to vector<8x32xf32>
    %cst_96 = arith.constant dense<0.000000e+00> : vector<16x32xf32>
    %310 = tpu.matmul %308, %309, %cst_96 {dimension_numbers = #tpu.dot_dimension_numbers<[1], [0], [0], [1], [0, 0, 1, 1], [], []>} : vector<16x8xf32>, vector<8x32xf32>, vector<16x32xf32> -> vector<16x32xf32>
    %311 = arith.addf %272, %310 : vector<16x32xf32>
    %312 = vector.extract_strided_slice %142 {offsets = [0, 32], sizes = [16, 8], strides = [1, 1]} : vector<16x64xf32> to vector<16x8xf32>
    %313 = vector.extract_strided_slice %10 {offsets = [4, 0], sizes = [1, 8], strides = [1, 1]} : vector<8x8xf32> to vector<1x8xf32>
    %314 = vector.broadcast %313 : vector<1x8xf32> to vector<16x8xf32>
    %315 = arith.mulf %312, %314 : vector<16x8xf32>
    %cst_97 = arith.constant dense<0.000000e+00> : vector<16xf32>
    %316 = vector.multi_reduction <add>, %315, %cst_97 [1] : vector<16x8xf32> to vector<16xf32>
    %317 = vector.shape_cast %316 : vector<16xf32> to vector<16x1xf32>
    %318 = vector.extract_strided_slice %12 {offsets = [4, 0], sizes = [1, 8], strides = [1, 1]} : vector<8x8xf32> to vector<1x8xf32>
    %cst_98 = arith.constant dense<0.000000e+00> : vector<1x16xf32>
    %319 = tpu.matmul %318, %312, %cst_98 {dimension_numbers = #tpu.dot_dimension_numbers<[1], [1], [0], [0], [0, 0, 1, 0], [], []>} : vector<1x8xf32>, vector<16x8xf32>, vector<1x16xf32> -> vector<1x16xf32>
    %320 = vector.broadcast %317 : vector<16x1xf32> to vector<16x16xf32>
    %321 = vector.broadcast %319 : vector<1x16xf32> to vector<16x16xf32>
    %322 = arith.addf %320, %321 : vector<16x16xf32>
    %cst_99 = arith.constant 0.000000e+00 : f32
    %323 = vector.broadcast %cst_99 : f32 to vector<16x16xf32>
    %324 = arith.cmpf ogt, %322, %323 : vector<16x16xf32>
    %cst_100 = arith.constant 2.000000e-01 : f32
    %325 = vector.broadcast %cst_100 : f32 to vector<16x16xf32>
    %326 = arith.mulf %325, %322 : vector<16x16xf32>
    %327 = arith.select %324, %322, %326 : vector<16x16xi1>, vector<16x16xf32>
    %cst_101 = arith.constant -1.000000e+30 : f32
    %328 = vector.broadcast %cst_101 : f32 to vector<16x16xf32>
    %329 = arith.select %154, %327, %328 : vector<16x16xi1>, vector<16x16xf32>
    %cst_102 = arith.constant dense<0xFF800000> : vector<16xf32>
    %330 = vector.multi_reduction <maximumf>, %329, %cst_102 [1] : vector<16x16xf32> to vector<16xf32>
    %331 = vector.shape_cast %330 : vector<16xf32> to vector<16x1xf32>
    %332 = vector.broadcast %331 : vector<16x1xf32> to vector<16x16xf32>
    %333 = arith.subf %329, %332 : vector<16x16xf32>
    %334 = math.exp %333 : vector<16x16xf32>
    %cst_103 = arith.constant 0.000000e+00 : f32
    %335 = vector.broadcast %cst_103 : f32 to vector<16x16xf32>
    %336 = arith.select %154, %334, %335 : vector<16x16xi1>, vector<16x16xf32>
    %cst_104 = arith.constant dense<0.000000e+00> : vector<16xf32>
    %337 = vector.multi_reduction <add>, %336, %cst_104 [1] : vector<16x16xf32> to vector<16xf32>
    %338 = vector.shape_cast %337 : vector<16xf32> to vector<16x1xf32>
    %339 = tpu.reciprocal %338 {approx = true} : vector<16x1xf32> -> vector<16x1xf32>
    %340 = vector.broadcast %339 : vector<16x1xf32> to vector<16x16xf32>
    %341 = arith.mulf %336, %340 : vector<16x16xf32>
    %cst_105 = arith.constant dense<0.000000e+00> : vector<16x8xf32>
    %342 = tpu.matmul %341, %312, %cst_105 {dimension_numbers = #tpu.dot_dimension_numbers<[1], [0], [0], [1], [0, 0, 1, 1], [], []>} : vector<16x16xf32>, vector<16x8xf32>, vector<16x8xf32> -> vector<16x8xf32>
    %343 = vector.extract_strided_slice %14 {offsets = [4, 0], sizes = [1, 8], strides = [1, 1]} : vector<8x8xf32> to vector<1x8xf32>
    %344 = vector.broadcast %343 : vector<1x8xf32> to vector<16x8xf32>
    %345 = arith.addf %342, %344 : vector<16x8xf32>
    %346 = vector.broadcast %148 : vector<16x1xf32> to vector<16x8xf32>
    %347 = arith.mulf %345, %346 : vector<16x8xf32>
    %348 = vector.extract_strided_slice %8 {offsets = [32, 0], sizes = [8, 32], strides = [1, 1]} : vector<64x32xf32> to vector<8x32xf32>
    %cst_106 = arith.constant dense<0.000000e+00> : vector<16x32xf32>
    %349 = tpu.matmul %347, %348, %cst_106 {dimension_numbers = #tpu.dot_dimension_numbers<[1], [0], [0], [1], [0, 0, 1, 1], [], []>} : vector<16x8xf32>, vector<8x32xf32>, vector<16x32xf32> -> vector<16x32xf32>
    %350 = arith.addf %311, %349 : vector<16x32xf32>
    %351 = vector.extract_strided_slice %142 {offsets = [0, 40], sizes = [16, 8], strides = [1, 1]} : vector<16x64xf32> to vector<16x8xf32>
    %352 = vector.extract_strided_slice %10 {offsets = [5, 0], sizes = [1, 8], strides = [1, 1]} : vector<8x8xf32> to vector<1x8xf32>
    %353 = vector.broadcast %352 : vector<1x8xf32> to vector<16x8xf32>
    %354 = arith.mulf %351, %353 : vector<16x8xf32>
    %cst_107 = arith.constant dense<0.000000e+00> : vector<16xf32>
    %355 = vector.multi_reduction <add>, %354, %cst_107 [1] : vector<16x8xf32> to vector<16xf32>
    %356 = vector.shape_cast %355 : vector<16xf32> to vector<16x1xf32>
    %357 = vector.extract_strided_slice %12 {offsets = [5, 0], sizes = [1, 8], strides = [1, 1]} : vector<8x8xf32> to vector<1x8xf32>
    %cst_108 = arith.constant dense<0.000000e+00> : vector<1x16xf32>
    %358 = tpu.matmul %357, %351, %cst_108 {dimension_numbers = #tpu.dot_dimension_numbers<[1], [1], [0], [0], [0, 0, 1, 0], [], []>} : vector<1x8xf32>, vector<16x8xf32>, vector<1x16xf32> -> vector<1x16xf32>
    %359 = vector.broadcast %356 : vector<16x1xf32> to vector<16x16xf32>
    %360 = vector.broadcast %358 : vector<1x16xf32> to vector<16x16xf32>
    %361 = arith.addf %359, %360 : vector<16x16xf32>
    %cst_109 = arith.constant 0.000000e+00 : f32
    %362 = vector.broadcast %cst_109 : f32 to vector<16x16xf32>
    %363 = arith.cmpf ogt, %361, %362 : vector<16x16xf32>
    %cst_110 = arith.constant 2.000000e-01 : f32
    %364 = vector.broadcast %cst_110 : f32 to vector<16x16xf32>
    %365 = arith.mulf %364, %361 : vector<16x16xf32>
    %366 = arith.select %363, %361, %365 : vector<16x16xi1>, vector<16x16xf32>
    %cst_111 = arith.constant -1.000000e+30 : f32
    %367 = vector.broadcast %cst_111 : f32 to vector<16x16xf32>
    %368 = arith.select %154, %366, %367 : vector<16x16xi1>, vector<16x16xf32>
    %cst_112 = arith.constant dense<0xFF800000> : vector<16xf32>
    %369 = vector.multi_reduction <maximumf>, %368, %cst_112 [1] : vector<16x16xf32> to vector<16xf32>
    %370 = vector.shape_cast %369 : vector<16xf32> to vector<16x1xf32>
    %371 = vector.broadcast %370 : vector<16x1xf32> to vector<16x16xf32>
    %372 = arith.subf %368, %371 : vector<16x16xf32>
    %373 = math.exp %372 : vector<16x16xf32>
    %cst_113 = arith.constant 0.000000e+00 : f32
    %374 = vector.broadcast %cst_113 : f32 to vector<16x16xf32>
    %375 = arith.select %154, %373, %374 : vector<16x16xi1>, vector<16x16xf32>
    %cst_114 = arith.constant dense<0.000000e+00> : vector<16xf32>
    %376 = vector.multi_reduction <add>, %375, %cst_114 [1] : vector<16x16xf32> to vector<16xf32>
    %377 = vector.shape_cast %376 : vector<16xf32> to vector<16x1xf32>
    %378 = tpu.reciprocal %377 {approx = true} : vector<16x1xf32> -> vector<16x1xf32>
    %379 = vector.broadcast %378 : vector<16x1xf32> to vector<16x16xf32>
    %380 = arith.mulf %375, %379 : vector<16x16xf32>
    %cst_115 = arith.constant dense<0.000000e+00> : vector<16x8xf32>
    %381 = tpu.matmul %380, %351, %cst_115 {dimension_numbers = #tpu.dot_dimension_numbers<[1], [0], [0], [1], [0, 0, 1, 1], [], []>} : vector<16x16xf32>, vector<16x8xf32>, vector<16x8xf32> -> vector<16x8xf32>
    %382 = vector.extract_strided_slice %14 {offsets = [5, 0], sizes = [1, 8], strides = [1, 1]} : vector<8x8xf32> to vector<1x8xf32>
    %383 = vector.broadcast %382 : vector<1x8xf32> to vector<16x8xf32>
    %384 = arith.addf %381, %383 : vector<16x8xf32>
    %385 = vector.broadcast %148 : vector<16x1xf32> to vector<16x8xf32>
    %386 = arith.mulf %384, %385 : vector<16x8xf32>
    %387 = vector.extract_strided_slice %8 {offsets = [40, 0], sizes = [8, 32], strides = [1, 1]} : vector<64x32xf32> to vector<8x32xf32>
    %cst_116 = arith.constant dense<0.000000e+00> : vector<16x32xf32>
    %388 = tpu.matmul %386, %387, %cst_116 {dimension_numbers = #tpu.dot_dimension_numbers<[1], [0], [0], [1], [0, 0, 1, 1], [], []>} : vector<16x8xf32>, vector<8x32xf32>, vector<16x32xf32> -> vector<16x32xf32>
    %389 = arith.addf %350, %388 : vector<16x32xf32>
    %390 = vector.extract_strided_slice %142 {offsets = [0, 48], sizes = [16, 8], strides = [1, 1]} : vector<16x64xf32> to vector<16x8xf32>
    %391 = vector.extract_strided_slice %10 {offsets = [6, 0], sizes = [1, 8], strides = [1, 1]} : vector<8x8xf32> to vector<1x8xf32>
    %392 = vector.broadcast %391 : vector<1x8xf32> to vector<16x8xf32>
    %393 = arith.mulf %390, %392 : vector<16x8xf32>
    %cst_117 = arith.constant dense<0.000000e+00> : vector<16xf32>
    %394 = vector.multi_reduction <add>, %393, %cst_117 [1] : vector<16x8xf32> to vector<16xf32>
    %395 = vector.shape_cast %394 : vector<16xf32> to vector<16x1xf32>
    %396 = vector.extract_strided_slice %12 {offsets = [6, 0], sizes = [1, 8], strides = [1, 1]} : vector<8x8xf32> to vector<1x8xf32>
    %cst_118 = arith.constant dense<0.000000e+00> : vector<1x16xf32>
    %397 = tpu.matmul %396, %390, %cst_118 {dimension_numbers = #tpu.dot_dimension_numbers<[1], [1], [0], [0], [0, 0, 1, 0], [], []>} : vector<1x8xf32>, vector<16x8xf32>, vector<1x16xf32> -> vector<1x16xf32>
    %398 = vector.broadcast %395 : vector<16x1xf32> to vector<16x16xf32>
    %399 = vector.broadcast %397 : vector<1x16xf32> to vector<16x16xf32>
    %400 = arith.addf %398, %399 : vector<16x16xf32>
    %cst_119 = arith.constant 0.000000e+00 : f32
    %401 = vector.broadcast %cst_119 : f32 to vector<16x16xf32>
    %402 = arith.cmpf ogt, %400, %401 : vector<16x16xf32>
    %cst_120 = arith.constant 2.000000e-01 : f32
    %403 = vector.broadcast %cst_120 : f32 to vector<16x16xf32>
    %404 = arith.mulf %403, %400 : vector<16x16xf32>
    %405 = arith.select %402, %400, %404 : vector<16x16xi1>, vector<16x16xf32>
    %cst_121 = arith.constant -1.000000e+30 : f32
    %406 = vector.broadcast %cst_121 : f32 to vector<16x16xf32>
    %407 = arith.select %154, %405, %406 : vector<16x16xi1>, vector<16x16xf32>
    %cst_122 = arith.constant dense<0xFF800000> : vector<16xf32>
    %408 = vector.multi_reduction <maximumf>, %407, %cst_122 [1] : vector<16x16xf32> to vector<16xf32>
    %409 = vector.shape_cast %408 : vector<16xf32> to vector<16x1xf32>
    %410 = vector.broadcast %409 : vector<16x1xf32> to vector<16x16xf32>
    %411 = arith.subf %407, %410 : vector<16x16xf32>
    %412 = math.exp %411 : vector<16x16xf32>
    %cst_123 = arith.constant 0.000000e+00 : f32
    %413 = vector.broadcast %cst_123 : f32 to vector<16x16xf32>
    %414 = arith.select %154, %412, %413 : vector<16x16xi1>, vector<16x16xf32>
    %cst_124 = arith.constant dense<0.000000e+00> : vector<16xf32>
    %415 = vector.multi_reduction <add>, %414, %cst_124 [1] : vector<16x16xf32> to vector<16xf32>
    %416 = vector.shape_cast %415 : vector<16xf32> to vector<16x1xf32>
    %417 = tpu.reciprocal %416 {approx = true} : vector<16x1xf32> -> vector<16x1xf32>
    %418 = vector.broadcast %417 : vector<16x1xf32> to vector<16x16xf32>
    %419 = arith.mulf %414, %418 : vector<16x16xf32>
    %cst_125 = arith.constant dense<0.000000e+00> : vector<16x8xf32>
    %420 = tpu.matmul %419, %390, %cst_125 {dimension_numbers = #tpu.dot_dimension_numbers<[1], [0], [0], [1], [0, 0, 1, 1], [], []>} : vector<16x16xf32>, vector<16x8xf32>, vector<16x8xf32> -> vector<16x8xf32>
    %421 = vector.extract_strided_slice %14 {offsets = [6, 0], sizes = [1, 8], strides = [1, 1]} : vector<8x8xf32> to vector<1x8xf32>
    %422 = vector.broadcast %421 : vector<1x8xf32> to vector<16x8xf32>
    %423 = arith.addf %420, %422 : vector<16x8xf32>
    %424 = vector.broadcast %148 : vector<16x1xf32> to vector<16x8xf32>
    %425 = arith.mulf %423, %424 : vector<16x8xf32>
    %426 = vector.extract_strided_slice %8 {offsets = [48, 0], sizes = [8, 32], strides = [1, 1]} : vector<64x32xf32> to vector<8x32xf32>
    %cst_126 = arith.constant dense<0.000000e+00> : vector<16x32xf32>
    %427 = tpu.matmul %425, %426, %cst_126 {dimension_numbers = #tpu.dot_dimension_numbers<[1], [0], [0], [1], [0, 0, 1, 1], [], []>} : vector<16x8xf32>, vector<8x32xf32>, vector<16x32xf32> -> vector<16x32xf32>
    %428 = arith.addf %389, %427 : vector<16x32xf32>
    %429 = vector.extract_strided_slice %142 {offsets = [0, 56], sizes = [16, 8], strides = [1, 1]} : vector<16x64xf32> to vector<16x8xf32>
    %430 = vector.extract_strided_slice %10 {offsets = [7, 0], sizes = [1, 8], strides = [1, 1]} : vector<8x8xf32> to vector<1x8xf32>
    %431 = vector.broadcast %430 : vector<1x8xf32> to vector<16x8xf32>
    %432 = arith.mulf %429, %431 : vector<16x8xf32>
    %cst_127 = arith.constant dense<0.000000e+00> : vector<16xf32>
    %433 = vector.multi_reduction <add>, %432, %cst_127 [1] : vector<16x8xf32> to vector<16xf32>
    %434 = vector.shape_cast %433 : vector<16xf32> to vector<16x1xf32>
    %435 = vector.extract_strided_slice %12 {offsets = [7, 0], sizes = [1, 8], strides = [1, 1]} : vector<8x8xf32> to vector<1x8xf32>
    %cst_128 = arith.constant dense<0.000000e+00> : vector<1x16xf32>
    %436 = tpu.matmul %435, %429, %cst_128 {dimension_numbers = #tpu.dot_dimension_numbers<[1], [1], [0], [0], [0, 0, 1, 0], [], []>} : vector<1x8xf32>, vector<16x8xf32>, vector<1x16xf32> -> vector<1x16xf32>
    %437 = vector.broadcast %434 : vector<16x1xf32> to vector<16x16xf32>
    %438 = vector.broadcast %436 : vector<1x16xf32> to vector<16x16xf32>
    %439 = arith.addf %437, %438 : vector<16x16xf32>
    %cst_129 = arith.constant 0.000000e+00 : f32
    %440 = vector.broadcast %cst_129 : f32 to vector<16x16xf32>
    %441 = arith.cmpf ogt, %439, %440 : vector<16x16xf32>
    %cst_130 = arith.constant 2.000000e-01 : f32
    %442 = vector.broadcast %cst_130 : f32 to vector<16x16xf32>
    %443 = arith.mulf %442, %439 : vector<16x16xf32>
    %444 = arith.select %441, %439, %443 : vector<16x16xi1>, vector<16x16xf32>
    %cst_131 = arith.constant -1.000000e+30 : f32
    %445 = vector.broadcast %cst_131 : f32 to vector<16x16xf32>
    %446 = arith.select %154, %444, %445 : vector<16x16xi1>, vector<16x16xf32>
    %cst_132 = arith.constant dense<0xFF800000> : vector<16xf32>
    %447 = vector.multi_reduction <maximumf>, %446, %cst_132 [1] : vector<16x16xf32> to vector<16xf32>
    %448 = vector.shape_cast %447 : vector<16xf32> to vector<16x1xf32>
    %449 = vector.broadcast %448 : vector<16x1xf32> to vector<16x16xf32>
    %450 = arith.subf %446, %449 : vector<16x16xf32>
    %451 = math.exp %450 : vector<16x16xf32>
    %cst_133 = arith.constant 0.000000e+00 : f32
    %452 = vector.broadcast %cst_133 : f32 to vector<16x16xf32>
    %453 = arith.select %154, %451, %452 : vector<16x16xi1>, vector<16x16xf32>
    %cst_134 = arith.constant dense<0.000000e+00> : vector<16xf32>
    %454 = vector.multi_reduction <add>, %453, %cst_134 [1] : vector<16x16xf32> to vector<16xf32>
    %455 = vector.shape_cast %454 : vector<16xf32> to vector<16x1xf32>
    %456 = tpu.reciprocal %455 {approx = true} : vector<16x1xf32> -> vector<16x1xf32>
    %457 = vector.broadcast %456 : vector<16x1xf32> to vector<16x16xf32>
    %458 = arith.mulf %453, %457 : vector<16x16xf32>
    %cst_135 = arith.constant dense<0.000000e+00> : vector<16x8xf32>
    %459 = tpu.matmul %458, %429, %cst_135 {dimension_numbers = #tpu.dot_dimension_numbers<[1], [0], [0], [1], [0, 0, 1, 1], [], []>} : vector<16x16xf32>, vector<16x8xf32>, vector<16x8xf32> -> vector<16x8xf32>
    %460 = vector.extract_strided_slice %14 {offsets = [7, 0], sizes = [1, 8], strides = [1, 1]} : vector<8x8xf32> to vector<1x8xf32>
    %461 = vector.broadcast %460 : vector<1x8xf32> to vector<16x8xf32>
    %462 = arith.addf %459, %461 : vector<16x8xf32>
    %463 = vector.broadcast %148 : vector<16x1xf32> to vector<16x8xf32>
    %464 = arith.mulf %462, %463 : vector<16x8xf32>
    %465 = vector.extract_strided_slice %8 {offsets = [56, 0], sizes = [8, 32], strides = [1, 1]} : vector<64x32xf32> to vector<8x32xf32>
    %cst_136 = arith.constant dense<0.000000e+00> : vector<16x32xf32>
    %466 = tpu.matmul %464, %465, %cst_136 {dimension_numbers = #tpu.dot_dimension_numbers<[1], [0], [0], [1], [0, 0, 1, 1], [], []>} : vector<16x8xf32>, vector<8x32xf32>, vector<16x32xf32> -> vector<16x32xf32>
    %467 = arith.addf %428, %466 : vector<16x32xf32>
    %468 = vector.extract_strided_slice %6 {offsets = [17, 0], sizes = [1, 32], strides = [1, 1]} : vector<24x32xf32> to vector<1x32xf32>
    %469 = vector.broadcast %468 : vector<1x32xf32> to vector<16x32xf32>
    %470 = arith.addf %467, %469 : vector<16x32xf32>
    %cst_137 = arith.constant 0.000000e+00 : f32
    %471 = vector.broadcast %cst_137 : f32 to vector<16x32xf32>
    %472 = arith.cmpf ogt, %470, %471 : vector<16x32xf32>
    %cst_138 = arith.constant 0.00999999977 : f32
    %473 = vector.broadcast %cst_138 : f32 to vector<16x32xf32>
    %474 = arith.mulf %473, %470 : vector<16x32xf32>
    %475 = arith.select %472, %470, %474 : vector<16x32xi1>, vector<16x32xf32>
    %476 = vector.broadcast %148 : vector<16x1xf32> to vector<16x32xf32>
    %477 = arith.mulf %475, %476 : vector<16x32xf32>
    %478 = vector.extract_strided_slice %6 {offsets = [18, 0], sizes = [1, 32], strides = [1, 1]} : vector<24x32xf32> to vector<1x32xf32>
    %479 = vector.broadcast %478 : vector<1x32xf32> to vector<16x32xf32>
    %480 = arith.mulf %477, %479 : vector<16x32xf32>
    %481 = vector.extract_strided_slice %6 {offsets = [19, 0], sizes = [1, 32], strides = [1, 1]} : vector<24x32xf32> to vector<1x32xf32>
    %482 = vector.broadcast %481 : vector<1x32xf32> to vector<16x32xf32>
    %483 = arith.addf %480, %482 : vector<16x32xf32>
    %484 = vector.extract_strided_slice %6 {offsets = [20, 0], sizes = [1, 32], strides = [1, 1]} : vector<24x32xf32> to vector<1x32xf32>
    %485 = vector.broadcast %484 : vector<1x32xf32> to vector<16x32xf32>
    %486 = arith.mulf %483, %485 : vector<16x32xf32>
    %cst_139 = arith.constant dense<0.000000e+00> : vector<16xf32>
    %487 = vector.multi_reduction <add>, %486, %cst_139 [1] : vector<16x32xf32> to vector<16xf32>
    %488 = vector.shape_cast %487 : vector<16xf32> to vector<16x1xf32>
    %489 = vector.extract_strided_slice %6 {offsets = [21, 2], sizes = [1, 1], strides = [1, 1]} : vector<24x32xf32> to vector<1x1xf32>
    %490 = vector.broadcast %489 : vector<1x1xf32> to vector<16x1xf32>
    %491 = arith.addf %488, %490 : vector<16x1xf32>
    %cst_140 = arith.constant 0.000000e+00 : f32
    %492 = vector.broadcast %cst_140 : f32 to vector<16x1xf32>
    %493 = arith.cmpf ogt, %491, %492 : vector<16x1xf32>
    %cst_141 = arith.constant 0.00999999977 : f32
    %494 = vector.broadcast %cst_141 : f32 to vector<16x1xf32>
    %495 = arith.mulf %494, %491 : vector<16x1xf32>
    %496 = arith.select %493, %491, %495 : vector<16x1xi1>, vector<16x1xf32>
    %497 = arith.mulf %496, %148 : vector<16x1xf32>
    %cst_142 = arith.constant 0.000000e+00 : f32
    %498 = vector.broadcast %cst_142 : f32 to vector<16x1xf32>
    %499 = arith.cmpf ogt, %19, %498 : vector<16x1xf32>
    %cst_143 = arith.constant 0.000000e+00 : f32
    %cst_144 = arith.constant 1.000000e+30 : f32
    %500 = arith.subf %cst_143, %cst_144 : f32
    %501 = vector.broadcast %500 : f32 to vector<16x1xf32>
    %502 = arith.select %499, %497, %501 : vector<16x1xi1>, vector<16x1xf32>
    %cst_145 = arith.constant dense<0xFF800000> : vector<1xf32>
    %503 = vector.multi_reduction <maximumf>, %502, %cst_145 [0] : vector<16x1xf32> to vector<1xf32>
    %504 = vector.shape_cast %503 : vector<1xf32> to vector<1x1xf32>
    %cst_146 = arith.constant 0.000000e+00 : f32
    %505 = vector.broadcast %cst_146 : f32 to vector<16x1xf32>
    %506 = arith.cmpf ogt, %19, %505 : vector<16x1xf32>
    %cst_147 = arith.constant 1.000000e+30 : f32
    %507 = vector.broadcast %cst_147 : f32 to vector<16x1xf32>
    %508 = arith.select %506, %497, %507 : vector<16x1xi1>, vector<16x1xf32>
    %cst_148 = arith.constant dense<0x7F800000> : vector<1xf32>
    %509 = vector.multi_reduction <minimumf>, %508, %cst_148 [0] : vector<16x1xf32> to vector<1xf32>
    %510 = vector.shape_cast %509 : vector<1xf32> to vector<1x1xf32>
    %511 = vector.broadcast %510 : vector<1x1xf32> to vector<16x1xf32>
    %512 = arith.subf %497, %511 : vector<16x1xf32>
    %cst_149 = arith.constant 9.99999997E-7 : f32
    %513 = vector.broadcast %cst_149 : f32 to vector<1x1xf32>
    %514 = arith.addf %504, %513 : vector<1x1xf32>
    %515 = arith.subf %514, %510 : vector<1x1xf32>
    %516 = vector.broadcast %515 : vector<1x1xf32> to vector<16x1xf32>
    %517 = arith.divf %512, %516 : vector<16x1xf32>
    %518 = arith.mulf %517, %148 : vector<16x1xf32>
    %cst_150 = arith.constant 9.99999997E-7 : f32
    %519 = vector.broadcast %cst_150 : f32 to vector<16x1xf32>
    %520 = arith.mulf %148, %519 : vector<16x1xf32>
    %521 = arith.addf %518, %520 : vector<16x1xf32>
    %522 = arith.subf %521, %5 : vector<16x1xf32>
    %cst_151 = arith.constant 0.000000e+00 : f32
    %523 = vector.broadcast %cst_151 : f32 to vector<16x1xf32>
    %524 = arith.cmpf ogt, %522, %523 : vector<16x1xf32>
    %525 = arith.extui %524 : vector<16x1xi1> to vector<16x1xi32>
    %526 = arith.sitofp %525 : vector<16x1xi32> to vector<16x1xf32>
    %cst_152 = arith.constant dense<0.000000e+00> : vector<16x1xf32>
    %527 = tpu.matmul %1, %521, %cst_152 {dimension_numbers = #tpu.dot_dimension_numbers<[1], [0], [0], [1], [0, 0, 1, 1], [], []>} : vector<16x16xf32>, vector<16x1xf32>, vector<16x1xf32> -> vector<16x1xf32>
    %cst_153 = arith.constant dense<0.000000e+00> : vector<16x1xf32>
    %528 = tpu.matmul %1, %526, %cst_153 {dimension_numbers = #tpu.dot_dimension_numbers<[1], [0], [0], [1], [0, 0, 1, 1], [], []>} : vector<16x16xf32>, vector<16x1xf32>, vector<16x1xf32> -> vector<16x1xf32>
    %529 = arith.mulf %21, %148 : vector<16x1xf32>
    %530 = arith.mulf %521, %21 : vector<16x1xf32>
    %531 = arith.mulf %21, %526 : vector<16x1xf32>
    %532 = arith.mulf %521, %521 : vector<16x1xf32>
    %533 = arith.mulf %521, %527 : vector<16x1xf32>
    %534 = arith.mulf %526, %528 : vector<16x1xf32>
    %535 = tpu.iota {dimensions = array<i32: 1>} : vector<8x128xi32>
    %cst_154 = arith.constant 0.000000e+00 : f32
    %536 = vector.broadcast %cst_154 : f32 to vector<8x128xf32>
    %537 = arith.mulf %21, %19 : vector<16x1xf32>
    %cst_155 = arith.constant dense<0.000000e+00> : vector<1xf32>
    %538 = vector.multi_reduction <add>, %537, %cst_155 [0] : vector<16x1xf32> to vector<1xf32>
    %539 = vector.shape_cast %538 : vector<1xf32> to vector<1x1xf32>
    %c0_i32 = arith.constant 0 : i32
    %540 = vector.broadcast %c0_i32 : i32 to vector<8x128xi32>
    %541 = arith.cmpi eq, %535, %540 : vector<8x128xi32>
    %cst_156 = arith.constant 0.000000e+00 : f32
    %542 = vector.shape_cast %539 : vector<1x1xf32> to vector<1x1xf32>
    %543 = vector.broadcast %542 : vector<1x1xf32> to vector<8x128xf32>
    %544 = vector.broadcast %cst_156 : f32 to vector<8x128xf32>
    %545 = arith.select %541, %543, %544 : vector<8x128xi1>, vector<8x128xf32>
    %546 = arith.addf %536, %545 : vector<8x128xf32>
    %547 = arith.mulf %19, %19 : vector<16x1xf32>
    %cst_157 = arith.constant dense<0.000000e+00> : vector<1xf32>
    %548 = vector.multi_reduction <add>, %547, %cst_157 [0] : vector<16x1xf32> to vector<1xf32>
    %549 = vector.shape_cast %548 : vector<1xf32> to vector<1x1xf32>
    %c1_i32 = arith.constant 1 : i32
    %550 = vector.broadcast %c1_i32 : i32 to vector<8x128xi32>
    %551 = arith.cmpi eq, %535, %550 : vector<8x128xi32>
    %cst_158 = arith.constant 0.000000e+00 : f32
    %552 = vector.shape_cast %549 : vector<1x1xf32> to vector<1x1xf32>
    %553 = vector.broadcast %552 : vector<1x1xf32> to vector<8x128xf32>
    %554 = vector.broadcast %cst_158 : f32 to vector<8x128xf32>
    %555 = arith.select %551, %553, %554 : vector<8x128xi1>, vector<8x128xf32>
    %556 = arith.addf %546, %555 : vector<8x128xf32>
    %557 = arith.mulf %529, %19 : vector<16x1xf32>
    %cst_159 = arith.constant dense<0.000000e+00> : vector<1xf32>
    %558 = vector.multi_reduction <add>, %557, %cst_159 [0] : vector<16x1xf32> to vector<1xf32>
    %559 = vector.shape_cast %558 : vector<1xf32> to vector<1x1xf32>
    %c2_i32 = arith.constant 2 : i32
    %560 = vector.broadcast %c2_i32 : i32 to vector<8x128xi32>
    %561 = arith.cmpi eq, %535, %560 : vector<8x128xi32>
    %cst_160 = arith.constant 0.000000e+00 : f32
    %562 = vector.shape_cast %559 : vector<1x1xf32> to vector<1x1xf32>
    %563 = vector.broadcast %562 : vector<1x1xf32> to vector<8x128xf32>
    %564 = vector.broadcast %cst_160 : f32 to vector<8x128xf32>
    %565 = arith.select %561, %563, %564 : vector<8x128xi1>, vector<8x128xf32>
    %566 = arith.addf %556, %565 : vector<8x128xf32>
    %567 = arith.mulf %148, %19 : vector<16x1xf32>
    %cst_161 = arith.constant dense<0.000000e+00> : vector<1xf32>
    %568 = vector.multi_reduction <add>, %567, %cst_161 [0] : vector<16x1xf32> to vector<1xf32>
    %569 = vector.shape_cast %568 : vector<1xf32> to vector<1x1xf32>
    %c3_i32 = arith.constant 3 : i32
    %570 = vector.broadcast %c3_i32 : i32 to vector<8x128xi32>
    %571 = arith.cmpi eq, %535, %570 : vector<8x128xi32>
    %cst_162 = arith.constant 0.000000e+00 : f32
    %572 = vector.shape_cast %569 : vector<1x1xf32> to vector<1x1xf32>
    %573 = vector.broadcast %572 : vector<1x1xf32> to vector<8x128xf32>
    %574 = vector.broadcast %cst_162 : f32 to vector<8x128xf32>
    %575 = arith.select %571, %573, %574 : vector<8x128xi1>, vector<8x128xf32>
    %576 = arith.addf %566, %575 : vector<8x128xf32>
    %577 = arith.mulf %530, %19 : vector<16x1xf32>
    %cst_163 = arith.constant dense<0.000000e+00> : vector<1xf32>
    %578 = vector.multi_reduction <add>, %577, %cst_163 [0] : vector<16x1xf32> to vector<1xf32>
    %579 = vector.shape_cast %578 : vector<1xf32> to vector<1x1xf32>
    %c4_i32 = arith.constant 4 : i32
    %580 = vector.broadcast %c4_i32 : i32 to vector<8x128xi32>
    %581 = arith.cmpi eq, %535, %580 : vector<8x128xi32>
    %cst_164 = arith.constant 0.000000e+00 : f32
    %582 = vector.shape_cast %579 : vector<1x1xf32> to vector<1x1xf32>
    %583 = vector.broadcast %582 : vector<1x1xf32> to vector<8x128xf32>
    %584 = vector.broadcast %cst_164 : f32 to vector<8x128xf32>
    %585 = arith.select %581, %583, %584 : vector<8x128xi1>, vector<8x128xf32>
    %586 = arith.addf %576, %585 : vector<8x128xf32>
    %587 = arith.mulf %521, %19 : vector<16x1xf32>
    %cst_165 = arith.constant dense<0.000000e+00> : vector<1xf32>
    %588 = vector.multi_reduction <add>, %587, %cst_165 [0] : vector<16x1xf32> to vector<1xf32>
    %589 = vector.shape_cast %588 : vector<1xf32> to vector<1x1xf32>
    %c5_i32 = arith.constant 5 : i32
    %590 = vector.broadcast %c5_i32 : i32 to vector<8x128xi32>
    %591 = arith.cmpi eq, %535, %590 : vector<8x128xi32>
    %cst_166 = arith.constant 0.000000e+00 : f32
    %592 = vector.shape_cast %589 : vector<1x1xf32> to vector<1x1xf32>
    %593 = vector.broadcast %592 : vector<1x1xf32> to vector<8x128xf32>
    %594 = vector.broadcast %cst_166 : f32 to vector<8x128xf32>
    %595 = arith.select %591, %593, %594 : vector<8x128xi1>, vector<8x128xf32>
    %596 = arith.addf %586, %595 : vector<8x128xf32>
    %597 = arith.mulf %526, %19 : vector<16x1xf32>
    %cst_167 = arith.constant dense<0.000000e+00> : vector<1xf32>
    %598 = vector.multi_reduction <add>, %597, %cst_167 [0] : vector<16x1xf32> to vector<1xf32>
    %599 = vector.shape_cast %598 : vector<1xf32> to vector<1x1xf32>
    %c6_i32 = arith.constant 6 : i32
    %600 = vector.broadcast %c6_i32 : i32 to vector<8x128xi32>
    %601 = arith.cmpi eq, %535, %600 : vector<8x128xi32>
    %cst_168 = arith.constant 0.000000e+00 : f32
    %602 = vector.shape_cast %599 : vector<1x1xf32> to vector<1x1xf32>
    %603 = vector.broadcast %602 : vector<1x1xf32> to vector<8x128xf32>
    %604 = vector.broadcast %cst_168 : f32 to vector<8x128xf32>
    %605 = arith.select %601, %603, %604 : vector<8x128xi1>, vector<8x128xf32>
    %606 = arith.addf %596, %605 : vector<8x128xf32>
    %607 = arith.mulf %531, %19 : vector<16x1xf32>
    %cst_169 = arith.constant dense<0.000000e+00> : vector<1xf32>
    %608 = vector.multi_reduction <add>, %607, %cst_169 [0] : vector<16x1xf32> to vector<1xf32>
    %609 = vector.shape_cast %608 : vector<1xf32> to vector<1x1xf32>
    %c7_i32 = arith.constant 7 : i32
    %610 = vector.broadcast %c7_i32 : i32 to vector<8x128xi32>
    %611 = arith.cmpi eq, %535, %610 : vector<8x128xi32>
    %cst_170 = arith.constant 0.000000e+00 : f32
    %612 = vector.shape_cast %609 : vector<1x1xf32> to vector<1x1xf32>
    %613 = vector.broadcast %612 : vector<1x1xf32> to vector<8x128xf32>
    %614 = vector.broadcast %cst_170 : f32 to vector<8x128xf32>
    %615 = arith.select %611, %613, %614 : vector<8x128xi1>, vector<8x128xf32>
    %616 = arith.addf %606, %615 : vector<8x128xf32>
    %617 = arith.mulf %532, %19 : vector<16x1xf32>
    %cst_171 = arith.constant dense<0.000000e+00> : vector<1xf32>
    %618 = vector.multi_reduction <add>, %617, %cst_171 [0] : vector<16x1xf32> to vector<1xf32>
    %619 = vector.shape_cast %618 : vector<1xf32> to vector<1x1xf32>
    %c8_i32 = arith.constant 8 : i32
    %620 = vector.broadcast %c8_i32 : i32 to vector<8x128xi32>
    %621 = arith.cmpi eq, %535, %620 : vector<8x128xi32>
    %cst_172 = arith.constant 0.000000e+00 : f32
    %622 = vector.shape_cast %619 : vector<1x1xf32> to vector<1x1xf32>
    %623 = vector.broadcast %622 : vector<1x1xf32> to vector<8x128xf32>
    %624 = vector.broadcast %cst_172 : f32 to vector<8x128xf32>
    %625 = arith.select %621, %623, %624 : vector<8x128xi1>, vector<8x128xf32>
    %626 = arith.addf %616, %625 : vector<8x128xf32>
    %627 = arith.mulf %533, %19 : vector<16x1xf32>
    %cst_173 = arith.constant dense<0.000000e+00> : vector<1xf32>
    %628 = vector.multi_reduction <add>, %627, %cst_173 [0] : vector<16x1xf32> to vector<1xf32>
    %629 = vector.shape_cast %628 : vector<1xf32> to vector<1x1xf32>
    %c9_i32 = arith.constant 9 : i32
    %630 = vector.broadcast %c9_i32 : i32 to vector<8x128xi32>
    %631 = arith.cmpi eq, %535, %630 : vector<8x128xi32>
    %cst_174 = arith.constant 0.000000e+00 : f32
    %632 = vector.shape_cast %629 : vector<1x1xf32> to vector<1x1xf32>
    %633 = vector.broadcast %632 : vector<1x1xf32> to vector<8x128xf32>
    %634 = vector.broadcast %cst_174 : f32 to vector<8x128xf32>
    %635 = arith.select %631, %633, %634 : vector<8x128xi1>, vector<8x128xf32>
    %636 = arith.addf %626, %635 : vector<8x128xf32>
    %637 = arith.mulf %534, %19 : vector<16x1xf32>
    %cst_175 = arith.constant dense<0.000000e+00> : vector<1xf32>
    %638 = vector.multi_reduction <add>, %637, %cst_175 [0] : vector<16x1xf32> to vector<1xf32>
    %639 = vector.shape_cast %638 : vector<1xf32> to vector<1x1xf32>
    %c10_i32 = arith.constant 10 : i32
    %640 = vector.broadcast %c10_i32 : i32 to vector<8x128xi32>
    %641 = arith.cmpi eq, %535, %640 : vector<8x128xi32>
    %cst_176 = arith.constant 0.000000e+00 : f32
    %642 = vector.shape_cast %639 : vector<1x1xf32> to vector<1x1xf32>
    %643 = vector.broadcast %642 : vector<1x1xf32> to vector<8x128xf32>
    %644 = vector.broadcast %cst_176 : f32 to vector<8x128xf32>
    %645 = arith.select %641, %643, %644 : vector<8x128xi1>, vector<8x128xf32>
    %646 = arith.addf %636, %645 : vector<8x128xf32>
    %c0_177 = arith.constant 0 : index
    %c0_178 = arith.constant 0 : index
    %c0_179 = arith.constant 0 : index
    %647 = vector.load %arg9[%c0_177, %c0_178, %c0_179] : memref<1x8x128xf32, #tpu.memory_space<vmem>>, vector<1x8x128xf32>
    %648 = vector.shape_cast %647 : vector<1x8x128xf32> to vector<8x128xf32>
    %649 = vector.shape_cast %646 : vector<8x128xf32> to vector<1x8x128xf32>
    tpu.vector_store %arg9[%c0_177, %c0_178, %c0_179], %649 {strides = array<i32>} : memref<1x8x128xf32, #tpu.memory_space<vmem>>, vector<1x8x128xf32>,
    %650 = tpu.iota {dimensions = array<i32: 1>} : vector<16x128xi32>
    %c0_i32_180 = arith.constant 0 : i32
    %651 = vector.broadcast %c0_i32_180 : i32 to vector<16x128xi32>
    %652 = arith.cmpi eq, %650, %651 : vector<16x128xi32>
    %cst_181 = arith.constant 0.000000e+00 : f32
    %653 = vector.shape_cast %521 : vector<16x1xf32> to vector<16x1xf32>
    %654 = vector.broadcast %653 : vector<16x1xf32> to vector<16x128xf32>
    %655 = vector.broadcast %cst_181 : f32 to vector<16x128xf32>
    %656 = arith.select %652, %654, %655 : vector<16x128xi1>, vector<16x128xf32>
    %c1_i32_182 = arith.constant 1 : i32
    %657 = vector.broadcast %c1_i32_182 : i32 to vector<16x128xi32>
    %658 = arith.cmpi eq, %650, %657 : vector<16x128xi32>
    %cst_183 = arith.constant 0.000000e+00 : f32
    %659 = vector.shape_cast %526 : vector<16x1xf32> to vector<16x1xf32>
    %660 = vector.broadcast %659 : vector<16x1xf32> to vector<16x128xf32>
    %661 = vector.broadcast %cst_183 : f32 to vector<16x128xf32>
    %662 = arith.select %658, %660, %661 : vector<16x128xi1>, vector<16x128xf32>
    %663 = arith.addf %656, %662 : vector<16x128xf32>
    %c2_i32_184 = arith.constant 2 : i32
    %664 = vector.broadcast %c2_i32_184 : i32 to vector<16x128xi32>
    %665 = arith.cmpi eq, %650, %664 : vector<16x128xi32>
    %cst_185 = arith.constant 0.000000e+00 : f32
    %666 = vector.shape_cast %148 : vector<16x1xf32> to vector<16x1xf32>
    %667 = vector.broadcast %666 : vector<16x1xf32> to vector<16x128xf32>
    %668 = vector.broadcast %cst_185 : f32 to vector<16x128xf32>
    %669 = arith.select %665, %667, %668 : vector<16x128xi1>, vector<16x128xf32>
    %670 = arith.addf %663, %669 : vector<16x128xf32>
    %c3_i32_186 = arith.constant 3 : i32
    %671 = vector.broadcast %c3_i32_186 : i32 to vector<16x128xi32>
    %672 = arith.cmpi eq, %650, %671 : vector<16x128xi32>
    %cst_187 = arith.constant 0.000000e+00 : f32
    %673 = vector.shape_cast %21 : vector<16x1xf32> to vector<16x1xf32>
    %674 = vector.broadcast %673 : vector<16x1xf32> to vector<16x128xf32>
    %675 = vector.broadcast %cst_187 : f32 to vector<16x128xf32>
    %676 = arith.select %672, %674, %675 : vector<16x128xi1>, vector<16x128xf32>
    %677 = arith.addf %670, %676 : vector<16x128xf32>
    %c0_188 = arith.constant 0 : index
    %c0_189 = arith.constant 0 : index
    %c0_190 = arith.constant 0 : index
    %678 = vector.load %arg8[%c0_188, %c0_189, %c0_190] : memref<1x16x128xf32, #tpu.memory_space<vmem>>, vector<1x16x128xf32>
    %679 = vector.shape_cast %678 : vector<1x16x128xf32> to vector<16x128xf32>
    %680 = vector.shape_cast %677 : vector<16x128xf32> to vector<1x16x128xf32>
    tpu.vector_store %arg8[%c0_188, %c0_189, %c0_190], %680 {strides = array<i32>} : memref<1x16x128xf32, #tpu.memory_space<vmem>>, vector<1x16x128xf32>,
    return
  }
  func.func @transform_0(%arg0: i32) -> (i32, i32, i32) {
    %c0_i32 = arith.constant 0 : i32
    %c0_i32_0 = arith.constant 0 : i32
    %c0_i32_1 = arith.constant 0 : i32
    return %arg0, %c0_i32, %c0_i32_0 : i32, i32, i32
  }
  func.func @transform_1(%arg0: i32) -> (i32, i32, i32) {
    %c0_i32 = arith.constant 0 : i32
    %c0_i32_0 = arith.constant 0 : i32
    %c0_i32_1 = arith.constant 0 : i32
    return %arg0, %c0_i32, %c0_i32_0 : i32, i32, i32
  }
  func.func @transform_2(%arg0: i32) -> (i32, i32) {
    %c0_i32 = arith.constant 0 : i32
    %c0_i32_0 = arith.constant 0 : i32
    %c0_i32_1 = arith.constant 0 : i32
    return %c0_i32, %c0_i32_0 : i32, i32
  }
  func.func @transform_3(%arg0: i32) -> (i32, i32, i32) {
    %c0_i32 = arith.constant 0 : i32
    %c0_i32_0 = arith.constant 0 : i32
    %c0_i32_1 = arith.constant 0 : i32
    %c0_i32_2 = arith.constant 0 : i32
    return %c0_i32, %c0_i32_0, %c0_i32_1 : i32, i32, i32
  }
  func.func @transform_4(%arg0: i32) -> (i32, i32) {
    %c0_i32 = arith.constant 0 : i32
    %c0_i32_0 = arith.constant 0 : i32
    %c0_i32_1 = arith.constant 0 : i32
    return %c0_i32, %c0_i32_0 : i32, i32
  }
  func.func @transform_5(%arg0: i32) -> (i32, i32, i32) {
    %c0_i32 = arith.constant 0 : i32
    %c0_i32_0 = arith.constant 0 : i32
    %c0_i32_1 = arith.constant 0 : i32
    %c0_i32_2 = arith.constant 0 : i32
    return %c0_i32, %c0_i32_0, %c0_i32_1 : i32, i32, i32
  }
  func.func @transform_6(%arg0: i32) -> (i32, i32) {
    %c0_i32 = arith.constant 0 : i32
    %c0_i32_0 = arith.constant 0 : i32
    %c0_i32_1 = arith.constant 0 : i32
    return %c0_i32, %c0_i32_0 : i32, i32
  }
  func.func @transform_7(%arg0: i32) -> (i32, i32, i32) {
    %c0_i32 = arith.constant 0 : i32
    %c0_i32_0 = arith.constant 0 : i32
    %c0_i32_1 = arith.constant 0 : i32
    return %arg0, %c0_i32, %c0_i32_0 : i32, i32, i32
  }
  func.func @transform_8(%arg0: i32) -> (i32, i32, i32) {
    %c0_i32 = arith.constant 0 : i32
    %c0_i32_0 = arith.constant 0 : i32
    %c0_i32_1 = arith.constant 0 : i32
    return %arg0, %c0_i32, %c0_i32_0 : i32, i32, i32
  }
}

</mosaic_0001>

<bundles_post_ra>
// kernel: tpu_custom_call.1
= control target key start
LH: loop header
LB: loop body
LE: loop exit
PB: predicated region body
PF: predicated region fallthrough
CT: control target
= control target key end

     0   :  { %14 = vsyncpa [#allocation3], 0  ;;  %s6873_s0 = inlined_call_operand.vmem [shape: f32[2,16,16], index: 0, kind: input, shape index: {}]   ;;  %s6874_s1 = inlined_call_operand.vmem [shape: f32[2,16,2], index: 1, kind: input, shape index: {}]   ;;  %s6875_s2 = inlined_call_operand.vmem [shape: f32[24,32], index: 2, kind: input, shape index: {}]   ;;  %s6876_s3 = inlined_call_operand.hbm [shape: f32[5,32,32], index: 3, kind: input, shape index: {}]   ;;  %s6877_s4 = inlined_call_operand.vmem [shape: f32[32,64], index: 4, kind: input, shape index: {}]   ;;  %s6878_s5 = inlined_call_operand.vmem [shape: f32[3,8,8], index: 5, kind: input, shape index: {}]   ;;  %s6879_s6 = inlined_call_operand.vmem [shape: f32[64,32], index: 6, kind: input, shape index: {}]   ;;  %s6880_s7 = inlined_call_operand.hbm [shape: f32[2,16,128], index: 7, kind: output, shape index: {0}]   ;;  %s6881_s8 = inlined_call_operand.hbm [shape: f32[2,8,128], index: 8, kind: output, shape index: {1}]  }
   0x1   :  { %15 = vsyncpa [#allocation4], 0 }
   0x2   :  { %17 = vsyncpa [#allocation4 + $0x1], 0 }
   0x3   :  { %18 = vsyncpa [#allocation7], 0 }
   0x4   :  { %20 = vsyncpa [#allocation7 + $0x1], 0  ;;  %s5923_s27 = smov 0   ;;  %s5925_s28 = smov 0  }
   0x5   :  { %s5927_s29 = smov 0   ;;  %s5929_s30 = smov 0  }
   0x6 LB: > { %s5944_s9 = sadd.s32 4294967295, %s5845_s30   ;;  %s4776_s10 = sadd.s32 4294967294, %s5845_s30   ;;  %s5845_s30 = sphi %s5929_s30, %s6907_s30   ;;  %s5841_s29 = sphi %s5927_s29, %s6906_s29   ;;  %s5837_s28 = sphi %s5925_s28, %s6905_s28   ;;  %s5833_s27 = sphi %s5923_s27, %s6904_s27  }
   0x7   : > { %s5948_s11 = sadd.s32 1, %s5845_s30   ;;  %s190_s12 = sadd.s32 1, %s5841_s29 }
   0x8   : > { %s187_s13 = ssub.s32 %s5845_s30, %s5948_s11  ;;  %p200_p0 = scmp.ne.s32.totalorder %s5841_s29, %s5837_s28 }
   0x9   : > { %p188_p1 = scmp.eq.s32.totalorder %s187_s13, 0  ;;  %p201_p2 = scmp.eq.s32.totalorder %s5944_s9, 1 }
   0xa   : > { %p206_p3 = scmp.ne.s32.totalorder %s5837_s28, %s5833_s27  ;;  %p207_p4 = scmp.eq.s32.totalorder %s4776_s10, 1 }
   0xb   : > { %s5959_s14 = scalar_select %p188_p1, %s5841_s29, %s190_s12  }
   0xc   : > { %p5961_p5 = por %p201_p2, %p200_p0  ;;  %p5965_p6 = por %p207_p4, %p206_p3 }
   0xd   : > { %p4777_p7 = scmp.ge.s32.totalorder %s5845_s30, 1  ;;  %p240_p8 = scmp.lt.s32.totalorder %s5845_s30, 3 }
   0xe   : > { %s6885_s15 = scalar_select %p5961_p5, 1, 0 }
   0xf   : > { %s6886_s16 = scalar_select %p5965_p6, 1, 0 }
  0x10   : > { %p6882_p9 = scmp.eq.s32.totalorder %s5944_s9, 0  ;;  %p5972_p10 = pnand %p4777_p7, %p240_p8 }
  0x11   : > { %s5847_s18 = smov [#allocation2]   ;;  %s5719_s23 = scalar_lea.hbm %s6876_s3, 2560 }
  0x12   : > { %s6887_s17 = scalar_select %p5972_p10, 1, 0 }
  0x13   : > { %s255_s19 = sshll.u32 %s5847_s18, 4  ;;  %p5492_p11 = pneg %p5972_p10  ;;  %s256_s19 = int_to_ptr.vmem [resolvable:$true] %s255_s19 }
  0x14   : > { %p5720_p13 = scmp.ne.s32.totalorder %s6876_s3, %s5719_s23  ;;  %p5726_p3 = scmp.lt.u32.totalorder %s5719_s23, %s6876_s3 }
  0x15   : > { %p5980_p12 = pnand %p6882_p9, %p5492_p11 }
  0x17   : > { %p5721_p0 = pneg %p5980_p12 }
  0x19   : > { %p5722_p1 = pnand %p5721_p0, %p5720_p13 }
  0x1b   : > { %p5723_p2 = pneg %p5722_p1 }
  0x1d   : > { %p5728_p4 = pnand %p5726_p3, %p5723_p2 }
  0x1f   : > { %5731 = shalt.err (!%p5728_p4)
}
  0x20   : > { %s5732_s12 = scalar_lea.vmem %s256_s19, 2560  ;;  %p5740_p9 = scmp.lt.s32.totalorder %s256_s19, %s256_s19 }
  0x21   : > { %p5733_p7 = scmp.ne.s32.totalorder %s256_s19, %s5732_s12  ;;  %p5741_p6 = scmp.lt.s32.totalorder %s5732_s12, %s5732_s12 }
  0x23   : > { %p5735_p8 = pnand %p5733_p7, %p5721_p0  ;;  %p5742_p5 = por %p5741_p6, %p5740_p9 }
  0x25   : > { %p5736_p11 = pneg %p5735_p8 }
  0x27   : > { %p5743_p10 = pnand %p5742_p5, %p5736_p11 }
  0x29   : > { %5746 = shalt.err (!%p5743_p10)
}
  0x2a   : > { %s5848_s13 = smov 128   ;;  %s5849_s18 = smov 8  }
  0x2b   : > { %5495 = dma.hbm_to_vmem [thread:$0]  (!%p5980_p12), %s6876_s3, 2560, %s256_s19, [#allocation3], %s5848_s13, %s5848_s13, %s5849_s18  }
  0x2c   : > { %p6889_p13 = scmp.ne.s32.totalorder %s6887_s17, 0 }
  0x2d   : > { %p6890_p1 = scmp.eq.s32.totalorder (!%p6889_p13), %s5944_s9, 0 }
  0x2e   : > { %296 = sbr.rel (%p6889_p13) target bundleno = 7106 (0x1bc2), region = 48 }
  0x35   : > { %5820 = dma.done.wait (%p6890_p1), [#allocation3], 2560   ;;  %p6891_p0 = pmov %p6890_p1 }
  0x36   : > { %p340_p5 = scmp.lt.s32.totalorder %s5944_s9, 1  ;;  %vm383_vm0 = vcmask 130048   ;;  %v5850_v5 = vmov 0   ;;  %v5851_v9 = vmov 0.0   ;;  %v505_v13 = vld [vmem:[#allocation2] sm:$0xff]  ;;  %v506_v14 = vld [vmem:[#allocation2 + $0x8] sm:$0xff]  ;;  %v374_v24 = vlaneseq }
  0x37   : > { %5822 = vsyncadd (%p6891_p0), [#allocation3], 4294964736  ;;  %5567 = vset.pattern.permute.xlu0 %v5850_v5  ;;  %5568 = vset.pattern.permute.xlu1 %v5850_v5  ;;  %v5326_v16 = vpack.c.bf16 %v506_v14, %v505_v13  ;;  %v507_v18 = vld [vmem:[#allocation2 + $0x10] sm:$0xff]  ;;  %v508_v19 = vld [vmem:[#allocation2 + $0x18] sm:$0xff]  ;;  %vm513_vm4 = vcmask 261120   ;;  %vm5855_vm11 = vmmov 0  }
  0x38   : > { %s341_s23 = scalar_select %p340_p5, %s5944_s9, 1  ;;  %v5330_v20 = vpack.c.bf16 %v508_v19, %v507_v18  ;;  %v6041_v21 = vld [vmem:[%s6875_s2 + $0x10] sm:$0xff]  ;;  %v6050_v25 = vshrl.u32 %v374_v24, 7  ;;  %v6058_v27 = vld [vmem:[%s6875_s2] sm:$0xff]  ;;  %v708_v60 = vld [vmem:[#allocation2 + $0x28] sm:$0xff]  ;;  %vm1578_vm12 = vcmask 64512  }
  0x39   : > { %5327 = vmatprep.subr.bf16.mxu1 %v5326_v16  ;;  %v6044_v22 = vadd.f32 1.0, %v6041_v21  ;;  %v707_v59 = vld [vmem:[#allocation2 + $0x20] sm:$0xff]  ;;  %v5852_v5 = vmov 1.0|1.0   ;;  %v801_v18 = vld [vmem:[#allocation2 + $0x50] sm:$0xff]  ;;  %v802_v19 = vld [vmem:[#allocation2 + $0x58] sm:$0xff] }
  0x3a   : > { %s4897_s24 = sshll.u32 %s341_s23, 4  ;;  %5329 = vmatpush3.bf16.msra.mxu1 %v5326_v16  ;;  %v6053_v26 = vsub.s32 0, %v6050_v25  ;;  %v6061_v28 = vsub.s32 1, %v6050_v25  ;;  %v6070_v39 = vsub.s32 2, %v6050_v25  ;;  %v6075_v41 = vsub.s32 3, %v6050_v25  ;;  %s5853_s23 = smov 127   ;;  %vm6223_vm13 = vmpackc.low %vm1578_vm12, %vm1578_vm12 }
  0x3b   : > { %s6011_s26 = scalar_lea.vmem %s6873_s0, %s4897_s24  ;;  %s6016_s17 = scalar_lea.vmem %s6874_s1, %s4897_s24  ;;  %5331 = vmatprep.subr.bf16.mxu1 %v5330_v20  ;;  %v698_v23 = vrot.slane %v6044_v22, 5  ;;  %v6078_v42 = vsub.s32 4, %v6050_v25  ;;  %v5338_v63 = vpack.c.bf16 %v708_v60, %v707_v59 }
  0x3c   : > { %v6019_v0 = vld [vmem:[%s6011_s26] sm:$0xff]  ;;  %v353_v2 = vld [vmem:[%s6016_s17 + $0x8] sm:$0xff]  ;;  %v494_v29 = vrot.slane %v6058_v27, %v6053_v26  ;;  %v500_v30 = vrot.slane %v6058_v27, %v6061_v28  ;;  %v512_v40 = vrot.slane %v6058_v27, %v6070_v39  ;;  %v600_v45 = vrot.slane %v6058_v27, %v6075_v41  ;;  %s5856_s10 = smov 120   ;;  %s5857_s12 = smov 8  }
  0x3d   : > { %v352_v1 = vld [vmem:[%s6016_s17] sm:$0xff]  ;;  %5052 = vmatprep.mubr.msk.f32.mxu0 %vm383_vm0, %v6019_v0  ;;  %v6026_v4 = vld [vmem:[%s6011_s26 + $0x8] sm:$0xff]  ;;  %5480 = vpush %v698_v23  ;;  %v606_v49 = vrot.slane %v6058_v27, %v6078_v42  ;;  %vm1566_vm14 = vcmp.gt.f32.partialorder %v6019_v0, 0.0  ;;  %s5858_s13 = smov 112   ;;  %s5859_s18 = smov 16  }
  0x3e   : > { %v5322_v3 = vpack.c.bf16 %v353_v2, %v352_v1  ;;  %5333 = vmatpush3.bf16.msra.mxu1 %v5330_v20  ;;  %v5350_v20 = vpack.c.bf16 %v802_v19, %v801_v18  ;;  %s5860_s21 = smov 104   ;;  %s5862_s19 = smov 96  }
  0x3f   : > { %s5864_s25 = smov 88   ;;  %p6902_p9 = scmp.ne.s32.totalorder %s6885_s15, 0 }
  0x40   : > { %5323 = vmatprep.subr.bf16.mxu0 %v5322_v3 }
  0x41   : > { %5325 = vmatpush3.bf16.msra.mxu0 %v5322_v3 }
  0x44   : > { %5053 = vmatmul.mubr.msk.f32.vlgmr.msra.gmra.mrb[0].mxu0 %vm383_vm0, %v6026_v4 }
  0x45   : > { %5070 = vmatprep.mubr.msk.f32.mxu0 %vm383_vm0, %v6019_v0 }
  0x6e   : > { %s5481_s22 = spop %5480 }
 0x117   : > { %v5054_v6 = vpop.f32.mrb[0].mxu0 }
 0x118   : > { %vm472_vm1 = vcmp.gt.f32.partialorder %v5054_v6, 0.0  ;;  %v462_v7 = vpop.f32.mrb[1].mxu0  ;;  %v480_v17 = vadd.f32 %v5054_v6, %v353_v2  ;;  %v710_v2 = vld [vmem:[#allocation2 + $0x38] sm:$0xff]  ;;  %v799_v6 = vld [vmem:[#allocation2 + $0x40] sm:$0xff] }
 0x119   : > { %vm471_vm2 = vcmp.gt.f32.partialorder %v462_v7, 0.0  ;;  %v479_v8 = vadd.f32 %v462_v7, %v352_v1  ;;  %v4793_v10 = vsel %vm472_vm1, 1.0, %v5851_v9  ;;  %v709_v1 = vld [vmem:[#allocation2 + $0x30] sm:$0xff]  ;;  %v800_v7 = vld [vmem:[#allocation2 + $0x48] sm:$0xff] }
 0x11a   : > { %vm6033_vm3 = vmpackc.low %vm472_vm1, %vm471_vm2  ;;  %v4792_v12 = vsel %vm471_vm2, 1.0, %v5851_v9  ;;  %v5342_v3 = vpack.c.bf16 %v710_v2, %v709_v1  ;;  %vm1567_vm1 = vcmp.gt.f32.partialorder %v6026_v4, 0.0 }
 0x11b   : > { %483 = vperm.xlu0 %5567, %v479_v8   ;;  %v5569_v15 = vpack.i.bf16 %v4793_v10, %v4792_v12  ;;  %v5346_v8 = vpack.c.bf16 %v800_v7, %v799_v6  ;;  %v700_v10 = vstv %s5481_s22  ;;  %s5861_s22 = smov 24  }
 0x11d   : > { %5570 = vperm.xlu1 %5568, %v5569_v15   ;;  %5347 = vmatprep.subr.bf16.mxu1 %v5346_v8 }
 0x11f   : > { %488 = vperm.xlu0 %5567, %v480_v17  }
 0x123   : > { %1086 = vrot.lane.b32.xlu0 %v698_v23, %s5853_s23  ;;  %s5868_s23 = smov 72  }
 0x19a   : > { %v484_v31 = vpop.permute.xlu0 %483 }
 0x19b   : > { %v495_v32 = vmul.f32 %v494_v29, %v484_v31  ;;  %v1098_v31 = vld [vmem:[#allocation2 + $0x70] sm:$0xff] }
 0x19c   : > { %v5571_v50 = vpop.permute.xlu1 %5570 }
 0x19d   : > { %v501_v33 = vadd.f32 %v500_v30, %v495_v32  ;;  %v5573_v54 = vunpack.i.h.bf16 %v5571_v50  ;;  %v5572_v56 = vunpack.i.l.bf16 %v5571_v50  ;;  %v1099_v32 = vld [vmem:[#allocation2 + $0x78] sm:$0xff]  ;;  %v6127_v50 = vsub.s32 6, %v6050_v25 }
 0x19e   : > { %v489_v34 = vpop.permute.xlu0 %488 }
 0x19f   : > { %v496_v35 = vmul.f32 %v494_v29, %v489_v34  ;;  %v503_v36 = vmax.f32 %v501_v33, 0.0  ;;  %v1096_v29 = vld [vmem:[#allocation2 + $0x60] sm:$0xff]  ;;  %v5366_v33 = vpack.c.bf16 %v1099_v32, %v1098_v31  ;;  %v6109_v34 = vsub.s32 5, %v6050_v25 }
 0x1a1   : > { %v502_v37 = vadd.f32 %v500_v30, %v496_v35  ;;  %5063 = vmatprep.mubr.msk.f32.mxu1 %vm513_vm4, %v503_v36  ;;  %v1097_v30 = vld [vmem:[#allocation2 + $0x68] sm:$0xff]  ;;  %v714_v35 = vrot.slane %v6058_v27, %v6109_v34 }
 0x1a2   : > { %v5362_v11 = vpack.c.bf16 %v1097_v30, %v1096_v29  ;;  %v1189_v29 = vld [vmem:[#allocation2 + $0x88] sm:$0xff] }
 0x1a3   : > { %v504_v38 = vmax.f32 %v502_v37, 0.0 }
 0x1a5   : > { %5064 = vmatmul.mubr.msk.f32.vlgmr.msra.gmra.mrb[0].mxu1 %vm513_vm4, %v504_v38 }
 0x1a6   : > { %5349 = vmatpush3.bf16.msra.mxu1 %v5346_v8 }
 0x1a7   : > { %5351 = vmatprep.subr.bf16.mxu1 %v5350_v20 }
 0x1aa   : > { %5353 = vmatpush3.bf16.msra.mxu1 %v5350_v20 }
 0x278   : > { %v5065_v43 = vpop.f32.mrb[0].mxu1 }
 0x279   : > { %v592_v44 = vadd.f32 %v5065_v43, %v512_v40  ;;  %v586_v46 = vpop.f32.mrb[1].mxu1 }
 0x27a   : > { %v587_v47 = vadd.f32 %v586_v46, %v512_v40 }
 0x27b   : > { %v596_v48 = vmax.f32 %v592_v44, 0.0 }
 0x27c   : > { %v595_v51 = vmax.f32 %v587_v47, 0.0 }
 0x27d   : > { %v602_v52 = vmul.f32 %v600_v45, %v596_v48 }
 0x27e   : > { %v601_v53 = vmul.f32 %v600_v45, %v595_v51  ;;  %v806_v51 = vrot.slane %v6058_v27, %v6127_v50 }
 0x27f   : > { %v608_v55 = vadd.f32 %v606_v49, %v602_v52  ;;  %v6132_v52 = vsub.s32 7, %v6050_v25 }
 0x280   : > { %v607_v57 = vadd.f32 %v606_v49, %v601_v53  ;;  %v1087_v49 = vpop.permute.xlu0 %1086  ;;  %v6137_v53 = vld [vmem:[%s6875_s2 + $0x8] sm:$0xff] }
 0x281   : > { %v6084_v58 = vmul.f32 %v5573_v54, %v608_v55  ;;  %5482 = vpush %v1087_v49 }
 0x282   : > { %v6086_v61 = vmul.f32 %v5572_v56, %v607_v57  ;;  %v893_v56 = vrot.slane %v6058_v27, %v6132_v52 }
 0x283   : > { %v703_v14 = vmul.f32 %v700_v10, %v6084_v58 }
 0x284   : > { %v5334_v62 = vpack.c.bf16 %v6084_v58, %v6086_v61  ;;  %v702_v12 = vmul.f32 %v700_v10, %v6086_v61 }
 0x286   : > { %5335 = vmatprep.subr.bf16.mxu0 %v5334_v62 }
 0x287   : > { %5337 = vmatpush3.bf16.msra.mxu0 %v5334_v62  ;;  %v899_v62 = vrot.slane %v6137_v53, %v6053_v26 }
 0x288   : > { %5339 = vmatprep.subr.bf16.mxu0 %v5338_v63 }
 0x28a   : > { %5071 = vmatmul.mubr.msk.f32.vlgmr.msra.gmra.mrb[2].mxu0 %vm383_vm0, %v6026_v4 }
 0x28b   : > { %5341 = vmatpush3.bf16.msra.mxu0 %v5338_v63 }
 0x28c   : > { %5343 = vmatprep.subr.bf16.mxu0 %v5342_v3 }
 0x28f   : > { %5345 = vmatpush3.bf16.msra.mxu0 %v5342_v3 }
 0x290   : > { %5355 = vmatprep.subr.msk.bf16.mxu0 %vm6033_vm3, %v5852_v5 }
 0x2b2   : > { %s5483_s20 = spop %5482 }
 0x2b3   : > { %v1089_v31 = vstv %s5483_s20  ;;  %s5865_s20 = smov 40  }
 0x35d   : > { %v5072_v13 = vpop.f32.mrb[2].mxu0 }
 0x35e   : > { %v687_v15 = vpop.f32.mrb[3].mxu0  ;;  %v705_v17 = vadd.f32 %v5072_v13, %v703_v14 }
 0x35f   : > { %v704_v16 = vadd.f32 %v702_v12, %v687_v15  ;;  %v1002_v12 = vrot.slane %v6137_v53, %v6061_v28  ;;  %v1008_v15 = vrot.slane %v6137_v53, %v6070_v39 }
 0x361   : > { %5081 = vmatprep.mubr.msk.f32.mxu0 %vm513_vm4, %v704_v16 }
 0x362   : > { %5082 = vmatmul.mubr.msk.f32.vlgmr.msra.gmra.mrb[4].mxu0 %vm513_vm4, %v705_v17 }
 0x363   : > { %5357 = vmatpush3.bf16.msk.msra.mxu0 %vm6033_vm3, %v5852_v5  ;;  %5099 = vmatprep.mubr.msk.f32.mxu0 %vm383_vm0, %v6019_v0 }
 0x364   : > { %5363 = vmatprep.subr.bf16.mxu0 %v5362_v11 }
 0x366   : > { %5100 = vmatmul.mubr.msk.f32.vlgmr.msra.gmra.mrb[6].mxu0 %vm383_vm0, %v6026_v4 }
 0x367   : > { %5365 = vmatpush3.bf16.msra.mxu0 %v5362_v11 }
 0x368   : > { %5367 = vmatprep.subr.bf16.mxu0 %v5366_v33 }
 0x36b   : > { %5369 = vmatpush3.bf16.msra.mxu0 %v5366_v33 }
 0x435   : > { %v5083_v36 = vpop.f32.mrb[4].mxu0 }
 0x436   : > { %v793_v37 = vadd.f32 %v5083_v36, %v714_v35  ;;  %v787_v38 = vpop.f32.mrb[5].mxu0 }
 0x437   : > { %v788_v40 = vadd.f32 %v787_v38, %v714_v35  ;;  %v1190_v38 = vld [vmem:[#allocation2 + $0x90] sm:$0xff] }
 0x438   : > { %v797_v23 = vmax.f32 %v793_v37, 0.0 }
 0x439   : > { %v796_v43 = vmax.f32 %v788_v40, 0.0  ;;  %v5101_v22 = vpop.f32.mrb[6].mxu0  ;;  %v1191_v40 = vld [vmem:[#allocation2 + $0x98] sm:$0xff] }
 0x43a   : > { %vm980_vm5 = vcmp.gt.f32.partialorder %v5101_v22, 0.0  ;;  %v970_v44 = vpop.f32.mrb[7].mxu0  ;;  %v1103_v22 = vrot.slane %v6137_v53, %v6075_v41 }
 0x43b   : > { %v4807_v45 = vsel %vm980_vm5, 1.0, %v5851_v9  ;;  %vm979_vm6 = vcmp.gt.f32.partialorder %v970_v44, 0.0  ;;  %5092 = vmatprep.mubr.msk.f32.mxu1 %vm513_vm4, %v796_v43  ;;  %v5374_v43 = vpack.c.bf16 %v1191_v40, %v1190_v38 }
 0x43c   : > { %v4806_v46 = vsel %vm979_vm6, 1.0, %v5851_v9  ;;  %vm6116_vm7 = vmpackc.low %vm980_vm5, %vm979_vm6  ;;  %5093 = vmatmul.mubr.msk.f32.vlgmr.msra.gmra.mrb[2].mxu1 %vm513_vm4, %v797_v23 }
 0x43d   : > { %v5574_v48 = vpack.i.bf16 %v4807_v45, %v4806_v46  ;;  %5379 = vmatprep.subr.msk.bf16.mxu0 %vm6116_vm7, %v5852_v5  ;;  %5106 = vmatprep.mubr.msk.f32.mxu1 %vm383_vm0, %v6019_v0 }
 0x43f   : > { %5575 = vperm.xlu1 %5568, %v5574_v48  }
 0x4be   : > { %v5576_v2 = vpop.permute.xlu1 %5575 }
 0x4bf   : > { %v5578_v8 = vunpack.i.h.bf16 %v5576_v2  ;;  %v5577_v13 = vunpack.i.l.bf16 %v5576_v2 }
 0x50f   : > { %v5094_v54 = vpop.f32.mrb[2].mxu1 }
 0x510   : > { %v885_v55 = vadd.f32 %v5094_v54, %v806_v51  ;;  %v879_v57 = vpop.f32.mrb[3].mxu1 }
 0x511   : > { %v880_v59 = vadd.f32 %v879_v57, %v806_v51  ;;  %v357_v57 = vld [vmem:[%s6877_s4] sm:$0xff] }
 0x512   : > { %v889_v60 = vmax.f32 %v885_v55, 0.0 }
 0x513   : > { %v888_v63 = vmax.f32 %v880_v59, 0.0  ;;  %v358_v59 = vld [vmem:[%s6877_s4 + $0x8] sm:$0xff] }
 0x514   : > { %v895_v1 = vmul.f32 %v893_v56, %v889_v60  ;;  %v5382_v60 = vpack.c.bf16 %v358_v59, %v357_v57 }
 0x515   : > { %v894_v3 = vmul.f32 %v893_v56, %v888_v63 }
 0x516   : > { %v901_v6 = vadd.f32 %v899_v62, %v895_v1  ;;  %v1195_v1 = vrot.slane %v6137_v53, %v6078_v42 }
 0x517   : > { %v900_v7 = vadd.f32 %v899_v62, %v894_v3  ;;  %v359_v62 = vld [vmem:[%s6877_s4 + $0x10] sm:$0xff] }
 0x518   : > { %v903_v10 = vadd.f32 %v901_v6, %v6084_v58  ;;  %v1282_v6 = vrot.slane %v6137_v53, %v6109_v34 }
 0x519   : > { %v902_v27 = vadd.f32 %v900_v7, %v6086_v61  ;;  %v1188_v61 = vld [vmem:[#allocation2 + $0x80] sm:$0xff] }
 0x51a   : > { %v998_v14 = vmul.f32 %v5578_v8, %v903_v10  ;;  %v5370_v30 = vpack.c.bf16 %v1189_v29, %v1188_v61  ;;  %v1391_v61 = vrot.slane %v6137_v53, %v6132_v52 }
 0x51b   : > { %v997_v16 = vmul.f32 %v5577_v13, %v902_v27 }
 0x51c   : > { %v1004_v17 = vmul.f32 %v1002_v12, %v998_v14 }
 0x51d   : > { %v1003_v18 = vmul.f32 %v1002_v12, %v997_v16  ;;  %v1288_v12 = vrot.slane %v6137_v53, %v6127_v50  ;;  %v6212_v53 = vld [vmem:[%s6878_s5] sm:$0xff] }
 0x51e   : > { %v6149_v19 = vadd.f32 %v1008_v15, %v1004_v17 }
 0x51f   : > { %v6151_v20 = vadd.f32 %v1008_v15, %v1003_v18 }
 0x520   : > { %v1092_v33 = vmul.f32 %v1089_v31, %v6149_v19 }
 0x521   : > { %v5358_v58 = vpack.c.bf16 %v6149_v19, %v6151_v20  ;;  %v1091_v11 = vmul.f32 %v1089_v31, %v6151_v20 }
 0x523   : > { %5359 = vmatprep.subr.bf16.mxu1 %v5358_v58 }
 0x524   : > { %5361 = vmatpush3.bf16.msra.mxu1 %v5358_v58 }
 0x525   : > { %5371 = vmatprep.subr.bf16.mxu1 %v5370_v30 }
 0x527   : > { %5107 = vmatmul.mubr.msk.f32.vlgmr.msra.gmra.mrb[4].mxu1 %vm383_vm0, %v6026_v4 }
 0x528   : > { %5373 = vmatpush3.bf16.msra.mxu1 %v5370_v30 }
 0x529   : > { %5375 = vmatprep.subr.bf16.mxu1 %v5374_v43 }
 0x52c   : > { %5377 = vmatpush3.bf16.msra.mxu1 %v5374_v43  ;;  %v5713_v43 = vld [vmem:[%s6878_s5 + $0x8] sm:$0xff] }
 0x52d   : > { %5383 = vmatprep.subr.bf16.mxu1 %v5382_v60 }
 0x5fa   : > { %v5108_v32 = vpop.f32.mrb[4].mxu1 }
 0x5fb   : > { %v1077_v35 = vpop.f32.mrb[5].mxu1  ;;  %v1094_v37 = vadd.f32 %v5108_v32, %v1092_v33  ;;  %v1397_v32 = vrot.slane %v6041_v21, %v6053_v26  ;;  %v1575_v21 = vrot.slane %v6212_v53, %v6053_v26 }
 0x5fc   : > { %v1093_v36 = vadd.f32 %v1091_v11, %v1077_v35 }
 0x5fe   : > { %5117 = vmatprep.mubr.msk.f32.mxu0 %vm513_vm4, %v1093_v36 }
 0x5ff   : > { %5118 = vmatmul.mubr.msk.f32.vlgmr.msra.gmra.mrb[8].mxu0 %vm513_vm4, %v1094_v37 }
 0x600   : > { %5381 = vmatpush3.bf16.msk.msra.mxu0 %vm6116_vm7, %v5852_v5  ;;  %5135 = vmatprep.mubr.msk.f32.mxu0 %vm383_vm0, %v6019_v0 }
 0x603   : > { %5136 = vmatmul.mubr.msk.f32.vlgmr.msra.gmra.mrb[10].mxu0 %vm383_vm0, %v6026_v4 }
 0x604   : > { %5153 = vmatprep.mubr.msk.f32.mxu0 %vm383_vm0, %v6019_v0  ;;  %v368_v0 = vld [vmem:[%s6879_s6 + $0x38] sm:$0xff] }
 0x6d2   : > { %v5119_v23 = vpop.f32.mrb[8].mxu0 }
 0x6d3   : > { %v1182_v44 = vadd.f32 %v5119_v23, %v1103_v22  ;;  %v1176_v45 = vpop.f32.mrb[9].mxu0 }
 0x6d4   : > { %v1177_v46 = vadd.f32 %v1176_v45, %v1103_v22 }
 0x6d5   : > { %v1186_v49 = vmax.f32 %v1182_v44, 0.0 }
 0x6d6   : > { %v1185_v47 = vmax.f32 %v1177_v46, 0.0  ;;  %v5137_v48 = vpop.f32.mrb[10].mxu0 }
 0x6d7   : > { %vm1369_vm8 = vcmp.gt.f32.partialorder %v5137_v48, 0.0  ;;  %v1359_v51 = vpop.f32.mrb[11].mxu0 }
 0x6d8   : > { %v4819_v54 = vsel %vm1369_vm8, 1.0, %v5851_v9  ;;  %vm1368_vm9 = vcmp.gt.f32.partialorder %v1359_v51, 0.0  ;;  %5128 = vmatprep.mubr.msk.f32.mxu1 %vm513_vm4, %v1185_v47  ;;  %v6242_v47 = vld [vmem:[%s6878_s5 + $0x8] sm:$0xff]  ;;  %v6251_v51 = vand.u32 127, %v374_v24 }
 0x6d9   : > { %v4818_v55 = vsel %vm1368_vm9, 1.0, %v5851_v9  ;;  %vm5390_vm10 = vmpackc.low %vm1369_vm8, %vm1368_vm9  ;;  %5129 = vmatmul.mubr.msk.f32.vlgmr.msra.gmra.mrb[6].mxu1 %vm513_vm4, %v1186_v49 }
 0x6da   : > { %v5579_v56 = vpack.i.bf16 %v4819_v54, %v4818_v55  ;;  %5391 = vmatprep.subr.msk.bf16.mxu0 %vm5390_vm10, %v5852_v5  ;;  %5385 = vmatpush3.bf16.msra.mxu1 %v5382_v60  ;;  %v376_v54 = vadd.s32 8, %v6050_v25  ;;  %vm1568_vm15 = vcmp.eq.s32.totalorder %v6050_v25, %v6251_v51 }
 0x6db   : > { %5393 = vmatpush3.bf16.msk.msra.mxu0 %vm5390_vm10, %v5852_v5  ;;  %v360_v5 = vld [vmem:[%s6877_s4 + $0x18] sm:$0xff]  ;;  %vm6260_vm3 = vmor %vm1566_vm14, %vm1568_vm15 }
 0x6dc   : > { %5580 = vperm.xlu1 %5568, %v5579_v56   ;;  %v5386_v63 = vpack.c.bf16 %v360_v5, %v359_v62  ;;  %vm1569_vm2 = vcmp.eq.s32.totalorder %v376_v54, %v6251_v51 }
 0x6dd   : > { %vm6264_vm7 = vmor %vm1567_vm1, %vm1569_vm2 }
 0x6de   : > { %5154 = vmatmul.mubr.msk.f32.vlgmr.msra.gmra.mrb[12].mxu0 %vm383_vm0, %v6026_v4  ;;  %5387 = vmatprep.subr.bf16.mxu1 %v5386_v63 }
 0x6df   : > { %5389 = vmatpush3.bf16.msra.mxu1 %v5386_v63  ;;  %5160 = vmatprep.mubr.msk.f32.mxu0 %vm5855_vm11, %v5851_v9 }
 0x75b   : > { %v5581_v14 = vpop.permute.xlu1 %5580 }
 0x75c   : > { %v5583_v18 = vunpack.i.h.bf16 %v5581_v14  ;;  %v5582_v29 = vunpack.i.l.bf16 %v5581_v14 }
 0x7ac   : > { %v5130_v2 = vpop.f32.mrb[6].mxu1 }
 0x7ad   : > { %v1274_v3 = vadd.f32 %v5130_v2, %v1195_v1  ;;  %v1268_v7 = vpop.f32.mrb[7].mxu1 }
 0x7ae   : > { %v1269_v8 = vadd.f32 %v1268_v7, %v1195_v1 }
 0x7af   : > { %v1278_v10 = vmax.f32 %v1274_v3, 0.0 }
 0x7b0   : > { %v1277_v13 = vmax.f32 %v1269_v8, 0.0 }
 0x7b1   : > { %v1284_v27 = vmul.f32 %v1282_v6, %v1278_v10  ;;  %v6246_v48 = vpop.f32.mrb[12].mxu0 }
 0x7b2   : > { %v1283_v15 = vmul.f32 %v1282_v6, %v1277_v13  ;;  %v6248_v49 = vpop.f32.mrb[13].mxu0  ;;  %vm1557_vm15 = vcmp.gt.f32.partialorder %v6246_v48, 0.0  ;;  %v361_v48 = vld [vmem:[%s6879_s6] sm:$0xff] }
 0x7b3   : > { %v1290_v16 = vadd.f32 %v1288_v12, %v1284_v27  ;;  %vm1556_vm1 = vcmp.gt.f32.partialorder %v6248_v49, 0.0 }
 0x7b4   : > { %v1289_v17 = vadd.f32 %v1288_v12, %v1283_v15 }
 0x7b5   : > { %v1292_v58 = vadd.f32 %v1290_v16, %v6149_v19  ;;  %v5854_v19 = vmov 0.0|0.0  }
 0x7b6   : > { %v1291_v30 = vadd.f32 %v1289_v17, %v6151_v20  ;;  %5394 = vmatprep.subr.bf16.mxu0 %v5854_v19 }
 0x7b7   : > { %v1387_v31 = vmul.f32 %v5583_v18, %v1292_v58 }
 0x7b8   : > { %v1386_v11 = vmul.f32 %v5582_v29, %v1291_v30  ;;  %v1802_v29 = vrot.slane %v6212_v53, %v6061_v28 }
 0x7b9   : > { %v1393_v33 = vmul.f32 %v1391_v61, %v1387_v31 }
 0x7ba   : > { %v1392_v35 = vmul.f32 %v1391_v61, %v1386_v11 }
 0x7bb   : > { %v1399_v37 = vadd.f32 %v1397_v32, %v1393_v33 }
 0x7bc   : > { %v1398_v36 = vadd.f32 %v1397_v32, %v1392_v35 }
 0x7be   : > { %5146 = vmatprep.mubr.msk.f32.mxu1 %vm513_vm4, %v1398_v36 }
 0x7bf   : > { %5147 = vmatmul.mubr.msk.f32.vlgmr.msra.gmra.mrb[8].mxu1 %vm513_vm4, %v1399_v37 }
 0x892   : > { %v6216_v20 = vpop.f32.mrb[8].mxu1 }
 0x893   : > { %v6218_v38 = vpop.f32.mrb[9].mxu1  ;;  %v1577_v40 = vmul.f32 %v6216_v20, %v1575_v21 }
 0x894   : > { %v5395_v22 = vpack.c.bf16 %v6216_v20, %v6218_v38  ;;  %v1576_v23 = vmul.f32 %v1575_v21, %v6218_v38  ;;  %v6232_v44 = vpack.i.bf16 %v6216_v20, %v6218_v38 }
 0x895   : > { %v1582_v45 = vsel %vm1578_vm12, %v1577_v40, 0.0 }
 0x896   : > { %1583 = vadd.xlane.f32.xlu1 %v1582_v45  ;;  %5397 = vmatpush3.bf16.xpose.msk.msra.mxu0 %vm6223_vm13, %v5395_v22  ;;  %v1579_v46 = vsel %vm1578_vm12, %v1576_v23, 0.0 }
 0x897   : > { %5399 = vmatprep.subr.bf16.mxu1 %v5395_v22  ;;  %1580 = vadd.xlane.f32.xlu0 %v1579_v46  ;;  %v1823_v46 = vrot.slane %v6242_v47, 1 }
 0x898   : > { %5401 = vmatpush3.bf16.msra.mxu1 %v5395_v22 }
 0x899   : > { %5402 = vmatprep.subr.bf16.mxu1 %v5854_v19 }
 0x89d   : > { %5161 = vmatmul.mubr.msk.f32.vlgmr.msra.gmra.mrb[14].mxu0 %vm1578_vm12, %v6242_v47 }
 0x923   : > { %v1584_v59 = vpop.xlane.xlu1 %1583 }
 0x924   : > { %v1581_v60 = vpop.xlane.xlu0 %1580 }
 0x970   : > { %v1660_v55 = vpop.f32.mrb[14].mxu0 }
 0x971   : > { %v1667_v56 = vrot.slane %v1660_v55, %v6053_v26  ;;  %v5162_v57 = vpop.f32.mrb[15].mxu0 }
 0x973   : > { %v1668_v62 = vadd.f32 %v1667_v56, %v1581_v60  ;;  %v1669_v5 = vadd.f32 %v1667_v56, %v1584_v59 }
 0x975   : > { %vm1670_vm5 = vcmp.gt.f32.partialorder %v1668_v62, 0.0  ;;  %v1672_v63 = vmul.f32 0.2, %v1668_v62  ;;  %vm1671_vm6 = vcmp.gt.f32.partialorder %v1669_v5, 0.0  ;;  %v1673_v1 = vmul.f32 0.2, %v1669_v5 }
 0x977   : > { %v1674_v25 = vsel %vm1670_vm5, %v1668_v62, %v1672_v63  ;;  %v1675_v2 = vsel %vm1671_vm6, %v1669_v5, %v1673_v1 }
 0x978   : > { %v1676_v3 = vsel %vm6260_vm3, %v1674_v25, -1e+30  ;;  %v1677_v6 = vsel %vm6264_vm7, %v1675_v2, -1e+30 }
 0x979   : > { %v1678_v4 = vsel %vm383_vm0, %v1676_v3, -inf  ;;  %v1681_v7 = vsel %vm383_vm0, %v1677_v6, -inf }
 0x97a   : > { %1679 = vmax.xlane.f32.xlu0 %v1678_v4 }
 0x97e   : > { %1682 = vmax.xlane.f32.xlu0 %v1681_v7 }
 0xa07   : > { %v1680_v8 = vpop.xlane.xlu0 %1679 }
 0xa08   : > { %v1684_v10 = vsub.f32 %v1676_v3, %v1680_v8 }
 0xa0a   : > { %v1686_v12 = vmul.f32 1.442695, %v1684_v10 }
 0xa0b   : > { %v1683_v13 = vpop.xlane.xlu0 %1682 }
 0xa0c   : > { %5646 = vpow2.f32 %v1686_v12  ;;  %v1685_v27 = vsub.f32 %v1677_v6, %v1683_v13 }
 0xa0e   : > { %v1688_v14 = vmul.f32 1.442695, %v1685_v27 }
 0xa10   : > { %5648 = vpow2.f32 %v1688_v14 }
 0xa16   : > { %v5647_v15 = vpop.eup %5646 }
 0xa17   : > { %v1690_v16 = vsel %vm6260_vm3, %v5647_v15, 0.0 }
 0xa18   : > { %v1692_v17 = vsel %vm383_vm0, %v1690_v16, 0.0 }
 0xa19   : > { %1693 = vadd.xlane.f32.xlu1 %v1692_v17 }
 0xa1a   : > { %v5649_v18 = vpop.eup %5648 }
 0xa1b   : > { %v1691_v58 = vsel %vm6264_vm7, %v5649_v18, 0.0  ;;  %v2196_v18 = vrot.slane %v6212_v53, %v6070_v39 }
 0xa1c   : > { %v1695_v61 = vsel %vm383_vm0, %v1691_v58, 0.0 }
 0xa1d   : > { %1696 = vadd.xlane.f32.xlu0 %v1695_v61 }
 0xa2a   : > { %5585 = vrot.lane.b32.xlu1 %v6232_v44, %s5856_s10 }
 0xa33   : > { %1804 = vrot.lane.b32.xlu0 %v1802_v29, %s5857_s12 }
 0xaa6   : > { %v1694_v30 = vpop.xlane.xlu1 %1693 }
 0xaa7   : > { %5650 = vrcp.f32 %v1694_v30 }
 0xaaa   : > { %v5586_v31 = vpop.permute.xlu1 %5585  ;;  %v1697_v11 = vpop.xlane.xlu0 %1696 }
 0xaab   : > { %v5588_v32 = vunpack.i.h.bf16 %v5586_v31  ;;  %v5587_v33 = vunpack.i.l.bf16 %v5586_v31  ;;  %5652 = vrcp.f32 %v1697_v11 }
 0xaad   : > { %v5403_v35 = vpack.c.bf16 %v5588_v32, %v5587_v33 }
 0xaae   : > { %v1805_v36 = vpop.permute.xlu0 %1804 }
 0xaaf   : > { %v1807_v37 = vmul.f32 %v1805_v36, %v6218_v38  ;;  %5407 = vmatprep.subr.bf16.mxu0 %v5403_v35  ;;  %v1808_v22 = vmul.f32 %v6216_v20, %v1805_v36 }
 0xab0   : > { %5409 = vmatpush3.bf16.msra.mxu0 %v5403_v35 }
 0xab1   : > { %v5651_v21 = vpop.eup %5650  ;;  %1811 = vrot.lane.b32.xlu1 %v1807_v37, %s5856_s10 }
 0xab2   : > { %v1700_v40 = vmul.f32 %v5651_v21, %v1690_v16 }
 0xab4   : > { %5167 = vmatprep.mubr.msk.f32.mxu1 %vm383_vm0, %v1700_v40 }
 0xab5   : > { %v5653_v23 = vpop.eup %5652  ;;  %1813 = vrot.lane.b32.xlu1 %v1808_v22, %s5856_s10  ;;  %s4899_s10 = sshll.u32 %s5944_s9, 8 }
 0xab6   : > { %v1701_v45 = vmul.f32 %v5653_v23, %v1691_v58  ;;  %v2217_v58 = vrot.slane %v6242_v47, 2 }
 0xab8   : > { %5168 = vmatmul.mubr.msk.f32.vlgmr.msra.gmra.mrb[10].mxu1 %vm383_vm0, %v1701_v45 }
 0xab9   : > { %5405 = vmatpush3.bf16.xpose.msk.msra.mxu1 %vm6223_vm13, %v5403_v35  ;;  %5174 = vmatprep.mubr.msk.f32.mxu1 %vm5855_vm11, %v5851_v9 }
 0xaba   : > { %5410 = vmatprep.subr.bf16.mxu1 %v5854_v19 }
 0xac0   : > { %5175 = vmatmul.mubr.msk.f32.vlgmr.msra.gmra.mrb[12].mxu1 %vm1578_vm12, %v1823_v46 }
 0xac1   : > { %5198 = vmatprep.mubr.msk.f32.mxu1 %vm5855_vm11, %v5851_v9 }
 0xb23   : > { %v1812_v54 = vpop.permute.xlu1 %1811 }
 0xb24   : > { %v1817_v55 = vsel %vm1578_vm12, %v1812_v54, 0.0 }
 0xb25   : > { %1818 = vadd.xlane.f32.xlu0 %v1817_v55 }
 0xb27   : > { %v1814_v56 = vpop.permute.xlu1 %1813 }
 0xb28   : > { %v1820_v57 = vsel %vm1578_vm12, %v1814_v56, 0.0 }
 0xb29   : > { %1821 = vadd.xlane.f32.xlu1 %v1820_v57 }
 0xb3b   : > { %5590 = vrot.lane.b32.xlu0 %v6232_v44, %s5858_s13 }
 0xb8b   : > { %v6301_v59 = vpop.f32.mrb[10].mxu1 }
 0xb8c   : > { %v6303_v60 = vpop.f32.mrb[11].mxu1 }
 0xb93   : > { %v1900_v62 = vpop.f32.mrb[12].mxu1 }
 0xb94   : > { %v5176_v5 = vpop.f32.mrb[13].mxu1  ;;  %v1907_v63 = vrot.slane %v1900_v62, %v6053_v26 }
 0xbb2   : > { %v1819_v1 = vpop.xlane.xlu0 %1818 }
 0xbb3   : > { %v1908_v25 = vadd.f32 %v1907_v63, %v1819_v1 }
 0xbb5   : > { %v1912_v2 = vmul.f32 0.2, %v1908_v25  ;;  %vm1910_vm8 = vcmp.gt.f32.partialorder %v1908_v25, 0.0 }
 0xbb6   : > { %v5591_v3 = vpop.permute.xlu0 %5590  ;;  %v1822_v4 = vpop.xlane.xlu1 %1821 }
 0xbb7   : > { %v5593_v6 = vunpack.i.h.bf16 %v5591_v3  ;;  %v5592_v7 = vunpack.i.l.bf16 %v5591_v3  ;;  %v1909_v8 = vadd.f32 %v1907_v63, %v1822_v4  ;;  %v1914_v10 = vsel %vm1910_vm8, %v1908_v25, %v1912_v2 }
 0xbb8   : > { %v1916_v12 = vsel %vm6260_vm3, %v1914_v10, -1e+30 }
 0xbb9   : > { %v6308_v13 = vpack.c.bf16 %v5593_v6, %v5592_v7  ;;  %v1913_v27 = vmul.f32 0.2, %v1909_v8  ;;  %v1918_v14 = vsel %vm383_vm0, %v1916_v12, -inf  ;;  %vm1911_vm9 = vcmp.gt.f32.partialorder %v1909_v8, 0.0 }
 0xbba   : > { %1919 = vmax.xlane.f32.xlu1 %v1918_v14 }
 0xbbb   : > { %5413 = vmatpush3.bf16.xpose.msk.msra.mxu1 %vm6223_vm13, %v6308_v13  ;;  %v1915_v15 = vsel %vm1911_vm9, %v1909_v8, %v1913_v27 }
 0xbbc   : > { %v1917_v16 = vsel %vm6264_vm7, %v1915_v15, -1e+30  ;;  %5418 = vmatprep.subr.bf16.mxu1 %v5854_v19 }
 0xbbd   : > { %v1921_v17 = vsel %vm383_vm0, %v1917_v16, -inf }
 0xbbe   : > { %1922 = vmax.xlane.f32.xlu1 %v1921_v17 }
 0xbc2   : > { %5199 = vmatmul.mubr.msk.f32.vlgmr.msra.gmra.mrb[14].mxu1 %vm1578_vm12, %v2217_v58 }
 0xbc3   : > { %5217 = vmatprep.mubr.msk.f32.mxu1 %vm5855_vm11, %v5851_v9 }
 0xbcf   : > { %2198 = vrot.lane.b32.xlu1 %v2196_v18, %s5859_s18  ;;  %s5867_s18 = smov 48  }
 0xc47   : > { %v1920_v61 = vpop.xlane.xlu1 %1919 }
 0xc48   : > { %v1924_v29 = vsub.f32 %v1916_v12, %v1920_v61 }
 0xc4a   : > { %v1926_v30 = vmul.f32 1.442695, %v1924_v29 }
 0xc4b   : > { %v1923_v31 = vpop.xlane.xlu1 %1922 }
 0xc4c   : > { %5654 = vpow2.f32 %v1926_v30  ;;  %v1925_v11 = vsub.f32 %v1917_v16, %v1923_v31 }
 0xc4e   : > { %v1928_v32 = vmul.f32 1.442695, %v1925_v11  ;;  %v2511_v11 = vrot.slane %v6212_v53, %v6075_v41 }
 0xc4f   : > { %v2199_v22 = vpop.permute.xlu1 %2198 }
 0xc50   : > { %5656 = vpow2.f32 %v1928_v32  ;;  %v2202_v23 = vmul.f32 %v6216_v20, %v2199_v22  ;;  %v2201_v45 = vmul.f32 %v2199_v22, %v6218_v38  ;;  %v2532_v32 = vrot.slane %v6242_v47, 3 }
 0xc56   : > { %v5655_v33 = vpop.eup %5654 }
 0xc57   : > { %v1930_v35 = vsel %vm6260_vm3, %v5655_v33, 0.0 }
 0xc58   : > { %v1932_v36 = vsel %vm383_vm0, %v1930_v35, 0.0 }
 0xc59   : > { %1933 = vadd.xlane.f32.xlu0 %v1932_v36 }
 0xc5a   : > { %v5657_v37 = vpop.eup %5656 }
 0xc5b   : > { %v1931_v21 = vsel %vm6264_vm7, %v5657_v37, 0.0 }
 0xc5c   : > { %v1935_v40 = vsel %vm383_vm0, %v1931_v21, 0.0 }
 0xc5d   : > { %1936 = vadd.xlane.f32.xlu1 %v1935_v40 }
 0xc6e   : > { %2207 = vrot.lane.b32.xlu1 %v2202_v23, %s5858_s13 }
 0xc6f   : > { %2205 = vrot.lane.b32.xlu0 %v2201_v45, %s5858_s13  ;;  %s5866_s13 = smov 80  }
 0xc95   : > { %v2294_v46 = vpop.f32.mrb[14].mxu1 }
 0xc96   : > { %v5200_v54 = vpop.f32.mrb[15].mxu1  ;;  %v2301_v4 = vrot.slane %v2294_v46, %v6053_v26 }
 0xce6   : > { %v1934_v55 = vpop.xlane.xlu0 %1933 }
 0xce7   : > { %5658 = vrcp.f32 %v1934_v55 }
 0xcea   : > { %v2206_v56 = vpop.permute.xlu0 %2205  ;;  %v1937_v57 = vpop.xlane.xlu1 %1936 }
 0xceb   : > { %5660 = vrcp.f32 %v1937_v57  ;;  %v2211_v62 = vsel %vm1578_vm12, %v2206_v56, 0.0 }
 0xcec   : > { %2212 = vadd.xlane.f32.xlu0 %v2211_v62 }
 0xcee   : > { %v2208_v5 = vpop.permute.xlu1 %2207 }
 0xcef   : > { %v2214_v63 = vsel %vm1578_vm12, %v2208_v5, 0.0 }
 0xcf0   : > { %2215 = vadd.xlane.f32.xlu1 %v2214_v63 }
 0xcf1   : > { %v5659_v1 = vpop.eup %5658 }
 0xcf2   : > { %v1940_v25 = vmul.f32 %v5659_v1, %v1930_v35  ;;  %v6372_v1 = vsel %vm1557_vm15, 1.0, %v5851_v9 }
 0xcf4   : > { %5181 = vmatprep.mubr.msk.f32.mxu0 %vm383_vm0, %v1940_v25  ;;  %v6375_v25 = vsel %vm1556_vm1, 1.0, %v5851_v9  ;;  %vm4145_vm1 = vcmask 23568  }
 0xcf5   : > { %v5661_v2 = vpop.eup %5660 }
 0xcf6   : > { %v1941_v3 = vmul.f32 %v5661_v2, %v1931_v21  ;;  %v6379_v2 = vpack.i.bf16 %v6372_v1, %v6375_v25 }
 0xcf8   : > { %5182 = vmatmul.mubr.msk.f32.vlgmr.msra.gmra.mrb[16].mxu0 %vm383_vm0, %v1941_v3  ;;  %v362_v3 = vld [vmem:[%s6879_s6 + $0x8] sm:$0xff] }
 0xcf9   : > { %5184 = vmatprep.subr.mxu0 %v362_v3 }
 0xcfa   : > { %5185 = vmatpush3.msra.mxu0 %v362_v3 }
 0xcfb   : > { %5189 = vmatprep.subr.mxu0 %v361_v48 }
 0xd02   : > { %5595 = vrot.lane.b32.xlu0 %v6232_v44, %s5860_s21 }
 0xd79   : > { %v2213_v6 = vpop.xlane.xlu0 %2212 }
 0xd7a   : > { %v2302_v7 = vadd.f32 %v2301_v4, %v2213_v6 }
 0xd7c   : > { %v2306_v8 = vmul.f32 0.2, %v2302_v7  ;;  %vm2304_vm10 = vcmp.gt.f32.partialorder %v2302_v7, 0.0 }
 0xd7d   : > { %v5596_v10 = vpop.permute.xlu0 %5595  ;;  %v2216_v12 = vpop.xlane.xlu1 %2215 }
 0xd7e   : > { %v5598_v27 = vunpack.i.h.bf16 %v5596_v10  ;;  %v5597_v14 = vunpack.i.l.bf16 %v5596_v10  ;;  %v2303_v15 = vadd.f32 %v2301_v4, %v2216_v12  ;;  %v2308_v16 = vsel %vm2304_vm10, %v2302_v7, %v2306_v8  ;;  %v6395_v12 = vld [vmem:[%s6878_s5 + $0x10] sm:$0xff] }
 0xd7f   : > { %v2310_v17 = vsel %vm6260_vm3, %v2308_v16, -1e+30 }
 0xd80   : > { %v6343_v18 = vpack.c.bf16 %v5598_v27, %v5597_v14  ;;  %v2307_v58 = vmul.f32 0.2, %v2303_v15  ;;  %v2312_v61 = vsel %vm383_vm0, %v2310_v17, -inf  ;;  %vm2305_vm14 = vcmp.gt.f32.partialorder %v2303_v15, 0.0 }
 0xd81   : > { %2313 = vmax.xlane.f32.xlu1 %v2312_v61  ;;  %v1945_v14 = vrot.slane %v6395_v12, %v6061_v28 }
 0xd82   : > { %5421 = vmatpush3.bf16.xpose.msk.msra.mxu1 %vm6223_vm13, %v6343_v18  ;;  %v2309_v29 = vsel %vm2305_vm14, %v2303_v15, %v2307_v58  ;;  %v1705_v15 = vrot.slane %v6395_v12, %v6053_v26 }
 0xd83   : > { %v2311_v30 = vsel %vm6264_vm7, %v2309_v29, -1e+30  ;;  %5426 = vmatprep.subr.bf16.mxu1 %v5854_v19 }
 0xd84   : > { %v2315_v31 = vsel %vm383_vm0, %v2311_v30, -inf }
 0xd85   : > { %2316 = vmax.xlane.f32.xlu1 %v2315_v31  ;;  %v1779_v31 = vadd.f32 %v6303_v60, %v1705_v15 }
 0xd89   : > { %5218 = vmatmul.mubr.msk.f32.vlgmr.msra.gmra.mrb[16].mxu1 %vm1578_vm12, %v2532_v32 }
 0xd8a   : > { %5236 = vmatprep.mubr.msk.f32.mxu1 %vm5855_vm11, %v5851_v9 }
 0xd96   : > { %2513 = vrot.lane.b32.xlu1 %v2511_v11, %s5861_s22  ;;  %s5863_s22 = smov 32  }
 0xdcb   : > { %v5183_v33 = vpop.f32.mrb[16].mxu0 }
 0xdcc   : > { %v2020_v35 = vpop.f32.mrb[17].mxu0  ;;  %v2026_v58 = vadd.f32 %v5183_v33, %v1945_v14 }
 0xdcd   : > { %v2021_v61 = vadd.f32 %v2020_v35, %v1945_v14  ;;  %v1784_v35 = vadd.f32 %v6301_v59, %v1705_v15  ;;  %v2339_v14 = vrot.slane %v6395_v12, %v6070_v39 }
 0xe0e   : > { %v2314_v36 = vpop.xlane.xlu1 %2313 }
 0xe0f   : > { %v2318_v55 = vsub.f32 %v2310_v17, %v2314_v36 }
 0xe11   : > { %v2320_v57 = vmul.f32 1.442695, %v2318_v55 }
 0xe12   : > { %v2317_v37 = vpop.xlane.xlu1 %2316 }
 0xe13   : > { %v2319_v21 = vsub.f32 %v2311_v30, %v2317_v37 }
 0xe15   : > { %v2322_v40 = vmul.f32 1.442695, %v2319_v21 }
 0xe16   : > { %v2514_v22 = vpop.permute.xlu1 %2513 }
 0xe17   : > { %5662 = vpow2.f32 %v2322_v40  ;;  %v2516_v23 = vmul.f32 %v2514_v22, %v6218_v38  ;;  %v2517_v45 = vmul.f32 %v6216_v20, %v2514_v22  ;;  %v363_v40 = vld [vmem:[%s6879_s6 + $0x10] sm:$0xff] }
 0xe18   : > { %5664 = vpow2.f32 %v2320_v57 }
 0xe19   : > { %2520 = vrot.lane.b32.xlu0 %v2516_v23, %s5860_s21 }
 0xe1d   : > { %2522 = vrot.lane.b32.xlu0 %v2517_v45, %s5860_s21 }
 0xe21   : > { %v5663_v46 = vpop.eup %5662 }
 0xe22   : > { %v2325_v54 = vsel %vm6264_vm7, %v5663_v46, 0.0  ;;  %v5665_v62 = vpop.eup %5664 }
 0xe23   : > { %v2329_v56 = vsel %vm383_vm0, %v2325_v54, 0.0  ;;  %v2324_v5 = vsel %vm6260_vm3, %v5665_v62, 0.0 }
 0xe24   : > { %2330 = vadd.xlane.f32.xlu1 %v2329_v56  ;;  %v2326_v63 = vsel %vm383_vm0, %v2324_v5, 0.0 }
 0xe3c   : > { %2327 = vadd.xlane.f32.xlu0 %v2326_v63 }
 0xe52   : > { %5600 = vperm.xlu0 %5567, %v6379_v2  }
 0xe5c   : > { %v2609_v8 = vpop.f32.mrb[16].mxu1 }
 0xe5d   : > { %v5219_v10 = vpop.f32.mrb[17].mxu1  ;;  %v2616_v59 = vrot.slane %v2609_v8, %v6053_v26  ;;  %v2847_v8 = vrot.slane %v6242_v47, 4 }
 0xe8b   : > { %v2521_v49 = vpop.permute.xlu0 %2520 }
 0xe8c   : > { %v2526_v4 = vsel %vm1578_vm12, %v2521_v49, 0.0 }
 0xe8d   : > { %2527 = vadd.xlane.f32.xlu1 %v2526_v4 }
 0xe8f   : > { %v2523_v6 = vpop.permute.xlu0 %2522 }
 0xe90   : > { %v2529_v7 = vsel %vm1578_vm12, %v2523_v6, 0.0 }
 0xe91   : > { %2530 = vadd.xlane.f32.xlu1 %v2529_v7  ;;  %v2826_v7 = vrot.slane %v6212_v53, %v6078_v42 }
 0xea2   : > { %5605 = vrot.lane.b32.xlu1 %v6232_v44, %s5862_s19 }
 0xeb1   : > { %v2331_v16 = vpop.xlane.xlu1 %2330 }
 0xec9   : > { %v2328_v27 = vpop.xlane.xlu0 %2327 }
 0xeca   : > { %5666 = vrcp.f32 %v2328_v27 }
 0xecb   : > { %5668 = vrcp.f32 %v2331_v16 }
 0xed1   : > { %v5601_v17 = vpop.permute.xlu0 %5600 }
 0xed2   : > { %v6401_v29 = vunpack.i.h.bf16 %v5601_v17  ;;  %v6403_v30 = vunpack.i.l.bf16 %v5601_v17 }
 0xed4   : > { %v2029_v11 = vmul.f32 %v6403_v30, %v2021_v61  ;;  %v2030_v32 = vmul.f32 %v6401_v29, %v2026_v58  ;;  %v1797_v36 = vmul.f32 %v6403_v30, %v1779_v31  ;;  %v5667_v33 = vpop.eup %5666  ;;  %v1798_v60 = vmul.f32 %v6401_v29, %v1784_v35 }
 0xed5   : > { %v5669_v37 = vpop.eup %5668  ;;  %v2334_v21 = vmul.f32 %v5667_v33, %v2324_v5 }
 0xed6   : > { %5186 = vmatprep.mubr.msk.f32.mxu0 %vm1578_vm12, %v2029_v11  ;;  %v2335_v22 = vmul.f32 %v5669_v37, %v2325_v54 }
 0xed7   : > { %5187 = vmatmul.mubr.msk.f32.vlgmr.msra.gmra.mrb[18].mxu0 %vm1578_vm12, %v2030_v32 }
 0xed8   : > { %5190 = vmatpush3.msra.mxu0 %v361_v48  ;;  %5191 = vmatprep.mubr.msk.f32.mxu0 %vm1578_vm12, %v1797_v36 }
 0xed9   : > { %5415 = vmatprep.subr.bf16.mxu0 %v6308_v13 }
 0xedf   : > { %5192 = vmatmul.mubr.msk.f32.vlgmr.msra.gmra.mrb[18].mxu0 %vm1578_vm12, %v1798_v60 }
 0xee0   : > { %5417 = vmatpush3.bf16.msra.mxu0 %v6308_v13  ;;  %5205 = vmatprep.mubr.msk.f32.mxu0 %vm383_vm0, %v2334_v21 }
 0xee1   : > { %5208 = vmatprep.subr.mxu0 %v363_v40 }
 0xee3   : > { %5206 = vmatmul.mubr.msk.f32.vlgmr.msra.gmra.mrb[20].mxu0 %vm383_vm0, %v2335_v22 }
 0xee4   : > { %5209 = vmatpush3.msra.mxu0 %v363_v40 }
 0xee5   : > { %5423 = vmatprep.subr.bf16.mxu0 %v6343_v18 }
 0xf1a   : > { %v2528_v23 = vpop.xlane.xlu1 %2527 }
 0xf1b   : > { %v2617_v45 = vadd.f32 %v2616_v59, %v2528_v23 }
 0xf1d   : > { %v2621_v46 = vmul.f32 0.2, %v2617_v45  ;;  %vm2619_vm2 = vcmp.gt.f32.partialorder %v2617_v45, 0.0 }
 0xf1e   : > { %v2531_v55 = vpop.xlane.xlu1 %2530 }
 0xf1f   : > { %v2618_v56 = vadd.f32 %v2616_v59, %v2531_v55  ;;  %v2623_v57 = vsel %vm2619_vm2, %v2617_v45, %v2621_v46 }
 0xf20   : > { %v2625_v13 = vsel %vm6260_vm3, %v2623_v57, -1e+30 }
 0xf21   : > { %v2622_v62 = vmul.f32 0.2, %v2618_v56  ;;  %v2627_v54 = vsel %vm383_vm0, %v2625_v13, -inf  ;;  %vm2620_vm5 = vcmp.gt.f32.partialorder %v2618_v56, 0.0 }
 0xf22   : > { %2628 = vmax.xlane.f32.xlu0 %v2627_v54  ;;  %v5606_v5 = vpop.permute.xlu1 %5605 }
 0xf23   : > { %v5608_v63 = vunpack.i.h.bf16 %v5606_v5  ;;  %v5607_v3 = vunpack.i.l.bf16 %v5606_v5  ;;  %v2624_v48 = vsel %vm2620_vm5, %v2618_v56, %v2622_v62 }
 0xf24   : > { %v2626_v49 = vsel %vm6264_vm7, %v2624_v48, -1e+30 }
 0xf25   : > { %v6429_v4 = vpack.c.bf16 %v5608_v63, %v5607_v3  ;;  %v2630_v6 = vsel %vm383_vm0, %v2626_v49, -inf }
 0xf26   : > { %2631 = vmax.xlane.f32.xlu1 %v2630_v6 }
 0xf27   : > { %5429 = vmatpush3.bf16.xpose.msk.msra.mxu1 %vm6223_vm13, %v6429_v4 }
 0xf28   : > { %5434 = vmatprep.subr.bf16.mxu1 %v5854_v19 }
 0xf2e   : > { %5237 = vmatmul.mubr.msk.f32.vlgmr.msra.gmra.mrb[18].mxu1 %vm1578_vm12, %v2847_v8 }
 0xf2f   : > { %5255 = vmatprep.mubr.msk.f32.mxu1 %vm5855_vm11, %v5851_v9 }
 0xf38   : > { %2828 = vrot.lane.b32.xlu0 %v2826_v7, %s5863_s22 }
 0xfaf   : > { %v2629_v10 = vpop.xlane.xlu0 %2628 }
 0xfb0   : > { %v2633_v36 = vsub.f32 %v2625_v13, %v2629_v10 }
 0xfb2   : > { %v2635_v35 = vmul.f32 1.442695, %v2633_v36 }
 0xfb3   : > { %v2829_v27 = vpop.permute.xlu0 %2828  ;;  %v2632_v33 = vpop.xlane.xlu1 %2631 }
 0xfb4   : > { %v2831_v15 = vmul.f32 %v2829_v27, %v6218_v38  ;;  %v2832_v16 = vmul.f32 %v6216_v20, %v2829_v27  ;;  %v2634_v60 = vsub.f32 %v2626_v49, %v2632_v33  ;;  %5670 = vpow2.f32 %v2635_v35 }
 0xfb6   : > { %v5207_v17 = vpop.f32.mrb[20].mxu0  ;;  %2837 = vrot.lane.b32.xlu0 %v2832_v16, %s5862_s19  ;;  %2835 = vrot.lane.b32.xlu1 %v2831_v15, %s5862_s19  ;;  %v2637_v37 = vmul.f32 1.442695, %v2634_v60  ;;  %v3141_v60 = vrot.slane %v6212_v53, %v6109_v34 }
 0xfb7   : > { %v2420_v58 = vadd.f32 %v5207_v17, %v2339_v14  ;;  %v2414_v61 = vpop.f32.mrb[21].mxu0 }
 0xfb8   : > { %v2415_v31 = vadd.f32 %v2414_v61, %v2339_v14  ;;  %5672 = vpow2.f32 %v2637_v37  ;;  %v3162_v37 = vrot.slane %v6242_v47, 5 }
 0xfb9   : > { %v2424_v32 = vmul.f32 %v6401_v29, %v2420_v58 }
 0xfba   : > { %v2423_v11 = vmul.f32 %v6403_v30, %v2415_v31 }
 0xfbc   : > { %5210 = vmatprep.mubr.msk.f32.mxu0 %vm1578_vm12, %v2423_v11 }
 0xfbd   : > { %5211 = vmatmul.mubr.msk.f32.vlgmr.msra.gmra.mrb[18].mxu0 %vm1578_vm12, %v2424_v32 }
 0xfbe   : > { %5425 = vmatpush3.bf16.msra.mxu0 %v6343_v18  ;;  %v5671_v21 = vpop.eup %5670  ;;  %v364_v18 = vld [vmem:[%s6879_s6 + $0x18] sm:$0xff] }
 0xfbf   : > { %v2639_v40 = vsel %vm6260_vm3, %v5671_v21, 0.0  ;;  %5227 = vmatprep.subr.mxu0 %v364_v18  ;;  %v2654_v21 = vrot.slane %v6395_v12, %v6075_v41 }
 0xfc0   : > { %v2641_v59 = vsel %vm383_vm0, %v2639_v40, 0.0 }
 0xfc2   : > { %v5673_v22 = vpop.eup %5672 }
 0xfc3   : > { %v2640_v23 = vsel %vm6264_vm7, %v5673_v22, 0.0 }
 0xfc4   : > { %v2644_v45 = vsel %vm383_vm0, %v2640_v23, 0.0 }
 0xfd5   : > { %2642 = vadd.xlane.f32.xlu0 %v2641_v59 }
 0xfda   : > { %2645 = vadd.xlane.f32.xlu1 %v2644_v45 }
0x1001   : > { %v2924_v13 = vpop.f32.mrb[18].mxu1 }
0x1002   : > { %v5238_v62 = vpop.f32.mrb[19].mxu1  ;;  %v2931_v6 = vrot.slane %v2924_v13, %v6053_v26 }
0x1028   : > { %v2836_v46 = vpop.permute.xlu1 %2835  ;;  %v2838_v56 = vpop.permute.xlu0 %2837 }
0x1029   : > { %v2841_v55 = vsel %vm1578_vm12, %v2836_v46, 0.0  ;;  %v2844_v57 = vsel %vm1578_vm12, %v2838_v56, 0.0 }
0x102a   : > { %2842 = vadd.xlane.f32.xlu0 %v2841_v55 }
0x102e   : > { %2845 = vadd.xlane.f32.xlu0 %v2844_v57 }
0x1044   : > { %5610 = vrot.lane.b32.xlu0 %v6232_v44, %s5864_s25 }
0x1062   : > { %v2643_v54 = vpop.xlane.xlu0 %2642 }
0x1063   : > { %5674 = vrcp.f32 %v2643_v54 }
0x1067   : > { %v2646_v5 = vpop.xlane.xlu1 %2645 }
0x1068   : > { %5676 = vrcp.f32 %v2646_v5 }
0x106d   : > { %v5675_v63 = vpop.eup %5674 }
0x106e   : > { %v2649_v3 = vmul.f32 %v5675_v63, %v2639_v40 }
0x1070   : > { %5224 = vmatprep.mubr.msk.f32.mxu0 %vm383_vm0, %v2649_v3 }
0x1072   : > { %v5677_v48 = vpop.eup %5676 }
0x1073   : > { %v2650_v49 = vmul.f32 %v5677_v48, %v2640_v23 }
0x1075   : > { %5225 = vmatmul.mubr.msk.f32.vlgmr.msra.gmra.mrb[22].mxu0 %vm383_vm0, %v2650_v49 }
0x1076   : > { %5228 = vmatpush3.msra.mxu0 %v364_v18 }
0x1077   : > { %5431 = vmatprep.subr.bf16.mxu0 %v6429_v4 }
0x10b7   : > { %v2843_v7 = vpop.xlane.xlu0 %2842 }
0x10b8   : > { %v2932_v8 = vadd.f32 %v2931_v6, %v2843_v7 }
0x10ba   : > { %v2936_v10 = vmul.f32 0.2, %v2932_v8  ;;  %vm2934_vm6 = vcmp.gt.f32.partialorder %v2932_v8, 0.0 }
0x10bb   : > { %v2846_v27 = vpop.xlane.xlu0 %2845 }
0x10bc   : > { %v2933_v14 = vadd.f32 %v2931_v6, %v2846_v27  ;;  %v2938_v15 = vsel %vm2934_vm6, %v2932_v8, %v2936_v10  ;;  %v365_v8 = vld [vmem:[%s6879_s6 + $0x20] sm:$0xff]  ;;  %vm4423_vm6 = vcmask 7168  }
0x10bd   : > { %v2940_v16 = vsel %vm6260_vm3, %v2938_v15, -1e+30 }
0x10be   : > { %v2937_v17 = vmul.f32 0.2, %v2933_v14  ;;  %v2942_v58 = vsel %vm383_vm0, %v2940_v16, -inf  ;;  %vm2935_vm8 = vcmp.gt.f32.partialorder %v2933_v14, 0.0 }
0x10bf   : > { %v5611_v61 = vpop.permute.xlu0 %5610  ;;  %2943 = vmax.xlane.f32.xlu1 %v2942_v58 }
0x10c0   : > { %v5613_v31 = vunpack.i.h.bf16 %v5611_v61  ;;  %v5612_v11 = vunpack.i.l.bf16 %v5611_v61  ;;  %v2939_v32 = vsel %vm2935_vm8, %v2933_v14, %v2937_v17  ;;  %vm4418_vm8 = vcmp.eq.s32.totalorder %v6251_v51, 1 }
0x10c1   : > { %v2941_v36 = vsel %vm6264_vm7, %v2939_v32, -1e+30 }
0x10c2   : > { %v6475_v33 = vpack.c.bf16 %v5613_v31, %v5612_v11  ;;  %v2945_v35 = vsel %vm383_vm0, %v2941_v36, -inf }
0x10c3   : > { %2946 = vmax.xlane.f32.xlu1 %v2945_v35 }
0x10c4   : > { %5437 = vmatpush3.bf16.xpose.msk.msra.mxu1 %vm6223_vm13, %v6475_v33 }
0x10c5   : > { %5442 = vmatprep.subr.bf16.mxu1 %v5854_v19 }
0x10cb   : > { %5256 = vmatmul.mubr.msk.f32.vlgmr.msra.gmra.mrb[20].mxu1 %vm1578_vm12, %v3162_v37 }
0x10cc   : > { %5274 = vmatprep.mubr.msk.f32.mxu1 %vm5855_vm11, %v5851_v9 }
0x10d4   : > { %3143 = vrot.lane.b32.xlu1 %v3141_v60, %s5865_s20  ;;  %s5869_s20 = smov 56  }
0x1148   : > { %v5226_v40 = vpop.f32.mrb[22].mxu0 }
0x1149   : > { %v2735_v22 = vadd.f32 %v5226_v40, %v2654_v21  ;;  %v2729_v59 = vpop.f32.mrb[23].mxu0 }
0x114a   : > { %v2730_v23 = vadd.f32 %v2729_v59, %v2654_v21 }
0x114b   : > { %v2739_v46 = vmul.f32 %v6401_v29, %v2735_v22 }
0x114c   : > { %v2738_v45 = vmul.f32 %v6403_v30, %v2730_v23  ;;  %v2944_v18 = vpop.xlane.xlu1 %2943 }
0x114d   : > { %v2948_v3 = vsub.f32 %v2940_v16, %v2944_v18 }
0x114e   : > { %5229 = vmatprep.mubr.msk.f32.mxu0 %vm1578_vm12, %v2738_v45 }
0x114f   : > { %5230 = vmatmul.mubr.msk.f32.vlgmr.msra.gmra.mrb[18].mxu0 %vm1578_vm12, %v2739_v46  ;;  %v2950_v48 = vmul.f32 1.442695, %v2948_v3  ;;  %v2969_v3 = vrot.slane %v6395_v12, %v6078_v42 }
0x1150   : > { %5433 = vmatpush3.bf16.msra.mxu0 %v6429_v4  ;;  %v2947_v55 = vpop.xlane.xlu1 %2946 }
0x1151   : > { %v2949_v56 = vsub.f32 %v2941_v36, %v2947_v55  ;;  %5246 = vmatprep.subr.mxu0 %v365_v8 }
0x1153   : > { %v2952_v57 = vmul.f32 1.442695, %v2949_v56 }
0x1154   : > { %v3144_v13 = vpop.permute.xlu1 %3143 }
0x1155   : > { %5678 = vpow2.f32 %v2952_v57  ;;  %v3146_v62 = vmul.f32 %v3144_v13, %v6218_v38  ;;  %v3147_v54 = vmul.f32 %v6216_v20, %v3144_v13 }
0x1156   : > { %5680 = vpow2.f32 %v2950_v48 }
0x1157   : > { %3150 = vrot.lane.b32.xlu0 %v3146_v62, %s5864_s25 }
0x115b   : > { %3152 = vrot.lane.b32.xlu0 %v3147_v54, %s5864_s25  ;;  %s5870_s25 = smov 2  }
0x115f   : > { %v5679_v5 = vpop.eup %5678 }
0x1160   : > { %v2955_v63 = vsel %vm6264_vm7, %v5679_v5, 0.0  ;;  %v5681_v49 = vpop.eup %5680  ;;  %v3456_v5 = vrot.slane %v6212_v53, %v6127_v50 }
0x1161   : > { %v2959_v4 = vsel %vm383_vm0, %v2955_v63, 0.0  ;;  %v2954_v6 = vsel %vm6260_vm3, %v5681_v49, 0.0 }
0x1162   : > { %2960 = vadd.xlane.f32.xlu1 %v2959_v4  ;;  %v2956_v7 = vsel %vm383_vm0, %v2954_v6, 0.0 }
0x117a   : > { %2957 = vadd.xlane.f32.xlu0 %v2956_v7 }
0x119e   : > { %v3239_v16 = vpop.f32.mrb[20].mxu1 }
0x119f   : > { %v5257_v17 = vpop.f32.mrb[21].mxu1  ;;  %v3246_v35 = vrot.slane %v3239_v16, %v6053_v26 }
0x11c9   : > { %v3151_v10 = vpop.permute.xlu0 %3150 }
0x11ca   : > { %v3156_v27 = vsel %vm1578_vm12, %v3151_v10, 0.0 }
0x11cb   : > { %3157 = vadd.xlane.f32.xlu0 %v3156_v27 }
0x11cd   : > { %v3153_v14 = vpop.permute.xlu0 %3152 }
0x11ce   : > { %v3159_v15 = vsel %vm1578_vm12, %v3153_v14, 0.0 }
0x11cf   : > { %3160 = vadd.xlane.f32.xlu0 %v3159_v15 }
0x11e5   : > { %5615 = vrot.lane.b32.xlu0 %v6232_v44, %s5866_s13 }
0x11ef   : > { %v2961_v58 = vpop.xlane.xlu1 %2960 }
0x11f0   : > { %5682 = vrcp.f32 %v2961_v58 }
0x11fa   : > { %v5683_v31 = vpop.eup %5682 }
0x11fb   : > { %v2965_v36 = vmul.f32 %v5683_v31, %v2955_v63  ;;  %v3477_v63 = vrot.slane %v6242_v47, 6 }
0x1207   : > { %v2958_v61 = vpop.xlane.xlu0 %2957 }
0x1208   : > { %5684 = vrcp.f32 %v2958_v61 }
0x1212   : > { %v5685_v11 = vpop.eup %5684 }
0x1213   : > { %v2964_v32 = vmul.f32 %v5685_v11, %v2954_v6 }
0x1215   : > { %5243 = vmatprep.mubr.msk.f32.mxu0 %vm383_vm0, %v2964_v32 }
0x1216   : > { %5244 = vmatmul.mubr.msk.f32.vlgmr.msra.gmra.mrb[24].mxu0 %vm383_vm0, %v2965_v36  ;;  %v366_v36 = vld [vmem:[%s6879_s6 + $0x28] sm:$0xff] }
0x1217   : > { %5247 = vmatpush3.msra.mxu0 %v365_v8 }
0x1218   : > { %5439 = vmatprep.subr.bf16.mxu0 %v6475_v33 }
0x1258   : > { %v3158_v60 = vpop.xlane.xlu0 %3157 }
0x1259   : > { %v3247_v37 = vadd.f32 %v3246_v35, %v3158_v60 }
0x125b   : > { %v3251_v21 = vmul.f32 0.2, %v3247_v37  ;;  %vm3249_vm9 = vcmp.gt.f32.partialorder %v3247_v37, 0.0 }
0x125c   : > { %v3161_v40 = vpop.xlane.xlu0 %3160 }
0x125d   : > { %v3248_v22 = vadd.f32 %v3246_v35, %v3161_v40  ;;  %v3253_v59 = vsel %vm3249_vm9, %v3247_v37, %v3251_v21  ;;  %vm4433_vm9 = vcmp.eq.s32.totalorder %v6251_v51, 2 }
0x125e   : > { %v3255_v23 = vsel %vm6260_vm3, %v3253_v59, -1e+30 }
0x125f   : > { %v3252_v45 = vmul.f32 0.2, %v3248_v22  ;;  %v3257_v18 = vsel %vm383_vm0, %v3255_v23, -inf  ;;  %vm3250_vm10 = vcmp.gt.f32.partialorder %v3248_v22, 0.0 }
0x1260   : > { %v5616_v46 = vpop.permute.xlu0 %5615  ;;  %3258 = vmax.xlane.f32.xlu1 %v3257_v18 }
0x1261   : > { %v5618_v55 = vunpack.i.h.bf16 %v5616_v46  ;;  %v5617_v56 = vunpack.i.l.bf16 %v5616_v46  ;;  %v3254_v57 = vsel %vm3250_vm10, %v3248_v22, %v3252_v45  ;;  %vm4452_vm10 = vcmp.eq.s32.totalorder %v6251_v51, 3 }
0x1262   : > { %v3256_v13 = vsel %vm6264_vm7, %v3254_v57, -1e+30 }
0x1263   : > { %v6521_v62 = vpack.c.bf16 %v5618_v55, %v5617_v56  ;;  %v3260_v54 = vsel %vm383_vm0, %v3256_v13, -inf }
0x1264   : > { %3261 = vmax.xlane.f32.xlu1 %v3260_v54 }
0x1265   : > { %5445 = vmatpush3.bf16.xpose.msk.msra.mxu1 %vm6223_vm13, %v6521_v62 }
0x1266   : > { %5450 = vmatprep.subr.bf16.mxu1 %v5854_v19 }
0x126c   : > { %5275 = vmatmul.mubr.msk.f32.vlgmr.msra.gmra.mrb[22].mxu1 %vm1578_vm12, %v3477_v63 }
0x126d   : > { %5293 = vmatprep.mubr.msk.f32.mxu1 %vm5855_vm11, %v5851_v9 }
0x1275   : > { %3458 = vrot.lane.b32.xlu1 %v3456_v5, %s5867_s18 }
0x12e9   : > { %v5245_v4 = vpop.f32.mrb[24].mxu0 }
0x12ea   : > { %v3050_v48 = vadd.f32 %v5245_v4, %v2969_v3  ;;  %v3044_v49 = vpop.f32.mrb[25].mxu0 }
0x12eb   : > { %v3045_v6 = vadd.f32 %v3044_v49, %v2969_v3 }
0x12ec   : > { %v3054_v53 = vmul.f32 %v6401_v29, %v3050_v48 }
0x12ed   : > { %v3053_v19 = vmul.f32 %v6403_v30, %v3045_v6  ;;  %v3259_v7 = vpop.xlane.xlu1 %3258 }
0x12ee   : > { %v3263_v8 = vsub.f32 %v3255_v23, %v3259_v7 }
0x12ef   : > { %5248 = vmatprep.mubr.msk.f32.mxu0 %vm1578_vm12, %v3053_v19 }
0x12f0   : > { %v3265_v47 = vmul.f32 1.442695, %v3263_v8  ;;  %5249 = vmatmul.mubr.msk.f32.vlgmr.msra.gmra.mrb[18].mxu0 %vm1578_vm12, %v3054_v53 }
0x12f1   : > { %5441 = vmatpush3.bf16.msra.mxu0 %v6475_v33  ;;  %v3262_v10 = vpop.xlane.xlu1 %3261 }
0x12f2   : > { %5686 = vpow2.f32 %v3265_v47  ;;  %v3264_v61 = vsub.f32 %v3256_v13, %v3262_v10  ;;  %5265 = vmatprep.subr.mxu0 %v366_v36  ;;  %v5712_v10 = vld [vmem:[%s6878_s5] sm:$0xff] }
0x12f4   : > { %v3267_v33 = vmul.f32 1.442695, %v3264_v61 }
0x12f5   : > { %v3459_v27 = vpop.permute.xlu1 %3458 }
0x12f6   : > { %v3461_v14 = vmul.f32 %v3459_v27, %v6218_v38  ;;  %v3462_v15 = vmul.f32 %v6216_v20, %v3459_v27  ;;  %5688 = vpow2.f32 %v3267_v33  ;;  %v3771_v27 = vrot.slane %v5712_v10, %v6132_v52 }
0x12f8   : > { %3465 = vrot.lane.b32.xlu0 %v3461_v14, %s5866_s13  ;;  %v3792_v14 = vrot.slane %v5713_v43, 7 }
0x12fc   : > { %v5687_v16 = vpop.eup %5686  ;;  %3467 = vrot.lane.b32.xlu0 %v3462_v15, %s5866_s13  ;;  %v6582_v15 = vld [vmem:[%s6011_s26] sm:$0xff] }
0x12fd   : > { %v3269_v17 = vsel %vm6260_vm3, %v5687_v16, 0.0  ;;  %v3284_v16 = vrot.slane %v6395_v12, %v6109_v34 }
0x12fe   : > { %v3271_v58 = vsel %vm383_vm0, %v3269_v17, 0.0 }
0x12ff   : > { %3272 = vadd.xlane.f32.xlu1 %v3271_v58 }
0x1300   : > { %v5689_v31 = vpop.eup %5688 }
0x1301   : > { %v3270_v11 = vsel %vm6264_vm7, %v5689_v31, 0.0 }
0x1302   : > { %v3274_v32 = vsel %vm383_vm0, %v3270_v11, 0.0 }
0x131b   : > { %3275 = vadd.xlane.f32.xlu0 %v3274_v32 }
0x133f   : > { %v3554_v40 = vpop.f32.mrb[22].mxu1 }
0x1340   : > { %v5276_v22 = vpop.f32.mrb[23].mxu1  ;;  %v3561_v56 = vrot.slane %v3554_v40, %v6053_v26 }
0x136a   : > { %v3466_v35 = vpop.permute.xlu0 %3465 }
0x136b   : > { %v3471_v60 = vsel %vm1578_vm12, %v3466_v35, 0.0 }
0x136c   : > { %3472 = vadd.xlane.f32.xlu0 %v3471_v60 }
0x136e   : > { %v3468_v37 = vpop.permute.xlu0 %3467 }
0x136f   : > { %v3474_v21 = vsel %vm1578_vm12, %v3468_v37, 0.0 }
0x1370   : > { %3475 = vadd.xlane.f32.xlu1 %v3474_v21 }
0x1382   : > { %5620 = vrot.lane.b32.xlu0 %v6232_v44, %s5868_s23 }
0x138c   : > { %v3273_v59 = vpop.xlane.xlu1 %3272 }
0x138d   : > { %5690 = vrcp.f32 %v3273_v59 }
0x1397   : > { %v5691_v23 = vpop.eup %5690 }
0x1398   : > { %v3279_v45 = vmul.f32 %v5691_v23, %v3269_v17 }
0x139a   : > { %5262 = vmatprep.mubr.msk.f32.mxu0 %vm383_vm0, %v3279_v45 }
0x13a8   : > { %v3276_v18 = vpop.xlane.xlu0 %3275 }
0x13a9   : > { %5692 = vrcp.f32 %v3276_v18 }
0x13b3   : > { %v5693_v46 = vpop.eup %5692 }
0x13b4   : > { %v3280_v55 = vmul.f32 %v5693_v46, %v3270_v11 }
0x13b6   : > { %5263 = vmatmul.mubr.msk.f32.vlgmr.msra.gmra.mrb[26].mxu0 %vm383_vm0, %v3280_v55 }
0x13b7   : > { %5266 = vmatpush3.msra.mxu0 %v366_v36 }
0x13b8   : > { %5447 = vmatprep.subr.bf16.mxu0 %v6521_v62 }
0x13f9   : > { %v3473_v57 = vpop.xlane.xlu0 %3472 }
0x13fa   : > { %v3562_v13 = vadd.f32 %v3561_v56, %v3473_v57 }
0x13fc   : > { %v3566_v44 = vmul.f32 0.2, %v3562_v13  ;;  %vm3564_vm11 = vcmp.gt.f32.partialorder %v3562_v13, 0.0 }
0x13fd   : > { %v5621_v54 = vpop.permute.xlu0 %5620  ;;  %v3476_v5 = vpop.xlane.xlu1 %3475 }
0x13fe   : > { %v5623_v63 = vunpack.i.h.bf16 %v5621_v54  ;;  %v5622_v3 = vunpack.i.l.bf16 %v5621_v54  ;;  %v3563_v4 = vadd.f32 %v3561_v56, %v3476_v5  ;;  %v3568_v48 = vsel %vm3564_vm11, %v3562_v13, %v3566_v44 }
0x13ff   : > { %v3570_v49 = vsel %vm6260_vm3, %v3568_v48, -1e+30  ;;  %vm4471_vm11 = vcmp.eq.s32.totalorder %v6251_v51, 4 }
0x1400   : > { %v6564_v6 = vpack.c.bf16 %v5623_v63, %v5622_v3  ;;  %v3567_v19 = vmul.f32 0.2, %v3563_v4  ;;  %v3572_v7 = vsel %vm383_vm0, %v3570_v49, -inf  ;;  %vm3565_vm14 = vcmp.gt.f32.partialorder %v3563_v4, 0.0 }
0x1401   : > { %3573 = vmax.xlane.f32.xlu1 %v3572_v7 }
0x1402   : > { %5453 = vmatpush3.bf16.xpose.msk.msra.mxu1 %vm6223_vm13, %v6564_v6  ;;  %v3569_v53 = vsel %vm3565_vm14, %v3563_v4, %v3567_v19  ;;  %vm4490_vm14 = vcmp.eq.s32.totalorder %v6251_v51, 5 }
0x1403   : > { %v3571_v8 = vsel %vm6264_vm7, %v3569_v53, -1e+30 }
0x1404   : > { %v3575_v47 = vsel %vm383_vm0, %v3571_v8, -inf }
0x1405   : > { %3576 = vmax.xlane.f32.xlu1 %v3575_v47 }
0x1409   : > { %5294 = vmatmul.mubr.msk.f32.vlgmr.msra.gmra.mrb[24].mxu1 %vm1578_vm12, %v3792_v14 }
0x140a   : > { %5312 = vmatprep.mubr.msk.f32.mxu1 %vm383_vm0, %v6582_v15 }
0x1416   : > { %3773 = vrot.lane.b32.xlu1 %v3771_v27, %s5869_s20  ;;  %s5871_s20 = smov 1  }
0x1489   : > { %v5264_v17 = vpop.f32.mrb[26].mxu0 }
0x148a   : > { %v3365_v58 = vadd.f32 %v5264_v17, %v3284_v16  ;;  %v3359_v61 = vpop.f32.mrb[27].mxu0 }
0x148b   : > { %v3360_v33 = vadd.f32 %v3359_v61, %v3284_v16  ;;  %v3599_v61 = vrot.slane %v6395_v12, %v6127_v50 }
0x148c   : > { %v3369_v11 = vmul.f32 %v6401_v29, %v3365_v58 }
0x148d   : > { %v3368_v31 = vmul.f32 %v6403_v30, %v3360_v33 }
0x148e   : > { %v3574_v32 = vpop.xlane.xlu1 %3573 }
0x148f   : > { %v3578_v36 = vsub.f32 %v3570_v49, %v3574_v32  ;;  %5267 = vmatprep.mubr.msk.f32.mxu0 %vm1578_vm12, %v3368_v31 }
0x1490   : > { %5268 = vmatmul.mubr.msk.f32.vlgmr.msra.gmra.mrb[18].mxu0 %vm1578_vm12, %v3369_v11 }
0x1491   : > { %v3580_v35 = vmul.f32 1.442695, %v3578_v36  ;;  %5449 = vmatpush3.bf16.msra.mxu0 %v6521_v62 }
0x1492   : > { %v3577_v60 = vpop.xlane.xlu1 %3576 }
0x1493   : > { %5694 = vpow2.f32 %v3580_v35  ;;  %v3579_v45 = vsub.f32 %v3571_v8, %v3577_v60 }
0x1495   : > { %v3582_v62 = vmul.f32 1.442695, %v3579_v45 }
0x1496   : > { %v3774_v37 = vpop.permute.xlu1 %3773 }
0x1497   : > { %v3776_v21 = vmul.f32 %v3774_v37, %v6218_v38  ;;  %v3777_v40 = vmul.f32 %v6216_v20, %v3774_v37  ;;  %5696 = vpow2.f32 %v3582_v62  ;;  %v367_v20 = vld [vmem:[%s6879_s6 + $0x30] sm:$0xff] }
0x1498   : > { %5284 = vmatprep.subr.mxu0 %v367_v20 }
0x1499   : > { %3780 = vrot.lane.b32.xlu0 %v3776_v21, %s5868_s23 }
0x149d   : > { %v5695_v22 = vpop.eup %5694  ;;  %3782 = vrot.lane.b32.xlu0 %v3777_v40, %s5868_s23  ;;  %s6793_s23 = scalar_lea.hbm %s6880_s7, %s4899_s10 }
0x149e   : > { %v3584_v59 = vsel %vm6260_vm3, %v5695_v22, 0.0 }
0x149f   : > { %v3586_v23 = vsel %vm383_vm0, %v3584_v59, 0.0 }
0x14a0   : > { %3587 = vadd.xlane.f32.xlu1 %v3586_v23 }
0x14a1   : > { %v5697_v18 = vpop.eup %5696 }
0x14a2   : > { %v3585_v38 = vsel %vm6264_vm7, %v5697_v18, 0.0 }
0x14a3   : > { %v3589_v46 = vsel %vm383_vm0, %v3585_v38, 0.0 }
0x14bc   : > { %3590 = vadd.xlane.f32.xlu0 %v3589_v46 }
0x14dc   : > { %v3869_v44 = vpop.f32.mrb[24].mxu1 }
0x14dd   : > { %v5295_v54 = vpop.f32.mrb[25].mxu1  ;;  %v3876_v19 = vrot.slane %v3869_v44, %v6053_v26 }
0x150b   : > { %v3781_v55 = vpop.permute.xlu0 %3780 }
0x150c   : > { %v3786_v56 = vsel %vm1578_vm12, %v3781_v55, 0.0 }
0x150d   : > { %3787 = vadd.xlane.f32.xlu0 %v3786_v56 }
0x150f   : > { %v3783_v57 = vpop.permute.xlu0 %3782 }
0x1510   : > { %v3789_v13 = vsel %vm1578_vm12, %v3783_v57, 0.0  ;;  %v3914_v57 = vrot.slane %v6395_v12, %v6132_v52 }
0x1511   : > { %3790 = vadd.xlane.f32.xlu1 %v3789_v13 }
0x152d   : > { %v3588_v5 = vpop.xlane.xlu1 %3587 }
0x152e   : > { %5698 = vrcp.f32 %v3588_v5 }
0x1538   : > { %v5699_v63 = vpop.eup %5698 }
0x1539   : > { %v3594_v3 = vmul.f32 %v5699_v63, %v3584_v59 }
0x153b   : > { %5281 = vmatprep.mubr.msk.f32.mxu0 %vm383_vm0, %v3594_v3 }
0x1549   : > { %v3591_v4 = vpop.xlane.xlu0 %3590 }
0x154a   : > { %5700 = vrcp.f32 %v3591_v4  ;;  %v5715_v4 = vld [vmem:[%s6875_s2 + $0x10] sm:$0xff] }
0x1554   : > { %v5701_v48 = vpop.eup %5700 }
0x1555   : > { %v3595_v49 = vmul.f32 %v5701_v48, %v3585_v38  ;;  %v4086_v48 = vrot.slane %v5715_v4, %v6061_v28  ;;  %v4112_v28 = vrot.slane %v5715_v4, %v6078_v42  ;;  %v4176_v42 = vmul.f32 1e-06, %v6372_v1 }
0x1557   : > { %5282 = vmatmul.mubr.msk.f32.vlgmr.msra.gmra.mrb[28].mxu0 %vm383_vm0, %v3595_v49 }
0x1558   : > { %5285 = vmatpush3.msra.mxu0 %v367_v20 }
0x1559   : > { %5455 = vmatprep.subr.bf16.mxu0 %v6564_v6 }
0x159a   : > { %v3788_v7 = vpop.xlane.xlu0 %3787 }
0x159b   : > { %v3877_v53 = vadd.f32 %v3876_v19, %v3788_v7 }
0x159d   : > { %v3881_v8 = vmul.f32 0.2, %v3877_v53  ;;  %vm3879_vm13 = vcmp.gt.f32.partialorder %v3877_v53, 0.0 }
0x159e   : > { %v3791_v47 = vpop.xlane.xlu1 %3790 }
0x159f   : > { %v3878_v10 = vadd.f32 %v3876_v19, %v3791_v47  ;;  %v3883_v27 = vsel %vm3879_vm13, %v3877_v53, %v3881_v8  ;;  %v4100_v8 = vrot.slane %v5715_v4, %v6070_v39  ;;  %vm4509_vm13 = vcmp.eq.s32.totalorder %v6251_v51, 6 }
0x15a0   : > { %v3885_v43 = vsel %vm6260_vm3, %v3883_v27, -1e+30 }
0x15a1   : > { %v3882_v14 = vmul.f32 0.2, %v3878_v10  ;;  %v3887_v16 = vsel %vm383_vm0, %v3885_v43, -inf  ;;  %vm3880_vm15 = vcmp.gt.f32.partialorder %v3878_v10, 0.0 }
0x15a2   : > { %3888 = vmax.xlane.f32.xlu0 %v3887_v16 }
0x15a3   : > { %v3884_v17 = vsel %vm3880_vm15, %v3878_v10, %v3882_v14  ;;  %vm4528_vm15 = vcmp.eq.s32.totalorder %v6251_v51, 7 }
0x15a4   : > { %v3886_v58 = vsel %vm6264_vm7, %v3884_v17, -1e+30 }
0x15a5   : > { %v3890_v26 = vsel %vm383_vm0, %v3886_v58, -inf }
0x15a6   : > { %3891 = vmax.xlane.f32.xlu1 %v3890_v26 }
0x162a   : > { %v5283_v33 = vpop.f32.mrb[28].mxu0 }
0x162b   : > { %v3680_v31 = vadd.f32 %v5283_v33, %v3599_v61  ;;  %v3674_v11 = vpop.f32.mrb[29].mxu0 }
0x162c   : > { %v3675_v32 = vadd.f32 %v3674_v11, %v3599_v61  ;;  %v5716_v11 = vld [vmem:[%s6016_s17 + $0x8] sm:$0xff] }
0x162d   : > { %v3684_v35 = vmul.f32 %v6401_v29, %v3680_v31 }
0x162e   : > { %v3683_v36 = vmul.f32 %v6403_v30, %v3675_v32  ;;  %v5717_v32 = vld [vmem:[%s6016_s17] sm:$0xff]  ;;  %s5872_s17 = smov 126  }
0x162f   : > { %v3889_v60 = vpop.xlane.xlu0 %3888 }
0x1630   : > { %v3893_v37 = vsub.f32 %v3885_v43, %v3889_v60  ;;  %5286 = vmatprep.mubr.msk.f32.mxu0 %vm1578_vm12, %v3683_v36  ;;  %v4106_v43 = vrot.slane %v5715_v4, %v6075_v41  ;;  %v4175_v41 = vmul.f32 1e-06, %v6375_v25  ;;  %v4124_v36 = vrot.slane %v5715_v4, %v6109_v34 }
0x1631   : > { %5287 = vmatmul.mubr.msk.f32.vlgmr.msra.gmra.mrb[18].mxu0 %vm1578_vm12, %v3684_v35 }
0x1632   : > { %v3895_v21 = vmul.f32 1.442695, %v3893_v37  ;;  %5457 = vmatpush3.bf16.msra.mxu0 %v6564_v6 }
0x1633   : > { %v3892_v40 = vpop.xlane.xlu1 %3891  ;;  %5303 = vmatprep.subr.mxu0 %v368_v0 }
0x1634   : > { %5702 = vpow2.f32 %v3895_v21  ;;  %v3894_v50 = vsub.f32 %v3886_v58, %v3892_v40 }
0x1636   : > { %v3897_v22 = vmul.f32 1.442695, %v3894_v50 }
0x1638   : > { %5704 = vpow2.f32 %v3897_v22 }
0x163e   : > { %v5703_v59 = vpop.eup %5702 }
0x163f   : > { %v3899_v23 = vsel %vm6260_vm3, %v5703_v59, 0.0 }
0x1640   : > { %v3901_v45 = vsel %vm383_vm0, %v3899_v23, 0.0 }
0x1641   : > { %3902 = vadd.xlane.f32.xlu0 %v3901_v45 }
0x1642   : > { %v5705_v62 = vpop.eup %5704 }
0x1643   : > { %v3900_v18 = vsel %vm6264_vm7, %v5705_v62, 0.0 }
0x1644   : > { %v3904_v38 = vsel %vm383_vm0, %v3900_v18, 0.0 }
0x1645   : > { %3905 = vadd.xlane.f32.xlu1 %v3904_v38 }
0x16ce   : > { %v3903_v6 = vpop.xlane.xlu0 %3902 }
0x16cf   : > { %5706 = vrcp.f32 %v3903_v6 }
0x16d2   : > { %v3906_v46 = vpop.xlane.xlu1 %3905 }
0x16d3   : > { %5708 = vrcp.f32 %v3906_v46 }
0x16d9   : > { %v5707_v20 = vpop.eup %5706 }
0x16da   : > { %v3909_v55 = vmul.f32 %v5707_v20, %v3899_v23 }
0x16dc   : > { %5300 = vmatprep.mubr.msk.f32.mxu0 %vm383_vm0, %v3909_v55 }
0x16dd   : > { %v5709_v24 = vpop.eup %5708 }
0x16de   : > { %v3910_v56 = vmul.f32 %v5709_v24, %v3900_v18 }
0x16e0   : > { %5301 = vmatmul.mubr.msk.f32.vlgmr.msra.gmra.mrb[30].mxu0 %vm383_vm0, %v3910_v56 }
0x16e1   : > { %5304 = vmatpush3.msra.mxu0 %v368_v0 }
0x17b3   : > { %v5302_v13 = vpop.f32.mrb[30].mxu0 }
0x17b4   : > { %v3995_v44 = vadd.f32 %v5302_v13, %v3914_v57  ;;  %v3989_v54 = vpop.f32.mrb[31].mxu0 }
0x17b5   : > { %v3990_v5 = vadd.f32 %v3989_v54, %v3914_v57 }
0x17b6   : > { %v3999_v3 = vmul.f32 %v6401_v29, %v3995_v44 }
0x17b7   : > { %v3998_v63 = vmul.f32 %v6403_v30, %v3990_v5 }
0x17b9   : > { %5305 = vmatprep.mubr.msk.f32.mxu0 %vm1578_vm12, %v3998_v63 }
0x17ba   : > { %5306 = vmatmul.mubr.msk.f32.vlgmr.msra.gmra.mrb[18].mxu0 %vm1578_vm12, %v3999_v3 }
0x188d   : > { %v5307_v49 = vpop.f32.mrb[18].mxu0 }
0x188e   : > { %v4088_v52 = vadd.f32 %v5307_v49, %v4086_v48  ;;  %v4072_v12 = vpop.f32.mrb[19].mxu0 }
0x188f   : > { %v4087_v19 = vadd.f32 %v4086_v48, %v4072_v12 }
0x1890   : > { %vm4090_vm3 = vcmp.gt.f32.partialorder %v4088_v52, 0.0  ;;  %v4092_v7 = vmul.f32 0.01, %v4088_v52 }
0x1891   : > { %vm4089_vm7 = vcmp.gt.f32.partialorder %v4087_v19, 0.0  ;;  %v4091_v53 = vmul.f32 0.01, %v4087_v19 }
0x1892   : > { %v4094_v47 = vsel %vm4090_vm3, %v4088_v52, %v4092_v7  ;;  %vm4547_vm3 = vcmp.eq.s32.totalorder %v6251_v51, 8 }
0x1893   : > { %v4096_v10 = vmul.f32 %v6401_v29, %v4094_v47  ;;  %v4093_v27 = vsel %vm4089_vm7, %v4087_v19, %v4091_v53 }
0x1894   : > { %v4095_v14 = vmul.f32 %v6403_v30, %v4093_v27 }
0x1895   : > { %v4102_v16 = vmul.f32 %v4100_v8, %v4096_v10 }
0x1896   : > { %v4101_v17 = vmul.f32 %v4100_v8, %v4095_v14 }
0x1897   : > { %v4108_v58 = vadd.f32 %v4106_v43, %v4102_v16 }
0x1898   : > { %v4107_v26 = vadd.f32 %v4106_v43, %v4101_v17 }
0x1899   : > { %v4114_v61 = vmul.f32 %v4112_v28, %v4108_v58 }
0x189a   : > { %v4113_v33 = vmul.f32 %v4112_v28, %v4107_v26 }
0x189b   : > { %v4118_v39 = vsel %vm513_vm4, %v4114_v61, 0.0 }
0x189c   : > { %4119 = vadd.xlane.f32.xlu1 %v4118_v39  ;;  %v4115_v31 = vsel %vm513_vm4, %v4113_v33, 0.0 }
0x189d   : > { %4116 = vadd.xlane.f32.xlu0 %v4115_v31 }
0x18ad   : > { %4179 = vrot.lane.b32.xlu1 %v4175_v41, %s5870_s25  ;;  %v384_v41 = vsel %vm383_vm0, %v6582_v15, 0.0 }
0x18b1   : > { %4181 = vrot.lane.b32.xlu1 %v4176_v42, %s5870_s25  ;;  %v5718_v42 = vld [vmem:[%s6011_s26 + $0x8] sm:$0xff]  ;;  %s6766_s26 = sand.u32 1, %s5837_s28  }
0x18b2   : > { %s4782_s19 = sshll.u32 %s6766_s26, 4  ;;  %s4627_s24 = scalar_lea.sflag [#allocation4], %s6766_s26 }
0x18b3   : > { %5625 = vrot.lane.b32.xlu0 %v6379_v2, %s5870_s25  ;;  %s332_s13 = scalar_lea.vmem [#allocation5], %s4782_s19 }
0x18b4   : > { %s4645_s18 = sshll.u32 %s332_s13, 4  ;;  %s6795_s18 = int_to_ptr.vmem [resolvable:$true] %s4645_s18 }
0x18b5   : > { %4191 = vrot.lane.b32.xlu1 %v5716_v11, %s5871_s20  ;;  %v387_v11 = vsel %vm383_vm0, %v5718_v42, 0.0 }
0x18b7   : > { %4189 = vrot.lane.b32.xlu0 %v5717_v32, %s5871_s20  ;;  %s5875_s20 = smov [#allocation5]  }
0x1929   : > { %v4120_v35 = vpop.xlane.xlu1 %4119 }
0x192a   : > { %v4126_v60 = vadd.f32 %v4124_v36, %v4120_v35  ;;  %v4117_v37 = vpop.xlane.xlu0 %4116 }
0x192b   : > { %v4125_v21 = vadd.f32 %v4124_v36, %v4117_v37 }
0x192c   : > { %v4130_v40 = vmul.f32 0.01, %v4126_v60  ;;  %vm4128_vm4 = vcmp.gt.f32.partialorder %v4126_v60, 0.0 }
0x192d   : > { %vm4127_vm12 = vcmp.gt.f32.partialorder %v4125_v21, 0.0  ;;  %v4129_v50 = vmul.f32 0.01, %v4125_v21  ;;  %v4180_v12 = vpop.permute.xlu1 %4179 }
0x192e   : > { %v5626_v22 = vpop.permute.xlu0 %5625  ;;  %v4132_v2 = vsel %vm4128_vm4, %v4126_v60, %v4130_v40 }
0x192f   : > { %v4131_v59 = vsel %vm4127_vm12, %v4125_v21, %v4129_v50  ;;  %v5628_v23 = vunpack.i.h.bf16 %v5626_v22  ;;  %v5627_v45 = vunpack.i.l.bf16 %v5626_v22 }
0x1931   : > { %v4140_v62 = vmul.f32 %v5628_v23, %v4132_v2  ;;  %v4139_v18 = vmul.f32 %v5627_v45, %v4131_v59  ;;  %v4182_v8 = vpop.permute.xlu1 %4181  ;;  %v4443_v2 = vsel %vm4423_vm6, %v6375_v25, 0.0 }
0x1932   : > { %v4190_v16 = vpop.permute.xlu0 %4189 }
0x1933   : > { %v4147_v38 = vsel %vm4145_vm1, %v4140_v62, -inf  ;;  %v4158_v34 = vsel %vm4145_vm1, %v4140_v62, inf  ;;  %v4146_v6 = vsel %vm4145_vm1, %v4139_v18, -inf  ;;  %v4157_v46 = vsel %vm4145_vm1, %v4139_v18, inf }
0x1934   : > { %v4148_v20 = vmax.f32 %v4146_v6, %v4147_v38  ;;  %v4159_v55 = vmin.f32 %v4157_v46, %v4158_v34 }
0x1935   : > { %v4192_v14 = vpop.permute.xlu1 %4191 }
0x1936   : > { %v4149_v24 = vrot.slane %v4148_v20, 4  ;;  %v4160_v56 = vrot.slane %v4159_v55, 4 }
0x1938   : > { %v4150_v0 = vmax.f32 %v4148_v20, %v4149_v24  ;;  %v4161_v57 = vmin.f32 %v4159_v55, %v4160_v56 }
0x193a   : > { %v4151_v13 = vrot.slane %v4150_v0, 2  ;;  %v4162_v44 = vrot.slane %v4161_v57, 2 }
0x193c   : > { %v4152_v54 = vmax.f32 %v4150_v0, %v4151_v13  ;;  %v4163_v5 = vmin.f32 %v4161_v57, %v4162_v44 }
0x193e   : > { %v4153_v63 = vrot.slane %v4152_v54, 1  ;;  %v4164_v3 = vrot.slane %v4163_v5, 1 }
0x1940   : > { %v4154_v4 = vmax.f32 %v4152_v54, %v4153_v63  ;;  %v4165_v48 = vmin.f32 %v4163_v5, %v4164_v3 }
0x1942   : > { %v4168_v49 = vadd.f32 1e-06, %v4154_v4  ;;  %v4166_v19 = vsub.f32 %v4139_v18, %v4165_v48  ;;  %v4167_v7 = vsub.f32 %v4140_v62, %v4165_v48 }
0x1944   : > { %v4169_v52 = vsub.f32 %v4168_v49, %v4165_v48 }
0x1946   : > { %5710 = vrcp.f32 %v4169_v52 }
0x1950   : > { %v5711_v53 = vpop.eup %5710 }
0x1951   : > { %v4171_v47 = vmul.f32 %v5711_v53, %v4166_v19  ;;  %v4172_v10 = vmul.f32 %v5711_v53, %v4167_v7 }
0x1953   : > { %v4173_v27 = vmul.f32 %v5627_v45, %v4171_v47  ;;  %v4174_v43 = vmul.f32 %v5628_v23, %v4172_v10  ;;  %v4444_v45 = vsel %vm4423_vm6, %v6372_v1, 0.0 }
0x1954   : > { %v4445_v18 = vadd.f32 %v4444_v45, %v4443_v2 }
0x1955   : > { %v6666_v28 = vadd.f32 %v4180_v12, %v4173_v27  ;;  %v6668_v17 = vadd.f32 %v4182_v8, %v4174_v43 }
0x1956   : > { %v4446_v55 = vrot.slane %v4445_v18, 4 }
0x1957   : > { %v4196_v58 = vsub.f32 %v6668_v17, %v4192_v14  ;;  %v4195_v26 = vsub.f32 %v6666_v28, %v4190_v16  ;;  %v5629_v61 = vpack.i.bf16 %v6668_v17, %v6666_v28  ;;  %v4481_v46 = vsel %vm4145_vm1, %v6666_v28, 0.0 }
0x1958   : > { %v4482_v20 = vsel %vm4145_vm1, %v6668_v17, 0.0  ;;  %v4375_v24 = vmul.f32 %v6666_v28, %v6666_v28  ;;  %v4376_v63 = vmul.f32 %v6668_v17, %v6668_v17  ;;  %v4447_v4 = vadd.f32 %v4446_v55, %v4445_v18 }
0x1959   : > { %vm4198_vm2 = vcmp.gt.f32.partialorder %v4196_v58, 0.0  ;;  %vm4197_vm5 = vcmp.gt.f32.partialorder %v4195_v26, 0.0  ;;  %5630 = vrot.lane.b32.xlu0 %v5629_v61, %s5872_s17  ;;  %v4483_v13 = vadd.f32 %v4482_v20, %v4481_v46 }
0x195a   : > { %v6675_v33 = vsel %vm4198_vm2, 1.0, %v5851_v9  ;;  %v6678_v39 = vsel %vm4197_vm5, 1.0, %v5851_v9  ;;  %v4538_v53 = vsel %vm4145_vm1, %v4375_v24, 0.0  ;;  %v4539_v8 = vsel %vm4145_vm1, %v4376_v63, 0.0 }
0x195b   : > { %v6682_v31 = vpack.i.bf16 %v6675_v33, %v6678_v39  ;;  %v4501_v44 = vsel %vm4145_vm1, %v6675_v33, 0.0  ;;  %v4500_v54 = vsel %vm4145_vm1, %v6678_v39, 0.0  ;;  %v4484_v12 = vrot.slane %v4483_v13, 4 }
0x195c   : > { %v4502_v48 = vadd.f32 %v4501_v44, %v4500_v54  ;;  %v4448_v47 = vrot.slane %v4447_v4, 2  ;;  %v4540_v14 = vadd.f32 %v4539_v8, %v4538_v53  ;;  %v5873_v24 = vmov 2  }
0x195d   : > { %5635 = vrot.lane.b32.xlu1 %v6682_v31, %s5872_s17  ;;  %v4485_v43 = vadd.f32 %v4484_v12, %v4483_v13  ;;  %s5751_s17 = sshll.u32 %s5875_s20, 4  ;;  %s5752_s17 = int_to_ptr.vmem [resolvable:$false] %s5751_s17 }
0x195e   : > { %v4503_v10 = vrot.slane %v4502_v48, 4  ;;  %v4449_v26 = vadd.f32 %v4448_v47, %v4447_v4  ;;  %s5753_s19 = scalar_lea.vmem %s5752_s17, 512  ;;  %p5754_p2 = scmp.lt.s32.totalorder %s6795_s18, %s5752_s17 }
0x1960   : > { %v4504_v61 = vadd.f32 %v4503_v10, %v4502_v48 }
0x1978   : > { %385 = vadd.xlane.f32.xlu0 %v384_v41 }
0x1981   : > { %388 = vadd.xlane.f32.xlu1 %v387_v11  ;;  %v4486_v11 = vrot.slane %v4485_v43, 2 }
0x19cb   : > { %v5631_v32 = vpop.permute.xlu0 %5630 }
0x19cc   : > { %v5633_v36 = vunpack.i.h.bf16 %v5631_v32  ;;  %v5632_v35 = vunpack.i.l.bf16 %v5631_v32  ;;  %v4541_v32 = vrot.slane %v4540_v14, 4 }
0x19ce   : > { %v5458_v60 = vpack.c.bf16 %v5633_v36, %v5632_v35 }
0x19cf   : > { %v5636_v9 = vpop.permute.xlu1 %5635 }
0x19d0   : > { %v5638_v37 = vunpack.i.h.bf16 %v5636_v9  ;;  %v5637_v21 = vunpack.i.l.bf16 %v5636_v9  ;;  %5459 = vmatprep.subr.bf16.mxu1 %v5458_v60  ;;  %v4450_v9 = vrot.slane %v4449_v26, 1 }
0x19d1   : > { %5461 = vmatpush3.bf16.msra.mxu1 %v5458_v60 }
0x19d2   : > { %v5462_v40 = vpack.c.bf16 %v5638_v37, %v5637_v21 }
0x19d4   : > { %5313 = vmatmul.mubr.msk.f32.vlgmr.msra.gmra.mrb[26].mxu1 %vm383_vm0, %v5718_v42  ;;  %5463 = vmatprep.subr.bf16.mxu1 %v5462_v40 }
0x19d5   : > { %5465 = vmatpush3.bf16.msra.mxu1 %v5462_v40  ;;  %5319 = vmatprep.mubr.msk.f32.mxu1 %vm383_vm0, %v6582_v15  ;;  %v4487_v40 = vadd.f32 %v4486_v11, %v4485_v43 }
0x19d8   : > { %5320 = vmatmul.mubr.msk.f32.vlgmr.msra.gmra.mrb[28].mxu1 %vm383_vm0, %v5718_v42  ;;  %vm4406_vm0 = vcmp.eq.s32.totalorder %v6251_v51, 0 }
0x1a05   : > { %v6695_v22 = vpop.xlane.xlu0 %385 }
0x1a06   : > { %v4369_v23 = vmul.f32 %v6375_v25, %v6695_v22  ;;  %v4371_v34 = vmul.f32 %v6666_v28, %v6695_v22  ;;  %v4373_v56 = vmul.f32 %v6678_v39, %v6695_v22 }
0x1a08   : > { %v4424_v38 = vsel %vm4423_vm6, %v4369_v23, 0.0  ;;  %v4462_v0 = vsel %vm4145_vm1, %v4371_v34, 0.0  ;;  %v4519_v49 = vsel %vm4145_vm1, %v4373_v56, 0.0  ;;  %v4542_v23 = vadd.f32 %v4541_v32, %v4540_v14 }
0x1a0e   : > { %v6693_v50 = vpop.xlane.xlu1 %388 }
0x1a0f   : > { %v4370_v59 = vmul.f32 %v6372_v1, %v6693_v50  ;;  %v4372_v15 = vmul.f32 %v6668_v17, %v6693_v50  ;;  %v4374_v1 = vmul.f32 %v6675_v33, %v6693_v50 }
0x1a11   : > { %v4425_v62 = vsel %vm4423_vm6, %v4370_v59, 0.0  ;;  %v4463_v25 = vsel %vm4145_vm1, %v4372_v15, 0.0  ;;  %v4520_v3 = vsel %vm4145_vm1, %v4374_v1, 0.0  ;;  %v4505_v59 = vrot.slane %v4504_v61, 2 }
0x1a12   : > { %v4426_v6 = vadd.f32 %v4425_v62, %v4424_v38  ;;  %v4464_v5 = vadd.f32 %v4463_v25, %v4462_v0  ;;  %v4521_v19 = vadd.f32 %v4520_v3, %v4519_v49  ;;  %v4451_v15 = vadd.f32 %v4450_v9, %v4449_v26 }
0x1a13   : > { %v4488_v38 = vrot.slane %v4487_v40, 1  ;;  %v4506_v34 = vadd.f32 %v4505_v59, %v4504_v61  ;;  %v5874_v3 = vmov 2.0  }
0x1a14   : > { %v4427_v57 = vrot.slane %v4426_v6, 4  ;;  %v4465_v7 = vrot.slane %v4464_v5, 4  ;;  %v4522_v58 = vrot.slane %v4521_v19, 4  ;;  %v4412_v4 = vrot.slane %v5874_v3, 4 }
0x1a15   : > { %v4489_v1 = vadd.f32 %v4488_v38, %v4487_v40  ;;  %v4507_v25 = vrot.slane %v4506_v34, 1 }
0x1a16   : > { %v4428_v52 = vadd.f32 %v4427_v57, %v4426_v6  ;;  %v4466_v16 = vadd.f32 %v4465_v7, %v4464_v5  ;;  %v4523_v60 = vadd.f32 %v4522_v58, %v4521_v19  ;;  %v4543_v6 = vrot.slane %v4542_v23, 2 }
0x1a17   : > { %v4508_v57 = vadd.f32 %v4507_v25, %v4506_v34  ;;  %v4399_v5 = vadd.f32 %v6693_v50, %v6695_v22  ;;  %v4413_v49 = vadd.f32 2.0, %v4412_v4 }
0x1a18   : > { %v4429_v27 = vrot.slane %v4428_v52, 2  ;;  %v4467_v35 = vrot.slane %v4466_v16, 2  ;;  %v4524_v62 = vrot.slane %v4523_v60, 2  ;;  %v4544_v55 = vadd.f32 %v4543_v6, %v4542_v23 }
0x1a19   : > { %v4400_v63 = vrot.slane %v4399_v5, 4  ;;  %v4414_v47 = vrot.slane %v4413_v49, 2 }
0x1a1a   : > { %v4430_v42 = vadd.f32 %v4429_v27, %v4428_v52  ;;  %v4468_v2 = vadd.f32 %v4467_v35, %v4466_v16  ;;  %v4525_v20 = vadd.f32 %v4524_v62, %v4523_v60  ;;  %v4545_v13 = vrot.slane %v4544_v55, 1 }
0x1a1b   : > { %v4401_v48 = vadd.f32 %v4400_v63, %v4399_v5  ;;  %v4415_v61 = vadd.f32 %v4414_v47, %v4413_v49 }
0x1a1c   : > { %v4431_v21 = vrot.slane %v4430_v42, 1  ;;  %v4469_v46 = vrot.slane %v4468_v2, 1  ;;  %v4526_v0 = vrot.slane %v4525_v20, 1  ;;  %v4546_v54 = vadd.f32 %v4545_v13, %v4544_v55 }
0x1a1d   : > { %v4402_v8 = vrot.slane %v4401_v48, 2  ;;  %v4416_v35 = vrot.slane %v4415_v61, 1 }
0x1a1e   : > { %v4432_v18 = vadd.f32 %v4431_v21, %v4430_v42  ;;  %v4470_v56 = vadd.f32 %v4469_v46, %v4468_v2  ;;  %v4527_v44 = vadd.f32 %v4526_v0, %v4525_v20 }
0x1a1f   : > { %v4417_v40 = vadd.f32 %v4416_v35, %v4415_v61 }
0x1aa7   : > { %v5314_v41 = vpop.f32.mrb[26].mxu1 }
0x1aa8   : > { %4381 = vrot.lane.b32.xlu1 %v5314_v41, %s5870_s25  ;;  %v4277_v36 = vpop.f32.mrb[27].mxu1 }
0x1aa9   : > { %4379 = vrot.lane.b32.xlu0 %v4277_v36, %s5870_s25 }
0x1aab   : > { %v5321_v37 = vpop.f32.mrb[28].mxu1 }
0x1aac   : > { %4391 = vrot.lane.b32.xlu1 %v5321_v37, %s5870_s25  ;;  %v4360_v45 = vpop.f32.mrb[29].mxu1 }
0x1aad   : > { %4389 = vrot.lane.b32.xlu0 %v4360_v45, %s5870_s25  ;;  %v4419_v45 = vsel %vm4418_vm8, %v4417_v40, 0.0  ;;  %s5747_s25 = scalar_lea.vmem %s6795_s18, 256 }
0x1aae   : > { %p5748_p6 = scmp.ne.s32.totalorder %s6795_s18, %s5747_s25  ;;  %p5755_p3 = scmp.lt.s32.totalorder %s5753_s19, %s5747_s25 }
0x1ab0   : > { %4455 = vperm.xlu1 %5568, %v4451_v15   ;;  %p5749_p10 = pnand %p5748_p6, %p6902_p9  ;;  %p5756_p4 = por %p5755_p3, %p5754_p2 }
0x1ab1   : > { %4436 = vperm.xlu0 %5567, %v4432_v18  }
0x1ab2   : > { %p5750_p12 = pneg %p5749_p10 }
0x1ab4   : > { %5640 = vset.pattern.permute.xlu1 %v5873_v24  ;;  %p5757_p7 = pnand %p5756_p4, %p5750_p12 }
0x1ab5   : > { %4493 = vperm.xlu1 %5640, %v4489_v1   ;;  %5639 = vset.pattern.permute.xlu0 %v5873_v24 }
0x1ab6   : > { %4474 = vperm.xlu0 %5639, %v4470_v56  }
0x1ab9   : > { %4512 = vperm.xlu1 %5640, %v4508_v57  }
0x1aba   : > { %4531 = vperm.xlu0 %5639, %v4527_v44  }
0x1abd   : > { %4550 = vperm.xlu1 %5640, %v4546_v54  }
0x1abe   : > { %4595 = vperm.xlu0 %5639, %v6666_v28  }
0x1ac1   : > { %4599 = vperm.xlu1 %5640, %v6668_v17  }
0x1ac2   : > { %5642 = vperm.xlu0 %5639, %v6682_v31  }
0x1b1a   : > { %v4382_v52 = vpop.permute.xlu1 %4381 }
0x1b1b   : > { %v4386_v12 = vmul.f32 %v4382_v52, %v6668_v17  ;;  %v4380_v19 = vpop.permute.xlu0 %4379  ;;  %v4403_v17 = vadd.f32 %v4402_v8, %v4401_v48 }
0x1b1c   : > { %v4385_v7 = vmul.f32 %v4380_v19, %v6666_v28 }
0x1b1d   : > { %v4558_v53 = vsel %vm4145_vm1, %v4386_v12, 0.0  ;;  %v4404_v36 = vrot.slane %v4403_v17, 1 }
0x1b1e   : > { %v4557_v31 = vsel %vm4145_vm1, %v4385_v7, 0.0  ;;  %v4392_v10 = vpop.permute.xlu1 %4391 }
0x1b1f   : > { %v4559_v27 = vadd.f32 %v4558_v53, %v4557_v31  ;;  %v4396_v43 = vmul.f32 %v6675_v33, %v4392_v10  ;;  %v4390_v14 = vpop.permute.xlu0 %4389  ;;  %v4405_v21 = vadd.f32 %v4404_v36, %v4403_v17  ;;  %v4620_v17 = vsel %vm4452_vm10, %v6695_v22, 0.0 }
0x1b20   : > { %v4395_v16 = vmul.f32 %v6678_v39, %v4390_v14  ;;  %v4617_v14 = vsel %vm4433_vm9, %v6401_v29, 0.0 }
0x1b21   : > { %v4560_v58 = vrot.slane %v4559_v27, 4  ;;  %v4577_v26 = vsel %vm4145_vm1, %v4396_v43, 0.0  ;;  %v4407_v23 = vsel %vm4406_vm0, %v4405_v21, 0.0  ;;  %v4616_v43 = vsel %vm4433_vm9, %v6403_v30, 0.0 }
0x1b22   : > { %v4576_v28 = vsel %vm4145_vm1, %v4395_v16, 0.0  ;;  %v4420_v18 = vadd.f32 %v4419_v45, %v4407_v23 }
0x1b23   : > { %v4561_v41 = vadd.f32 %v4560_v58, %v4559_v27  ;;  %v4578_v42 = vadd.f32 %v4577_v26, %v4576_v28  ;;  %v4621_v26 = vsel %vm4452_vm10, %v6693_v50, 0.0 }
0x1b25   : > { %v4562_v11 = vrot.slane %v4561_v41, 2  ;;  %v4579_v32 = vrot.slane %v4578_v42, 4 }
0x1b27   : > { %v4563_v60 = vadd.f32 %v4562_v11, %v4561_v41  ;;  %v4580_v9 = vadd.f32 %v4579_v32, %v4578_v42 }
0x1b29   : > { %v4581_v37 = vrot.slane %v4580_v9, 2  ;;  %v4564_v33 = vrot.slane %v4563_v60, 1 }
0x1b2b   : > { %v4582_v39 = vadd.f32 %v4581_v37, %v4580_v9  ;;  %v4565_v59 = vadd.f32 %v4564_v33, %v4563_v60 }
0x1b2d   : > { %4569 = vperm.xlu1 %5640, %v4565_v59   ;;  %v4583_v2 = vrot.slane %v4582_v39, 1 }
0x1b2f   : > { %v4456_v62 = vpop.permute.xlu1 %4455  ;;  %v4584_v15 = vadd.f32 %v4583_v2, %v4582_v39 }
0x1b30   : > { %v4437_v38 = vpop.permute.xlu0 %4436  ;;  %v4458_v46 = vsel %vm4452_vm10, %v4456_v62, 0.0 }
0x1b31   : > { %v4439_v34 = vsel %vm4433_vm9, %v4437_v38, 0.0  ;;  %4588 = vperm.xlu0 %5639, %v4584_v15  }
0x1b32   : > { %v4440_v6 = vadd.f32 %v4439_v34, %v4420_v18 }
0x1b34   : > { %v4494_v20 = vpop.permute.xlu1 %4493  ;;  %v4459_v1 = vadd.f32 %v4458_v46, %v4440_v6 }
0x1b35   : > { %v4475_v25 = vpop.permute.xlu0 %4474  ;;  %v4496_v56 = vsel %vm4490_vm14, %v4494_v20, 0.0 }
0x1b36   : > { %v4477_v55 = vsel %vm4471_vm11, %v4475_v25, 0.0 }
0x1b37   : > { %v4478_v24 = vadd.f32 %v4477_v55, %v4459_v1 }
0x1b38   : > { %v4513_v0 = vpop.permute.xlu1 %4512 }
0x1b39   : > { %v4497_v57 = vadd.f32 %v4496_v56, %v4478_v24  ;;  %v4515_v13 = vsel %vm4509_vm13, %v4513_v0, 0.0  ;;  %v4532_v44 = vpop.permute.xlu0 %4531 }
0x1b3a   : > { %v4534_v5 = vsel %vm4528_vm15, %v4532_v44, 0.0 }
0x1b3b   : > { %v4516_v54 = vadd.f32 %v4515_v13, %v4497_v57 }
0x1b3c   : > { %v4551_v63 = vpop.permute.xlu1 %4550 }
0x1b3d   : > { %v4535_v3 = vadd.f32 %v4534_v5, %v4516_v54  ;;  %v4553_v4 = vsel %vm4547_vm3, %v4551_v63, 0.0  ;;  %v4596_v48 = vpop.permute.xlu0 %4595 }
0x1b3e   : > { %v4602_v53 = vsel %vm4406_vm0, %v4596_v48, 0.0 }
0x1b3f   : > { %v6763_v49 = vadd.f32 %v4553_v4, %v4535_v3 }
0x1b40   : > { %v4600_v52 = vpop.permute.xlu1 %4599 }
0x1b41   : > { %v5643_v12 = vpop.permute.xlu0 %5642  ;;  %v4603_v8 = vsel %vm4406_vm0, %v4600_v52, 0.0 }
0x1b42   : > { %v5645_v19 = vunpack.i.h.bf16 %v5643_v12  ;;  %v5644_v7 = vunpack.i.l.bf16 %v5643_v12 }
0x1b44   : > { %v4613_v47 = vsel %vm4418_vm8, %v5645_v19, 0.0  ;;  %v4612_v31 = vsel %vm4418_vm8, %v5644_v7, 0.0 }
0x1b45   : > { %v4615_v10 = vadd.f32 %v4613_v47, %v4603_v8  ;;  %v4614_v27 = vadd.f32 %v4612_v31, %v4602_v53 }
0x1b47   : > { %v4619_v16 = vadd.f32 %v4617_v14, %v4615_v10  ;;  %v4618_v58 = vadd.f32 %v4616_v43, %v4614_v27 }
0x1b49   : > { %v4623_v30 = vadd.f32 %v4621_v26, %v4619_v16  ;;  %v4622_v29 = vadd.f32 %v4620_v17, %v4618_v58 }
0x1b4b   : > { %4625 = vst [vmem:[%s332_s13 + $0x8] sm:$0xff] %v4623_v30  ;;  %4624 = vst [vmem:[%s332_s13] sm:$0xff] %v4622_v29 }
0x1b4c   : > { %5760 = shalt.err (!%p5757_p7)
}
0x1b4d   : > { %s5761_s10 = scalar_lea.hbm %s6793_s23, 256  ;;  %s5765_s22 = scalar_lea.hbm %s6880_s7, 512 }
0x1b4e   : > { %p5762_p8 = scmp.ne.s32.totalorder %s6793_s23, %s5761_s10  ;;  %p5766_p1 = scmp.lt.u32.totalorder %s6793_s23, %s6880_s7 }
0x1b4f   : > { %p5767_p0 = scmp.lt.u32.totalorder %s5765_s22, %s5761_s10  ;;  %p5769_p6 = scmp.lt.u32.totalorder %s5761_s10, %s6793_s23 }
0x1b50   : > { %p5763_p11 = pnand %p5762_p8, %p6902_p9 }
0x1b51   : > { %p5768_p5 = por %p5767_p0, %p5766_p1 }
0x1b52   : > { %p5764_p13 = pneg %p5763_p11 }
0x1b53   : > { %p5770_p10 = por %p5769_p6, %p5768_p5 }
0x1b55   : > { %p5771_p12 = pnand %p5770_p10, %p5764_p13 }
0x1b57   : > { %5774 = shalt.err (!%p5771_p12)
}
0x1b58   : > { %s5876_s25 = smov 128   ;;  %s4783_s19 = sshll.u32 %s6766_s26, 3  ;;  %vm4566_vm7 = vcmp.eq.s32.totalorder %v6251_v51, 9  ;;  %vm4585_vm4 = vcmp.eq.s32.totalorder %v6251_v51, 10 }
0x1b59   : > { %5488 = dma.vmem_to_hbm [thread:$0]  (%p6902_p9), %s6795_s18, 256, %s6793_s23, %s4627_s24, %s5876_s25, %s5876_s25, %s5857_s12  }
0x1b5a   : > { %s4894_s10 = sshll.u32 %s5944_s9, 7  ;;  %s339_s13 = scalar_lea.vmem [#allocation6], %s4783_s19 }
0x1b5b   : > { %s4661_s21 = sshll.u32 %s339_s13, 4  ;;  %s6830_s12 = scalar_lea.hbm %s6881_s8, %s4894_s10  ;;  %s6832_s21 = int_to_ptr.vmem [resolvable:$true] %s4661_s21 }
0x1b5c   : > { %s4632_s18 = scalar_lea.sflag [#allocation7], %s6766_s26  ;;  %s5775_s9 = scalar_lea.vmem %s6832_s21, 128 }
0x1b5d   : > { %p5776_p2 = scmp.ne.s32.totalorder %s6832_s21, %s5775_s9  ;;  %s5877_s23 = smov [#allocation6]  }
0x1b5e   : > { %s5779_s24 = sshll.u32 %s5877_s23, 4  ;;  %s5780_s24 = int_to_ptr.vmem [resolvable:$false] %s5779_s24 }
0x1b5f   : > { %p5777_p3 = pnand %p5776_p2, %p6902_p9  ;;  %s5781_s17 = scalar_lea.vmem %s5780_s24, 256 }
0x1b60   : > { %p5782_p7 = scmp.lt.s32.totalorder %s6832_s21, %s5780_s24  ;;  %p5783_p8 = scmp.lt.s32.totalorder %s5781_s17, %s5775_s9 }
0x1b61   : > { %p5778_p4 = pneg %p5777_p3 }
0x1b62   : > { %p5784_p11 = por %p5783_p8, %p5782_p7 }
0x1b64   : > { %p5785_p13 = pnand %p5784_p11, %p5778_p4 }
0x1bac   : > { %v4570_v50 = vpop.permute.xlu1 %4569 }
0x1bad   : > { %v4572_v22 = vsel %vm4566_vm7, %v4570_v50, 0.0 }
0x1bae   : > { %v4573_v61 = vadd.f32 %v4572_v22, %v6763_v49 }
0x1bb0   : > { %v4589_v28 = vpop.permute.xlu0 %4588 }
0x1bb1   : > { %v4591_v41 = vsel %vm4585_vm4, %v4589_v28, 0.0 }
0x1bb2   : > { %v4592_v42 = vadd.f32 %v4591_v41, %v4573_v61 }
0x1bb4   : > { %4593 = vst [vmem:[%s339_s13] sm:$0xff] %v4592_v42 }
0x1bb5   : > { %5788 = shalt.err (!%p5785_p13)
}
0x1bb6   : > { %s5789_s26 = scalar_lea.hbm %s6830_s12, 128  ;;  %s5793_s10 = scalar_lea.hbm %s6881_s8, 256 }
0x1bb7   : > { %p5790_p1 = scmp.ne.s32.totalorder %s6830_s12, %s5789_s26  ;;  %p5794_p6 = scmp.lt.u32.totalorder %s6830_s12, %s6881_s8 }
0x1bb8   : > { %p5795_p10 = scmp.lt.u32.totalorder %s5793_s10, %s5789_s26  ;;  %p5797_p2 = scmp.lt.u32.totalorder %s5789_s26, %s6830_s12 }
0x1bb9   : > { %p5791_p0 = pnand %p5790_p1, %p6902_p9 }
0x1bba   : > { %p5796_p12 = por %p5795_p10, %p5794_p6 }
0x1bbb   : > { %p5792_p5 = pneg %p5791_p0 }
0x1bbc   : > { %p5798_p3 = por %p5797_p2, %p5796_p12 }
0x1bbe   : > { %p5799_p4 = pnand %p5798_p3, %p5792_p5 }
0x1bc0   : > { %5802 = shalt.err (!%p5799_p4)
}
0x1bc1   : > { %5489 = dma.vmem_to_hbm [thread:$0]  (%p6902_p9), %s6832_s21, 128, %s6830_s12, %s4632_s18  }
0x1bc2 PF: > { %p5505_p7 = scmp.ge.s32.totalorder %s5845_s30, 2  ;;  %s4673_s20 = sand.u32 1, %s5833_s27  }
0x1bc3   : > { %p6903_p8 = scmp.ne.s32.totalorder %s6886_s16, 0  ;;  %s4674_s9 = scalar_lea.sflag [#allocation4], %s4673_s20 }
0x1bc5   : > { %p5497_p11 = pnand %p5505_p7, %p6903_p8 }
0x1bc7   : > { %5824 = dma.done.wait (!%p5497_p11), %s4674_s9, 256  }
0x1bc8   : > { %5826 = vsyncadd (!%p5497_p11), %s4674_s9, 4294967040  ;;  %s4683_s23 = scalar_lea.sflag [#allocation7], %s4673_s20 }
0x1bc9   : > { %5828 = dma.done.wait (!%p5497_p11), %s4683_s23, 128  }
0x1bca   : > { %5830 = vsyncadd (!%p5497_p11), %s4683_s23, 4294967168  ;;  %p23_p9 = scmp.ge.s32.totalorder %s5948_s11, 4   ;;  %s6904_s27 = smov %s5837_s28 }
0x1bcb   : > { %s6905_s28 = smov %s5841_s29  ;;  %s6906_s29 = smov %s5959_s14 }
0x1bcc   : > { %s6907_s30 = smov %s5948_s11  ;;  %25 = sbr.rel (!%p23_p9) target bundleno = 6 (0x6), region = 114 }
0x1bd3   :  { %4688 = vsyncpa [#allocation3], 1 }
0x1bd4   :  { %4690 = vsyncpa [#allocation3 + $0x1], 1 }
0x1bd5   :  { %4691 = vsyncpa [#allocation4], 1 }
0x1bd6   :  { %4693 = vsyncpa [#allocation4 + $0x1], 1 }
0x1bd7   :  { %4694 = vsyncpa [#allocation7], 1 }
0x1bd8   :  { %4696 = vsyncpa [#allocation7 + $0x1], 1 }

</bundles_post_ra>
